<compile_context>
chip_gen: v5e
topology: v5e:2x2
jax: 0.10.0
libtpu: 0.0.40
codegen_flags: <defaults>
</compile_context>

<pallas_src>
import math

import jax
import jax.numpy as jnp
from jax.experimental import pallas as pl
from jax.experimental.pallas import tpu as pltpu


# ------------------------------------------------------------------------ kernel

def day_branch_kernel(
        x_ref,        # (T, B)    raw input (time-major)
        xr_ref,       # (T, B)    time-reversed raw input
        bn_ref,       # (T, 4)    [scale, shift, scale_rev, shift_rev]
        w0in_ref,     # (2, G)    layer-0 input rows: [fwd cols; bwd cols]
        whh0_ref,     # (H2, G)   layer-0 fused (block-diagonal) recurrent weight
        w1big_ref,    # (2H2, G)  layer-1 combined input weight (loop-order seq layout)
        whh1_ref,     # (H2, G)   layer-1 fused recurrent weight
        lstm_b_ref,   # (2, G)    fused biases (b_ih + b_hh) for layer 0 / layer 1
        wa1_ref,      # (H2, Ha)  attention Linear 1
        wa2_ref,      # (1, Ha)   attention Linear 2 (row vector)
        wf1_ref,      # (H2, H2)  fc Linear 1
        wf2_ref,      # (H2, O)   fc Linear 2
        head_b_ref,   # (4, W)    packed biases: [ba1, ba2, bf1, bf2] (zero padded)
        out_ref,      # (B, O)
        # scratch
        gate_ref,     # (T, B, G)     precombined gate inputs for the current layer
        seq_ref,      # (T, B, 2*H2)  per-step fused outputs, stored in both orders
):
    T, B = x_ref.shape
    H2 = whh0_ref.shape[0]          # 2 * H  (= hidden_dim)
    H = H2 // 2
    G = 4 * H2                      # 8 * H  (fused gate width)
    Ha = wa1_ref.shape[1]
    OUT = out_ref.shape[1]

    def run_layer(whh):
        """One fused bidirectional layer: fwd processes time s, bwd time T-1-s.
        h/c live in registers; each step reads one precombined slab and does one
        recurrent matmul; h is stored full-width at both s and T-1-s."""
        h = jnp.zeros((B, H2), jnp.float32)
        c = jnp.zeros((B, H2), jnp.float32)
        for s in range(T):          # fully unrolled (T small & static)
            gates = gate_ref[s] + jnp.dot(h, whh,
                                          preferred_element_type=jnp.float32)  # (B, G)
            # sigmoid(x) = 0.5 * tanh(0.5 x) + 0.5  -> one EUP op per vreg
            sg = 0.5 * jnp.tanh(0.5 * gates[:, 0:3 * H2]) + 0.5                # i | f | o
            i = sg[:, 0:H2]
            f = sg[:, H2:2 * H2]
            o = sg[:, 2 * H2:3 * H2]
            g = jnp.tanh(gates[:, 3 * H2:G])
            c = f * c + i * g
            h = o * jnp.tanh(c)
            seq_ref[s, :, 0:H2] = h                  # loop order
            seq_ref[T - 1 - s, :, H2:2 * H2] = h     # reversed order

    # --- BatchNorm1d (eval) folded to scale/shift; layer-0 gate inputs, precombined ---
    xb = x_ref[...] * bn_ref[:, 0:1] + bn_ref[:, 1:2]       # (T, B) normalised x
    xbr = xr_ref[...] * bn_ref[:, 2:3] + bn_ref[:, 3:4]     # (T, B) = xb time-reversed
    gate_ref[...] = (xb[:, :, None] * w0in_ref[0:1, :][None, :, :]
                     + xbr[:, :, None] * w0in_ref[1:2, :][None, :, :]
                     + lstm_b_ref[0:1, :][None, :, :])

    # --- bidirectional LSTM layer 0 ---
    run_layer(whh0_ref[...])

    # --- layer-1 gate inputs: ONE dense matmul over the "both orders" seq buffer ---
    sflat = seq_ref[...].reshape(T * B, 2 * H2)
    gate_ref[...] = (jnp.dot(sflat, w1big_ref[...],
                             preferred_element_type=jnp.float32).reshape(T, B, G)
                     + lstm_b_ref[1:2, :][None, :, :])

    # --- bidirectional LSTM layer 1 (reuses seq_ref; gate_ref already built) ---
    run_layer(whh1_ref[...])

    # --- time-ordered features [fwd(t) | bwd(t)] straight out of the seq buffer ---
    feats = jnp.concatenate([seq_ref[:, :, 0:H], seq_ref[:, :, H2 + H:2 * H2]],
                            axis=-1)                                       # (T, B, H2)

    # --- attention pooling over time ---
    ff = feats.reshape(T * B, H2)
    hid = jnp.maximum(jnp.dot(ff, wa1_ref[...], preferred_element_type=jnp.float32)
                      + head_b_ref[0:1, 0:Ha], 0.0)                        # (T*B, Ha)
    sc = (jnp.sum(hid.reshape(T, B, Ha) * wa2_ref[0:1, :][None, :, :],
                  axis=-1, keepdims=True)
          + head_b_ref[1:2, 0:1][None, :, :])                              # (T, B, 1)
    m = jnp.max(sc, axis=0, keepdims=True)
    e = jnp.exp(sc - m)
    w = e / jnp.sum(e, axis=0, keepdims=True)                              # softmax over T
    attended = jnp.sum(feats * w, axis=0)                                  # (B, H2)

    # --- fc head: Linear -> ReLU -> (Dropout = id) -> Linear ---
    h1 = jnp.maximum(jnp.dot(attended, wf1_ref[...],
                             preferred_element_type=jnp.float32)
                     + head_b_ref[2:3, 0:H2], 0.0)
    out_ref[...] = (jnp.dot(h1, wf2_ref[...], preferred_element_type=jnp.float32)
                    + head_b_ref[3:4, 0:OUT])


# ------------------------------------------------------------------------ packing

def pack_params(p):
    """Fuse per-direction LSTM weights into interleaved fused-gate arrays, build the
    combined layer-1 input weight for the 'both orders' seq layout, fold BatchNorm to
    scale/shift (plus time-reversed copies), and pack small biases. All host-side."""
    H = p['l0f'][1].shape[0]
    H2 = 2 * H

    # Fused gate-column order: [i_f,i_b, f_f,f_b, o_f,o_b, g_f,g_b]
    # (torch gate order i=0, f=1, g=2, o=3 -> fused block order i, f, o, g)
    def interleave_cols(mf, mb):
        cols = []
        for k in (0, 1, 3, 2):
            cols.append(mf[:, k * H:(k + 1) * H])
            cols.append(mb[:, k * H:(k + 1) * H])
        return jnp.concatenate(cols, axis=1)

    def fuse_layer(pf, pb):
        wih_f, whh_f, b_f = pf
        wih_b, whh_b, b_b = pb
        zin = jnp.zeros_like(wih_f)
        zh = jnp.zeros_like(whh_f)
        w_in_f = interleave_cols(wih_f, jnp.zeros_like(wih_b))   # fwd input -> fwd cols
        w_in_b = interleave_cols(zin, wih_b)                     # bwd input -> bwd cols
        whh = jnp.concatenate([interleave_cols(whh_f, zh),       # h_f -> fwd cols
                               interleave_cols(zh, whh_b)],      # h_b -> bwd cols
                              axis=0)                            # (2H, 8H)
        b = interleave_cols(b_f, b_b)                            # (1, 8H)
        return w_in_f, w_in_b, whh, b

    w0f, w0b, whh0, b0 = fuse_layer(p['l0f'], p['l0b'])          # w0f/w0b: (1, 8H)
    w1f, w1b, whh1, b1 = fuse_layer(p['l1f'], p['l1b'])          # w1f/w1b: (2H, 8H)

    # Layer-1 combined input weight for the loop-order seq layout
    # seq[s] features = [fwd(s)(H) | bwd(T-1-s)(H) | fwd(T-1-s)(H) | bwd(s)(H)]
    w1big = jnp.concatenate([w1f[0:H], w1b[H:H2], w1b[0:H], w1f[H:H2]], axis=0)  # (2H2, 8H)

    # BatchNorm1d (eval) folded to per-feature scale/shift plus reversed copies, (T, 4).
    bn = p['bn']
    scale = bn[0] * jax.lax.rsqrt(bn[3] + 1e-5)
    shift = bn[1] - bn[2] * scale
    bn_ts = jnp.stack([scale, shift, scale[::-1], shift[::-1]], axis=1).astype(jnp.float32)

    out_dim = p['wf2'].shape[1]
    Ha = p['wa1'].shape[1]
    W = max(Ha, 1, H2, out_dim)
    head_b = jnp.zeros((4, W), jnp.float32)
    head_b = head_b.at[0, :Ha].set(p['ba1'][0])
    head_b = head_b.at[1, :1].set(p['ba2'][0])
    head_b = head_b.at[2, :H2].set(p['bf1'][0])
    head_b = head_b.at[3, :out_dim].set(p['bf2'][0])

    return dict(
        bn=bn_ts,                                        # (T, 4)
        w0in=jnp.concatenate([w0f, w0b], axis=0),        # (2, 8H)
        whh0=whh0,                                       # (2H, 8H)
        w1big=w1big,                                     # (4H, 8H)
        whh1=whh1,                                       # (2H, 8H)
        lstm_b=jnp.concatenate([b0, b1], axis=0),        # (2, 8H)
        wa1=p['wa1'],                                    # (2H, Ha)
        wa2row=jnp.transpose(p['wa2']),                  # (1, Ha)
        wf1=p['wf1'], wf2=p['wf2'],
        head_b=head_b,                                   # (4, W)
    )


# ------------------------------------------------------------------------ wrapper

def day_branch_forward(x, p, *, batch_block=None):
    B, T = x.shape
    H2 = p['wf1'].shape[0]          # hidden_dim
    G = 4 * H2                      # fused gate width 8H
    out_dim = p['wf2'].shape[1]
    packed = pack_params(p)

    # Pad batch to a multiple of 8 sublanes; optional batch grid ("parallel") so the
    # batch can be split across TensorCores / kept inside VMEM limits.
    if batch_block is None:
        BB = ((B + 7) // 8) * 8
    else:
        assert batch_block % 8 == 0
        BB = batch_block
    Bp = ((B + BB - 1) // BB) * BB
    nb = Bp // BB

    xT = jnp.pad(jnp.transpose(x), ((0, 0), (0, Bp - B)))            # (T, Bp)
    xTr = xT[::-1, :]                                                # time-reversed
    x3 = jnp.transpose(xT.reshape(T, nb, BB), (1, 0, 2))             # (nb, T, BB)
    x3r = jnp.transpose(xTr.reshape(T, nb, BB), (1, 0, 2))           # (nb, T, BB)

    def rep(arr):   # full-array block, replicated across the batch grid
        return pl.BlockSpec(arr.shape, lambda i: (0, 0))

    in_specs = [
        pl.BlockSpec((None, T, BB), lambda i: (i, 0, 0)),            # x (squeezed lead)
        pl.BlockSpec((None, T, BB), lambda i: (i, 0, 0)),            # x reversed
        rep(packed['bn']), rep(packed['w0in']), rep(packed['whh0']),
        rep(packed['w1big']), rep(packed['whh1']), rep(packed['lstm_b']),
        rep(packed['wa1']), rep(packed['wa2row']),
        rep(packed['wf1']), rep(packed['wf2']), rep(packed['head_b']),
    ]
    out_spec = pl.BlockSpec((BB, out_dim), lambda i: (i, 0))

    scratch = [
        pltpu.VMEM((T, BB, G), jnp.float32),         # precombined gate inputs
        pltpu.VMEM((T, BB, 2 * H2), jnp.float32),    # seq buffer (both orders, reused)
    ]

    # Explicit VMEM budget: scratch + double-buffered IO/weights + headroom
    # (capped below v7x's 64 MiB physical unless the user asks for huge tiles).
    scratch_bytes = 4 * T * BB * (G + 2 * H2)
    weight_bytes = 4 * sum(int(v.size) for v in packed.values())
    io_bytes = 4 * (2 * T * BB + BB * out_dim)
    vmem_limit = int(min(96 * 2 ** 20,
                         max(32 * 2 ** 20,
                             2 * scratch_bytes + 4 * (weight_bytes + io_bytes))))

    out = pl.pallas_call(
        day_branch_kernel,
        out_shape=jax.ShapeDtypeStruct((Bp, out_dim), jnp.float32),
        grid=(nb,),
        in_specs=in_specs,
        out_specs=out_spec,
        scratch_shapes=scratch,
        compiler_params=pltpu.CompilerParams(
            dimension_semantics=("parallel",),
            vmem_limit_bytes=vmem_limit),
    )(x3, x3r, packed['bn'], packed['w0in'], packed['whh0'], packed['w1big'],
      packed['whh1'], packed['lstm_b'], packed['wa1'], packed['wa2row'],
      packed['wf1'], packed['wf2'], packed['head_b'])
    return out[:B]


# ------------------------------------------------------------------------ params

def init_params(key, T, hidden_dim=32, out_dim=128):
    H = hidden_dim // 2
    HD = hidden_dim
    ks = iter(jax.random.split(key, 40))

    def unif(shape, fan_in):
        bound = 1.0 / math.sqrt(fan_in)
        return jax.random.uniform(next(ks), shape, jnp.float32, -bound, bound)

    def lstm_dir(in_dim):
        wih = unif((in_dim, 4 * H), H)                 # stored as (in, 4H) = W_ih^T
        whh = unif((H, 4 * H), H)                      # (H, 4H) = W_hh^T
        b = unif((1, 4 * H), H) + unif((1, 4 * H), H)  # b_ih + b_hh
        return (wih, whh, b)

    p = {}
    # BatchNorm1d defaults: gamma=1, beta=0, running_mean=0, running_var=1
    p['bn'] = jnp.stack([jnp.ones((T,)), jnp.zeros((T,)),
                         jnp.zeros((T,)), jnp.ones((T,))]).astype(jnp.float32)
    p['l0f'] = lstm_dir(1)
    p['l0b'] = lstm_dir(1)
    p['l1f'] = lstm_dir(HD)
    p['l1b'] = lstm_dir(HD)
    # Attention: Linear(HD, HD//2) -> ReLU -> Linear(HD//2, 1)
    p['wa1'] = unif((HD, HD // 2), HD)
    p['ba1'] = unif((1, HD // 2), HD)
    p['wa2'] = unif((HD // 2, 1), HD // 2)
    p['ba2'] = unif((1, 1), HD // 2)
    # fc: Linear(HD, HD) -> ReLU -> Dropout -> Linear(HD, 128)
    p['wf1'] = unif((HD, HD), HD)
    p['bf1'] = unif((1, HD), HD)
    p['wf2'] = unif((HD, out_dim), HD)
    p['bf2'] = unif((1, out_dim), HD)
    return p


# ------------------------------------------------------------------------ reference

def day_branch_ref(x, p):
    """Pure-JAX reference mirroring the PyTorch forward (eval mode)."""
    B, T = x.shape
    bn = p['bn']
    xb = (x - bn[2][None, :]) / jnp.sqrt(bn[3][None, :] + 1e-5) * bn[0][None, :] + bn[1][None, :]
    H = p['l0f'][1].shape[0]

    def cell(x_t, h, c, wih, whh, b):
        gates = x_t @ wih + h @ whh + b
        i = jax.nn.sigmoid(gates[:, :H])
        f = jax.nn.sigmoid(gates[:, H:2 * H])
        g = jnp.tanh(gates[:, 2 * H:3 * H])
        o = jax.nn.sigmoid(gates[:, 3 * H:])
        c = f * c + i * g
        return o * jnp.tanh(c), c

    def run(inputs, w, reverse):
        wih, whh, b = w
        h = jnp.zeros((B, H), jnp.float32)
        c = jnp.zeros((B, H), jnp.float32)
        outs = [None] * T
        order = range(T - 1, -1, -1) if reverse else range(T)
        for t in order:
            h, c = cell(inputs[t], h, c, wih, whh, b)
            outs[t] = h
        return outs

    xs = [xb[:, t:t + 1] for t in range(T)]
    l0 = [jnp.concatenate([a, b_], 1)
          for a, b_ in zip(run(xs, p['l0f'], False), run(xs, p['l0b'], True))]
    feats = [jnp.concatenate([a, b_], 1)
             for a, b_ in zip(run(l0, p['l1f'], False), run(l0, p['l1b'], True))]
    lstm_out = jnp.stack(feats, axis=1)                                   # (B, T, HD)
    sc = jnp.maximum(lstm_out @ p['wa1'] + p['ba1'], 0.0) @ p['wa2'] + p['ba2']  # (B,T,1)
    w = jax.nn.softmax(sc, axis=1)
    attended = jnp.sum(lstm_out * w, axis=1)                              # (B, HD)
    h1 = jnp.maximum(attended @ p['wf1'] + p['bf1'], 0.0)
    return h1 @ p['wf2'] + p['bf2']


# ------------------------------------------------------------------------ main

if __name__ == "__main__":
    root = jax.random.PRNGKey(0)

    def check(key, B, T, hidden_dim, out_dim, batch_block=None):
        kx, kp = jax.random.split(key)
        x = jax.random.normal(kx, (B, T), dtype=jnp.float32)
        params = init_params(kp, T, hidden_dim=hidden_dim, out_dim=out_dim)
        out = jax.block_until_ready(
            day_branch_forward(x, params, batch_block=batch_block))
        ref = day_branch_ref(x, params)
        assert out.shape == (B, out_dim), out.shape
        err = float(jnp.max(jnp.abs(out - ref)))
        assert jnp.allclose(out, ref, atol=1e-2, rtol=1e-2), err
        return err

    # Small config (batch is padded 4 -> 8 inside the wrapper).
    check(root, B=4, T=8, hidden_dim=32, out_dim=128)
    # Module defaults: DAY_LOOK_BACK=20, hidden_dim=128 (odd batch exercises padding).
    check(jax.random.fold_in(root, 1), B=3, T=20, hidden_dim=128, out_dim=128)
    # Multi-block batch grid (grid=(3,), "parallel" axis, last block partially padded).
    check(jax.random.fold_in(root, 2), B=20, T=8, hidden_dim=32, out_dim=128,
          batch_block=8)

    print("KERNEL_OK")
</pallas_src>

<mosaic_0001>
module attributes {stable_mosaic.version = 11 : i64} {
  func.func @day_branch_kernel(%arg0: i32, %arg1: memref<1x8x8xf32, #tpu.memory_space<vmem>>, %arg2: memref<1x8x8xf32, #tpu.memory_space<vmem>>, %arg3: memref<8x4xf32, #tpu.memory_space<vmem>>, %arg4: memref<2x128xf32, #tpu.memory_space<vmem>>, %arg5: memref<32x128xf32, #tpu.memory_space<vmem>>, %arg6: memref<64x128xf32, #tpu.memory_space<vmem>>, %arg7: memref<32x128xf32, #tpu.memory_space<vmem>>, %arg8: memref<2x128xf32, #tpu.memory_space<vmem>>, %arg9: memref<32x16xf32, #tpu.memory_space<vmem>>, %arg10: memref<1x16xf32, #tpu.memory_space<vmem>>, %arg11: memref<32x32xf32, #tpu.memory_space<vmem>>, %arg12: memref<32x128xf32, #tpu.memory_space<vmem>>, %arg13: memref<4x128xf32, #tpu.memory_space<vmem>>, %arg14: memref<8x128xf32, #tpu.memory_space<vmem>>, %arg15: memref<8x8x128xf32, #tpu.memory_space<vmem>>, %arg16: memref<8x8x64xf32, #tpu.memory_space<vmem>>) attributes {dimension_semantics = [#tpu.dimension_semantics<parallel>], iteration_bounds = array<i64: 1>, scalar_prefetch = 0 : i64, scratch_operands = 2 : i64, tpu.core_type = #tpu.core_type<tc>, window_params = [{transform_indices = @transform_0, window_bounds = array<i64: 1, 8, 8>}, {transform_indices = @transform_1, window_bounds = array<i64: 1, 8, 8>}, {pipeline_mode = #tpu.pipeline_mode<synchronous>, transform_indices = @transform_2, window_bounds = array<i64: 8, 4>}, {pipeline_mode = #tpu.pipeline_mode<synchronous>, transform_indices = @transform_3, window_bounds = array<i64: 2, 128>}, {pipeline_mode = #tpu.pipeline_mode<synchronous>, transform_indices = @transform_4, window_bounds = array<i64: 32, 128>}, {pipeline_mode = #tpu.pipeline_mode<synchronous>, transform_indices = @transform_5, window_bounds = array<i64: 64, 128>}, {pipeline_mode = #tpu.pipeline_mode<synchronous>, transform_indices = @transform_6, window_bounds = array<i64: 32, 128>}, {pipeline_mode = #tpu.pipeline_mode<synchronous>, transform_indices = @transform_7, window_bounds = array<i64: 2, 128>}, {pipeline_mode = #tpu.pipeline_mode<synchronous>, transform_indices = @transform_8, window_bounds = array<i64: 32, 16>}, {pipeline_mode = #tpu.pipeline_mode<synchronous>, transform_indices = @transform_9, window_bounds = array<i64: 1, 16>}, {pipeline_mode = #tpu.pipeline_mode<synchronous>, transform_indices = @transform_10, window_bounds = array<i64: 32, 32>}, {pipeline_mode = #tpu.pipeline_mode<synchronous>, transform_indices = @transform_11, window_bounds = array<i64: 32, 128>}, {pipeline_mode = #tpu.pipeline_mode<synchronous>, transform_indices = @transform_12, window_bounds = array<i64: 4, 128>}, {transform_indices = @transform_13, window_bounds = array<i64: 8, 128>}]} {
    %c0 = arith.constant 0 : index
    %c0_0 = arith.constant 0 : index
    %c0_1 = arith.constant 0 : index
    %0 = vector.load %arg1[%c0, %c0_0, %c0_1] : memref<1x8x8xf32, #tpu.memory_space<vmem>>, vector<1x8x8xf32>
    %1 = vector.shape_cast %0 : vector<1x8x8xf32> to vector<8x8xf32>
    %c0_2 = arith.constant 0 : index
    %c0_3 = arith.constant 0 : index
    %2 = vector.load %arg3[%c0_2, %c0_3] : memref<8x4xf32, #tpu.memory_space<vmem>>, vector<8x1xf32>
    %3 = vector.broadcast %2 : vector<8x1xf32> to vector<8x8xf32>
    %4 = arith.mulf %1, %3 : vector<8x8xf32>
    %c0_4 = arith.constant 0 : index
    %c1 = arith.constant 1 : index
    %5 = vector.load %arg3[%c0_4, %c1] : memref<8x4xf32, #tpu.memory_space<vmem>>, vector<8x1xf32>
    %6 = vector.broadcast %5 : vector<8x1xf32> to vector<8x8xf32>
    %7 = arith.addf %4, %6 : vector<8x8xf32>
    %c0_5 = arith.constant 0 : index
    %c0_6 = arith.constant 0 : index
    %c0_7 = arith.constant 0 : index
    %8 = vector.load %arg2[%c0_5, %c0_6, %c0_7] : memref<1x8x8xf32, #tpu.memory_space<vmem>>, vector<1x8x8xf32>
    %9 = vector.shape_cast %8 : vector<1x8x8xf32> to vector<8x8xf32>
    %c0_8 = arith.constant 0 : index
    %c2 = arith.constant 2 : index
    %10 = vector.load %arg3[%c0_8, %c2] : memref<8x4xf32, #tpu.memory_space<vmem>>, vector<8x1xf32>
    %11 = vector.broadcast %10 : vector<8x1xf32> to vector<8x8xf32>
    %12 = arith.mulf %9, %11 : vector<8x8xf32>
    %c0_9 = arith.constant 0 : index
    %c3 = arith.constant 3 : index
    %13 = vector.load %arg3[%c0_9, %c3] : memref<8x4xf32, #tpu.memory_space<vmem>>, vector<8x1xf32>
    %14 = vector.broadcast %13 : vector<8x1xf32> to vector<8x8xf32>
    %15 = arith.addf %12, %14 : vector<8x8xf32>
    %16 = vector.shape_cast %7 : vector<8x8xf32> to vector<8x8x1xf32>
    %c0_10 = arith.constant 0 : index
    %c0_11 = arith.constant 0 : index
    %17 = vector.load %arg4[%c0_10, %c0_11] : memref<2x128xf32, #tpu.memory_space<vmem>>, vector<1x128xf32>
    %18 = vector.shape_cast %17 : vector<1x128xf32> to vector<1x1x128xf32>
    %19 = vector.broadcast %16 : vector<8x8x1xf32> to vector<8x8x128xf32>
    %20 = vector.broadcast %18 : vector<1x1x128xf32> to vector<8x8x128xf32>
    %21 = arith.mulf %19, %20 : vector<8x8x128xf32>
    %22 = vector.shape_cast %15 : vector<8x8xf32> to vector<8x8x1xf32>
    %c1_12 = arith.constant 1 : index
    %c0_13 = arith.constant 0 : index
    %23 = vector.load %arg4[%c1_12, %c0_13] : memref<2x128xf32, #tpu.memory_space<vmem>>, vector<1x128xf32>
    %24 = vector.shape_cast %23 : vector<1x128xf32> to vector<1x1x128xf32>
    %25 = vector.broadcast %22 : vector<8x8x1xf32> to vector<8x8x128xf32>
    %26 = vector.broadcast %24 : vector<1x1x128xf32> to vector<8x8x128xf32>
    %27 = arith.mulf %25, %26 : vector<8x8x128xf32>
    %28 = arith.addf %21, %27 : vector<8x8x128xf32>
    %c0_14 = arith.constant 0 : index
    %c0_15 = arith.constant 0 : index
    %29 = vector.load %arg8[%c0_14, %c0_15] : memref<2x128xf32, #tpu.memory_space<vmem>>, vector<1x128xf32>
    %30 = vector.shape_cast %29 : vector<1x128xf32> to vector<1x1x128xf32>
    %31 = vector.broadcast %30 : vector<1x1x128xf32> to vector<8x8x128xf32>
    %32 = arith.addf %28, %31 : vector<8x8x128xf32>
    %c0_16 = arith.constant 0 : index
    %c0_17 = arith.constant 0 : index
    %c0_18 = arith.constant 0 : index
    %33 = vector.load %arg15[%c0_16, %c0_17, %c0_18] : memref<8x8x128xf32, #tpu.memory_space<vmem>>, vector<8x8x128xf32>
    tpu.vector_store %arg15[%c0_16, %c0_17, %c0_18], %32 {strides = array<i32>} : memref<8x8x128xf32, #tpu.memory_space<vmem>>, vector<8x8x128xf32>,
    %c0_19 = arith.constant 0 : index
    %c0_20 = arith.constant 0 : index
    %34 = vector.load %arg5[%c0_19, %c0_20] : memref<32x128xf32, #tpu.memory_space<vmem>>, vector<32x128xf32>
    %cst = arith.constant 0.000000e+00 : f32
    %35 = vector.broadcast %cst : f32 to vector<8x32xf32>
    %cst_21 = arith.constant 0.000000e+00 : f32
    %36 = vector.broadcast %cst_21 : f32 to vector<8x32xf32>
    %c0_22 = arith.constant 0 : index
    %c0_23 = arith.constant 0 : index
    %c0_24 = arith.constant 0 : index
    %37 = vector.load %arg15[%c0_22, %c0_23, %c0_24] : memref<8x8x128xf32, #tpu.memory_space<vmem>>, vector<1x8x128xf32>
    %38 = vector.shape_cast %37 : vector<1x8x128xf32> to vector<8x128xf32>
    %cst_25 = arith.constant dense<0.000000e+00> : vector<8x128xf32>
    %39 = tpu.matmul %35, %34, %cst_25 {dimension_numbers = #tpu.dot_dimension_numbers<[1], [0], [0], [1], [0, 0, 1, 1], [], []>} : vector<8x32xf32>, vector<32x128xf32>, vector<8x128xf32> -> vector<8x128xf32>
    %40 = arith.addf %38, %39 : vector<8x128xf32>
    %41 = vector.extract_strided_slice %40 {offsets = [0, 0], sizes = [8, 96], strides = [1, 1]} : vector<8x128xf32> to vector<8x96xf32>
    %cst_26 = arith.constant 5.000000e-01 : f32
    %42 = vector.broadcast %cst_26 : f32 to vector<8x96xf32>
    %43 = arith.mulf %42, %41 : vector<8x96xf32>
    %44 = math.tanh %43 : vector<8x96xf32>
    %cst_27 = arith.constant 5.000000e-01 : f32
    %45 = vector.broadcast %cst_27 : f32 to vector<8x96xf32>
    %46 = arith.mulf %45, %44 : vector<8x96xf32>
    %cst_28 = arith.constant 5.000000e-01 : f32
    %47 = vector.broadcast %cst_28 : f32 to vector<8x96xf32>
    %48 = arith.addf %46, %47 : vector<8x96xf32>
    %49 = vector.extract_strided_slice %48 {offsets = [0, 0], sizes = [8, 32], strides = [1, 1]} : vector<8x96xf32> to vector<8x32xf32>
    %50 = vector.extract_strided_slice %48 {offsets = [0, 32], sizes = [8, 32], strides = [1, 1]} : vector<8x96xf32> to vector<8x32xf32>
    %51 = vector.extract_strided_slice %48 {offsets = [0, 64], sizes = [8, 32], strides = [1, 1]} : vector<8x96xf32> to vector<8x32xf32>
    %52 = vector.extract_strided_slice %40 {offsets = [0, 96], sizes = [8, 32], strides = [1, 1]} : vector<8x128xf32> to vector<8x32xf32>
    %53 = math.tanh %52 : vector<8x32xf32>
    %54 = arith.mulf %50, %36 : vector<8x32xf32>
    %55 = arith.mulf %49, %53 : vector<8x32xf32>
    %56 = arith.addf %54, %55 : vector<8x32xf32>
    %57 = math.tanh %56 : vector<8x32xf32>
    %58 = arith.mulf %51, %57 : vector<8x32xf32>
    %c0_29 = arith.constant 0 : index
    %c0_30 = arith.constant 0 : index
    %c0_31 = arith.constant 0 : index
    %59 = vector.load %arg16[%c0_29, %c0_30, %c0_31] : memref<8x8x64xf32, #tpu.memory_space<vmem>>, vector<1x8x32xf32>
    %60 = vector.shape_cast %59 : vector<1x8x32xf32> to vector<8x32xf32>
    %61 = vector.shape_cast %58 : vector<8x32xf32> to vector<1x8x32xf32>
    tpu.vector_store %arg16[%c0_29, %c0_30, %c0_31], %61 {strides = array<i32>} : memref<8x8x64xf32, #tpu.memory_space<vmem>>, vector<1x8x32xf32>,
    %c7 = arith.constant 7 : index
    %c0_32 = arith.constant 0 : index
    %c32 = arith.constant 32 : index
    %62 = vector.load %arg16[%c7, %c0_32, %c32] : memref<8x8x64xf32, #tpu.memory_space<vmem>>, vector<1x8x32xf32>
    %63 = vector.shape_cast %62 : vector<1x8x32xf32> to vector<8x32xf32>
    %64 = vector.shape_cast %58 : vector<8x32xf32> to vector<1x8x32xf32>
    tpu.vector_store %arg16[%c7, %c0_32, %c32], %64 {strides = array<i32>} : memref<8x8x64xf32, #tpu.memory_space<vmem>>, vector<1x8x32xf32>,
    %c1_33 = arith.constant 1 : index
    %c0_34 = arith.constant 0 : index
    %c0_35 = arith.constant 0 : index
    %65 = vector.load %arg15[%c1_33, %c0_34, %c0_35] : memref<8x8x128xf32, #tpu.memory_space<vmem>>, vector<1x8x128xf32>
    %66 = vector.shape_cast %65 : vector<1x8x128xf32> to vector<8x128xf32>
    %cst_36 = arith.constant dense<0.000000e+00> : vector<8x128xf32>
    %67 = tpu.matmul %58, %34, %cst_36 {dimension_numbers = #tpu.dot_dimension_numbers<[1], [0], [0], [1], [0, 0, 1, 1], [], []>} : vector<8x32xf32>, vector<32x128xf32>, vector<8x128xf32> -> vector<8x128xf32>
    %68 = arith.addf %66, %67 : vector<8x128xf32>
    %69 = vector.extract_strided_slice %68 {offsets = [0, 0], sizes = [8, 96], strides = [1, 1]} : vector<8x128xf32> to vector<8x96xf32>
    %cst_37 = arith.constant 5.000000e-01 : f32
    %70 = vector.broadcast %cst_37 : f32 to vector<8x96xf32>
    %71 = arith.mulf %70, %69 : vector<8x96xf32>
    %72 = math.tanh %71 : vector<8x96xf32>
    %cst_38 = arith.constant 5.000000e-01 : f32
    %73 = vector.broadcast %cst_38 : f32 to vector<8x96xf32>
    %74 = arith.mulf %73, %72 : vector<8x96xf32>
    %cst_39 = arith.constant 5.000000e-01 : f32
    %75 = vector.broadcast %cst_39 : f32 to vector<8x96xf32>
    %76 = arith.addf %74, %75 : vector<8x96xf32>
    %77 = vector.extract_strided_slice %76 {offsets = [0, 0], sizes = [8, 32], strides = [1, 1]} : vector<8x96xf32> to vector<8x32xf32>
    %78 = vector.extract_strided_slice %76 {offsets = [0, 32], sizes = [8, 32], strides = [1, 1]} : vector<8x96xf32> to vector<8x32xf32>
    %79 = vector.extract_strided_slice %76 {offsets = [0, 64], sizes = [8, 32], strides = [1, 1]} : vector<8x96xf32> to vector<8x32xf32>
    %80 = vector.extract_strided_slice %68 {offsets = [0, 96], sizes = [8, 32], strides = [1, 1]} : vector<8x128xf32> to vector<8x32xf32>
    %81 = math.tanh %80 : vector<8x32xf32>
    %82 = arith.mulf %78, %56 : vector<8x32xf32>
    %83 = arith.mulf %77, %81 : vector<8x32xf32>
    %84 = arith.addf %82, %83 : vector<8x32xf32>
    %85 = math.tanh %84 : vector<8x32xf32>
    %86 = arith.mulf %79, %85 : vector<8x32xf32>
    %c1_40 = arith.constant 1 : index
    %c0_41 = arith.constant 0 : index
    %c0_42 = arith.constant 0 : index
    %87 = vector.load %arg16[%c1_40, %c0_41, %c0_42] : memref<8x8x64xf32, #tpu.memory_space<vmem>>, vector<1x8x32xf32>
    %88 = vector.shape_cast %87 : vector<1x8x32xf32> to vector<8x32xf32>
    %89 = vector.shape_cast %86 : vector<8x32xf32> to vector<1x8x32xf32>
    tpu.vector_store %arg16[%c1_40, %c0_41, %c0_42], %89 {strides = array<i32>} : memref<8x8x64xf32, #tpu.memory_space<vmem>>, vector<1x8x32xf32>,
    %c6 = arith.constant 6 : index
    %c0_43 = arith.constant 0 : index
    %c32_44 = arith.constant 32 : index
    %90 = vector.load %arg16[%c6, %c0_43, %c32_44] : memref<8x8x64xf32, #tpu.memory_space<vmem>>, vector<1x8x32xf32>
    %91 = vector.shape_cast %90 : vector<1x8x32xf32> to vector<8x32xf32>
    %92 = vector.shape_cast %86 : vector<8x32xf32> to vector<1x8x32xf32>
    tpu.vector_store %arg16[%c6, %c0_43, %c32_44], %92 {strides = array<i32>} : memref<8x8x64xf32, #tpu.memory_space<vmem>>, vector<1x8x32xf32>,
    %c2_45 = arith.constant 2 : index
    %c0_46 = arith.constant 0 : index
    %c0_47 = arith.constant 0 : index
    %93 = vector.load %arg15[%c2_45, %c0_46, %c0_47] : memref<8x8x128xf32, #tpu.memory_space<vmem>>, vector<1x8x128xf32>
    %94 = vector.shape_cast %93 : vector<1x8x128xf32> to vector<8x128xf32>
    %cst_48 = arith.constant dense<0.000000e+00> : vector<8x128xf32>
    %95 = tpu.matmul %86, %34, %cst_48 {dimension_numbers = #tpu.dot_dimension_numbers<[1], [0], [0], [1], [0, 0, 1, 1], [], []>} : vector<8x32xf32>, vector<32x128xf32>, vector<8x128xf32> -> vector<8x128xf32>
    %96 = arith.addf %94, %95 : vector<8x128xf32>
    %97 = vector.extract_strided_slice %96 {offsets = [0, 0], sizes = [8, 96], strides = [1, 1]} : vector<8x128xf32> to vector<8x96xf32>
    %cst_49 = arith.constant 5.000000e-01 : f32
    %98 = vector.broadcast %cst_49 : f32 to vector<8x96xf32>
    %99 = arith.mulf %98, %97 : vector<8x96xf32>
    %100 = math.tanh %99 : vector<8x96xf32>
    %cst_50 = arith.constant 5.000000e-01 : f32
    %101 = vector.broadcast %cst_50 : f32 to vector<8x96xf32>
    %102 = arith.mulf %101, %100 : vector<8x96xf32>
    %cst_51 = arith.constant 5.000000e-01 : f32
    %103 = vector.broadcast %cst_51 : f32 to vector<8x96xf32>
    %104 = arith.addf %102, %103 : vector<8x96xf32>
    %105 = vector.extract_strided_slice %104 {offsets = [0, 0], sizes = [8, 32], strides = [1, 1]} : vector<8x96xf32> to vector<8x32xf32>
    %106 = vector.extract_strided_slice %104 {offsets = [0, 32], sizes = [8, 32], strides = [1, 1]} : vector<8x96xf32> to vector<8x32xf32>
    %107 = vector.extract_strided_slice %104 {offsets = [0, 64], sizes = [8, 32], strides = [1, 1]} : vector<8x96xf32> to vector<8x32xf32>
    %108 = vector.extract_strided_slice %96 {offsets = [0, 96], sizes = [8, 32], strides = [1, 1]} : vector<8x128xf32> to vector<8x32xf32>
    %109 = math.tanh %108 : vector<8x32xf32>
    %110 = arith.mulf %106, %84 : vector<8x32xf32>
    %111 = arith.mulf %105, %109 : vector<8x32xf32>
    %112 = arith.addf %110, %111 : vector<8x32xf32>
    %113 = math.tanh %112 : vector<8x32xf32>
    %114 = arith.mulf %107, %113 : vector<8x32xf32>
    %c2_52 = arith.constant 2 : index
    %c0_53 = arith.constant 0 : index
    %c0_54 = arith.constant 0 : index
    %115 = vector.load %arg16[%c2_52, %c0_53, %c0_54] : memref<8x8x64xf32, #tpu.memory_space<vmem>>, vector<1x8x32xf32>
    %116 = vector.shape_cast %115 : vector<1x8x32xf32> to vector<8x32xf32>
    %117 = vector.shape_cast %114 : vector<8x32xf32> to vector<1x8x32xf32>
    tpu.vector_store %arg16[%c2_52, %c0_53, %c0_54], %117 {strides = array<i32>} : memref<8x8x64xf32, #tpu.memory_space<vmem>>, vector<1x8x32xf32>,
    %c5 = arith.constant 5 : index
    %c0_55 = arith.constant 0 : index
    %c32_56 = arith.constant 32 : index
    %118 = vector.load %arg16[%c5, %c0_55, %c32_56] : memref<8x8x64xf32, #tpu.memory_space<vmem>>, vector<1x8x32xf32>
    %119 = vector.shape_cast %118 : vector<1x8x32xf32> to vector<8x32xf32>
    %120 = vector.shape_cast %114 : vector<8x32xf32> to vector<1x8x32xf32>
    tpu.vector_store %arg16[%c5, %c0_55, %c32_56], %120 {strides = array<i32>} : memref<8x8x64xf32, #tpu.memory_space<vmem>>, vector<1x8x32xf32>,
    %c3_57 = arith.constant 3 : index
    %c0_58 = arith.constant 0 : index
    %c0_59 = arith.constant 0 : index
    %121 = vector.load %arg15[%c3_57, %c0_58, %c0_59] : memref<8x8x128xf32, #tpu.memory_space<vmem>>, vector<1x8x128xf32>
    %122 = vector.shape_cast %121 : vector<1x8x128xf32> to vector<8x128xf32>
    %cst_60 = arith.constant dense<0.000000e+00> : vector<8x128xf32>
    %123 = tpu.matmul %114, %34, %cst_60 {dimension_numbers = #tpu.dot_dimension_numbers<[1], [0], [0], [1], [0, 0, 1, 1], [], []>} : vector<8x32xf32>, vector<32x128xf32>, vector<8x128xf32> -> vector<8x128xf32>
    %124 = arith.addf %122, %123 : vector<8x128xf32>
    %125 = vector.extract_strided_slice %124 {offsets = [0, 0], sizes = [8, 96], strides = [1, 1]} : vector<8x128xf32> to vector<8x96xf32>
    %cst_61 = arith.constant 5.000000e-01 : f32
    %126 = vector.broadcast %cst_61 : f32 to vector<8x96xf32>
    %127 = arith.mulf %126, %125 : vector<8x96xf32>
    %128 = math.tanh %127 : vector<8x96xf32>
    %cst_62 = arith.constant 5.000000e-01 : f32
    %129 = vector.broadcast %cst_62 : f32 to vector<8x96xf32>
    %130 = arith.mulf %129, %128 : vector<8x96xf32>
    %cst_63 = arith.constant 5.000000e-01 : f32
    %131 = vector.broadcast %cst_63 : f32 to vector<8x96xf32>
    %132 = arith.addf %130, %131 : vector<8x96xf32>
    %133 = vector.extract_strided_slice %132 {offsets = [0, 0], sizes = [8, 32], strides = [1, 1]} : vector<8x96xf32> to vector<8x32xf32>
    %134 = vector.extract_strided_slice %132 {offsets = [0, 32], sizes = [8, 32], strides = [1, 1]} : vector<8x96xf32> to vector<8x32xf32>
    %135 = vector.extract_strided_slice %132 {offsets = [0, 64], sizes = [8, 32], strides = [1, 1]} : vector<8x96xf32> to vector<8x32xf32>
    %136 = vector.extract_strided_slice %124 {offsets = [0, 96], sizes = [8, 32], strides = [1, 1]} : vector<8x128xf32> to vector<8x32xf32>
    %137 = math.tanh %136 : vector<8x32xf32>
    %138 = arith.mulf %134, %112 : vector<8x32xf32>
    %139 = arith.mulf %133, %137 : vector<8x32xf32>
    %140 = arith.addf %138, %139 : vector<8x32xf32>
    %141 = math.tanh %140 : vector<8x32xf32>
    %142 = arith.mulf %135, %141 : vector<8x32xf32>
    %c3_64 = arith.constant 3 : index
    %c0_65 = arith.constant 0 : index
    %c0_66 = arith.constant 0 : index
    %143 = vector.load %arg16[%c3_64, %c0_65, %c0_66] : memref<8x8x64xf32, #tpu.memory_space<vmem>>, vector<1x8x32xf32>
    %144 = vector.shape_cast %143 : vector<1x8x32xf32> to vector<8x32xf32>
    %145 = vector.shape_cast %142 : vector<8x32xf32> to vector<1x8x32xf32>
    tpu.vector_store %arg16[%c3_64, %c0_65, %c0_66], %145 {strides = array<i32>} : memref<8x8x64xf32, #tpu.memory_space<vmem>>, vector<1x8x32xf32>,
    %c4 = arith.constant 4 : index
    %c0_67 = arith.constant 0 : index
    %c32_68 = arith.constant 32 : index
    %146 = vector.load %arg16[%c4, %c0_67, %c32_68] : memref<8x8x64xf32, #tpu.memory_space<vmem>>, vector<1x8x32xf32>
    %147 = vector.shape_cast %146 : vector<1x8x32xf32> to vector<8x32xf32>
    %148 = vector.shape_cast %142 : vector<8x32xf32> to vector<1x8x32xf32>
    tpu.vector_store %arg16[%c4, %c0_67, %c32_68], %148 {strides = array<i32>} : memref<8x8x64xf32, #tpu.memory_space<vmem>>, vector<1x8x32xf32>,
    %c4_69 = arith.constant 4 : index
    %c0_70 = arith.constant 0 : index
    %c0_71 = arith.constant 0 : index
    %149 = vector.load %arg15[%c4_69, %c0_70, %c0_71] : memref<8x8x128xf32, #tpu.memory_space<vmem>>, vector<1x8x128xf32>
    %150 = vector.shape_cast %149 : vector<1x8x128xf32> to vector<8x128xf32>
    %cst_72 = arith.constant dense<0.000000e+00> : vector<8x128xf32>
    %151 = tpu.matmul %142, %34, %cst_72 {dimension_numbers = #tpu.dot_dimension_numbers<[1], [0], [0], [1], [0, 0, 1, 1], [], []>} : vector<8x32xf32>, vector<32x128xf32>, vector<8x128xf32> -> vector<8x128xf32>
    %152 = arith.addf %150, %151 : vector<8x128xf32>
    %153 = vector.extract_strided_slice %152 {offsets = [0, 0], sizes = [8, 96], strides = [1, 1]} : vector<8x128xf32> to vector<8x96xf32>
    %cst_73 = arith.constant 5.000000e-01 : f32
    %154 = vector.broadcast %cst_73 : f32 to vector<8x96xf32>
    %155 = arith.mulf %154, %153 : vector<8x96xf32>
    %156 = math.tanh %155 : vector<8x96xf32>
    %cst_74 = arith.constant 5.000000e-01 : f32
    %157 = vector.broadcast %cst_74 : f32 to vector<8x96xf32>
    %158 = arith.mulf %157, %156 : vector<8x96xf32>
    %cst_75 = arith.constant 5.000000e-01 : f32
    %159 = vector.broadcast %cst_75 : f32 to vector<8x96xf32>
    %160 = arith.addf %158, %159 : vector<8x96xf32>
    %161 = vector.extract_strided_slice %160 {offsets = [0, 0], sizes = [8, 32], strides = [1, 1]} : vector<8x96xf32> to vector<8x32xf32>
    %162 = vector.extract_strided_slice %160 {offsets = [0, 32], sizes = [8, 32], strides = [1, 1]} : vector<8x96xf32> to vector<8x32xf32>
    %163 = vector.extract_strided_slice %160 {offsets = [0, 64], sizes = [8, 32], strides = [1, 1]} : vector<8x96xf32> to vector<8x32xf32>
    %164 = vector.extract_strided_slice %152 {offsets = [0, 96], sizes = [8, 32], strides = [1, 1]} : vector<8x128xf32> to vector<8x32xf32>
    %165 = math.tanh %164 : vector<8x32xf32>
    %166 = arith.mulf %162, %140 : vector<8x32xf32>
    %167 = arith.mulf %161, %165 : vector<8x32xf32>
    %168 = arith.addf %166, %167 : vector<8x32xf32>
    %169 = math.tanh %168 : vector<8x32xf32>
    %170 = arith.mulf %163, %169 : vector<8x32xf32>
    %c4_76 = arith.constant 4 : index
    %c0_77 = arith.constant 0 : index
    %c0_78 = arith.constant 0 : index
    %171 = vector.load %arg16[%c4_76, %c0_77, %c0_78] : memref<8x8x64xf32, #tpu.memory_space<vmem>>, vector<1x8x32xf32>
    %172 = vector.shape_cast %171 : vector<1x8x32xf32> to vector<8x32xf32>
    %173 = vector.shape_cast %170 : vector<8x32xf32> to vector<1x8x32xf32>
    tpu.vector_store %arg16[%c4_76, %c0_77, %c0_78], %173 {strides = array<i32>} : memref<8x8x64xf32, #tpu.memory_space<vmem>>, vector<1x8x32xf32>,
    %c3_79 = arith.constant 3 : index
    %c0_80 = arith.constant 0 : index
    %c32_81 = arith.constant 32 : index
    %174 = vector.load %arg16[%c3_79, %c0_80, %c32_81] : memref<8x8x64xf32, #tpu.memory_space<vmem>>, vector<1x8x32xf32>
    %175 = vector.shape_cast %174 : vector<1x8x32xf32> to vector<8x32xf32>
    %176 = vector.shape_cast %170 : vector<8x32xf32> to vector<1x8x32xf32>
    tpu.vector_store %arg16[%c3_79, %c0_80, %c32_81], %176 {strides = array<i32>} : memref<8x8x64xf32, #tpu.memory_space<vmem>>, vector<1x8x32xf32>,
    %c5_82 = arith.constant 5 : index
    %c0_83 = arith.constant 0 : index
    %c0_84 = arith.constant 0 : index
    %177 = vector.load %arg15[%c5_82, %c0_83, %c0_84] : memref<8x8x128xf32, #tpu.memory_space<vmem>>, vector<1x8x128xf32>
    %178 = vector.shape_cast %177 : vector<1x8x128xf32> to vector<8x128xf32>
    %cst_85 = arith.constant dense<0.000000e+00> : vector<8x128xf32>
    %179 = tpu.matmul %170, %34, %cst_85 {dimension_numbers = #tpu.dot_dimension_numbers<[1], [0], [0], [1], [0, 0, 1, 1], [], []>} : vector<8x32xf32>, vector<32x128xf32>, vector<8x128xf32> -> vector<8x128xf32>
    %180 = arith.addf %178, %179 : vector<8x128xf32>
    %181 = vector.extract_strided_slice %180 {offsets = [0, 0], sizes = [8, 96], strides = [1, 1]} : vector<8x128xf32> to vector<8x96xf32>
    %cst_86 = arith.constant 5.000000e-01 : f32
    %182 = vector.broadcast %cst_86 : f32 to vector<8x96xf32>
    %183 = arith.mulf %182, %181 : vector<8x96xf32>
    %184 = math.tanh %183 : vector<8x96xf32>
    %cst_87 = arith.constant 5.000000e-01 : f32
    %185 = vector.broadcast %cst_87 : f32 to vector<8x96xf32>
    %186 = arith.mulf %185, %184 : vector<8x96xf32>
    %cst_88 = arith.constant 5.000000e-01 : f32
    %187 = vector.broadcast %cst_88 : f32 to vector<8x96xf32>
    %188 = arith.addf %186, %187 : vector<8x96xf32>
    %189 = vector.extract_strided_slice %188 {offsets = [0, 0], sizes = [8, 32], strides = [1, 1]} : vector<8x96xf32> to vector<8x32xf32>
    %190 = vector.extract_strided_slice %188 {offsets = [0, 32], sizes = [8, 32], strides = [1, 1]} : vector<8x96xf32> to vector<8x32xf32>
    %191 = vector.extract_strided_slice %188 {offsets = [0, 64], sizes = [8, 32], strides = [1, 1]} : vector<8x96xf32> to vector<8x32xf32>
    %192 = vector.extract_strided_slice %180 {offsets = [0, 96], sizes = [8, 32], strides = [1, 1]} : vector<8x128xf32> to vector<8x32xf32>
    %193 = math.tanh %192 : vector<8x32xf32>
    %194 = arith.mulf %190, %168 : vector<8x32xf32>
    %195 = arith.mulf %189, %193 : vector<8x32xf32>
    %196 = arith.addf %194, %195 : vector<8x32xf32>
    %197 = math.tanh %196 : vector<8x32xf32>
    %198 = arith.mulf %191, %197 : vector<8x32xf32>
    %c5_89 = arith.constant 5 : index
    %c0_90 = arith.constant 0 : index
    %c0_91 = arith.constant 0 : index
    %199 = vector.load %arg16[%c5_89, %c0_90, %c0_91] : memref<8x8x64xf32, #tpu.memory_space<vmem>>, vector<1x8x32xf32>
    %200 = vector.shape_cast %199 : vector<1x8x32xf32> to vector<8x32xf32>
    %201 = vector.shape_cast %198 : vector<8x32xf32> to vector<1x8x32xf32>
    tpu.vector_store %arg16[%c5_89, %c0_90, %c0_91], %201 {strides = array<i32>} : memref<8x8x64xf32, #tpu.memory_space<vmem>>, vector<1x8x32xf32>,
    %c2_92 = arith.constant 2 : index
    %c0_93 = arith.constant 0 : index
    %c32_94 = arith.constant 32 : index
    %202 = vector.load %arg16[%c2_92, %c0_93, %c32_94] : memref<8x8x64xf32, #tpu.memory_space<vmem>>, vector<1x8x32xf32>
    %203 = vector.shape_cast %202 : vector<1x8x32xf32> to vector<8x32xf32>
    %204 = vector.shape_cast %198 : vector<8x32xf32> to vector<1x8x32xf32>
    tpu.vector_store %arg16[%c2_92, %c0_93, %c32_94], %204 {strides = array<i32>} : memref<8x8x64xf32, #tpu.memory_space<vmem>>, vector<1x8x32xf32>,
    %c6_95 = arith.constant 6 : index
    %c0_96 = arith.constant 0 : index
    %c0_97 = arith.constant 0 : index
    %205 = vector.load %arg15[%c6_95, %c0_96, %c0_97] : memref<8x8x128xf32, #tpu.memory_space<vmem>>, vector<1x8x128xf32>
    %206 = vector.shape_cast %205 : vector<1x8x128xf32> to vector<8x128xf32>
    %cst_98 = arith.constant dense<0.000000e+00> : vector<8x128xf32>
    %207 = tpu.matmul %198, %34, %cst_98 {dimension_numbers = #tpu.dot_dimension_numbers<[1], [0], [0], [1], [0, 0, 1, 1], [], []>} : vector<8x32xf32>, vector<32x128xf32>, vector<8x128xf32> -> vector<8x128xf32>
    %208 = arith.addf %206, %207 : vector<8x128xf32>
    %209 = vector.extract_strided_slice %208 {offsets = [0, 0], sizes = [8, 96], strides = [1, 1]} : vector<8x128xf32> to vector<8x96xf32>
    %cst_99 = arith.constant 5.000000e-01 : f32
    %210 = vector.broadcast %cst_99 : f32 to vector<8x96xf32>
    %211 = arith.mulf %210, %209 : vector<8x96xf32>
    %212 = math.tanh %211 : vector<8x96xf32>
    %cst_100 = arith.constant 5.000000e-01 : f32
    %213 = vector.broadcast %cst_100 : f32 to vector<8x96xf32>
    %214 = arith.mulf %213, %212 : vector<8x96xf32>
    %cst_101 = arith.constant 5.000000e-01 : f32
    %215 = vector.broadcast %cst_101 : f32 to vector<8x96xf32>
    %216 = arith.addf %214, %215 : vector<8x96xf32>
    %217 = vector.extract_strided_slice %216 {offsets = [0, 0], sizes = [8, 32], strides = [1, 1]} : vector<8x96xf32> to vector<8x32xf32>
    %218 = vector.extract_strided_slice %216 {offsets = [0, 32], sizes = [8, 32], strides = [1, 1]} : vector<8x96xf32> to vector<8x32xf32>
    %219 = vector.extract_strided_slice %216 {offsets = [0, 64], sizes = [8, 32], strides = [1, 1]} : vector<8x96xf32> to vector<8x32xf32>
    %220 = vector.extract_strided_slice %208 {offsets = [0, 96], sizes = [8, 32], strides = [1, 1]} : vector<8x128xf32> to vector<8x32xf32>
    %221 = math.tanh %220 : vector<8x32xf32>
    %222 = arith.mulf %218, %196 : vector<8x32xf32>
    %223 = arith.mulf %217, %221 : vector<8x32xf32>
    %224 = arith.addf %222, %223 : vector<8x32xf32>
    %225 = math.tanh %224 : vector<8x32xf32>
    %226 = arith.mulf %219, %225 : vector<8x32xf32>
    %c6_102 = arith.constant 6 : index
    %c0_103 = arith.constant 0 : index
    %c0_104 = arith.constant 0 : index
    %227 = vector.load %arg16[%c6_102, %c0_103, %c0_104] : memref<8x8x64xf32, #tpu.memory_space<vmem>>, vector<1x8x32xf32>
    %228 = vector.shape_cast %227 : vector<1x8x32xf32> to vector<8x32xf32>
    %229 = vector.shape_cast %226 : vector<8x32xf32> to vector<1x8x32xf32>
    tpu.vector_store %arg16[%c6_102, %c0_103, %c0_104], %229 {strides = array<i32>} : memref<8x8x64xf32, #tpu.memory_space<vmem>>, vector<1x8x32xf32>,
    %c1_105 = arith.constant 1 : index
    %c0_106 = arith.constant 0 : index
    %c32_107 = arith.constant 32 : index
    %230 = vector.load %arg16[%c1_105, %c0_106, %c32_107] : memref<8x8x64xf32, #tpu.memory_space<vmem>>, vector<1x8x32xf32>
    %231 = vector.shape_cast %230 : vector<1x8x32xf32> to vector<8x32xf32>
    %232 = vector.shape_cast %226 : vector<8x32xf32> to vector<1x8x32xf32>
    tpu.vector_store %arg16[%c1_105, %c0_106, %c32_107], %232 {strides = array<i32>} : memref<8x8x64xf32, #tpu.memory_space<vmem>>, vector<1x8x32xf32>,
    %c7_108 = arith.constant 7 : index
    %c0_109 = arith.constant 0 : index
    %c0_110 = arith.constant 0 : index
    %233 = vector.load %arg15[%c7_108, %c0_109, %c0_110] : memref<8x8x128xf32, #tpu.memory_space<vmem>>, vector<1x8x128xf32>
    %234 = vector.shape_cast %233 : vector<1x8x128xf32> to vector<8x128xf32>
    %cst_111 = arith.constant dense<0.000000e+00> : vector<8x128xf32>
    %235 = tpu.matmul %226, %34, %cst_111 {dimension_numbers = #tpu.dot_dimension_numbers<[1], [0], [0], [1], [0, 0, 1, 1], [], []>} : vector<8x32xf32>, vector<32x128xf32>, vector<8x128xf32> -> vector<8x128xf32>
    %236 = arith.addf %234, %235 : vector<8x128xf32>
    %237 = vector.extract_strided_slice %236 {offsets = [0, 0], sizes = [8, 96], strides = [1, 1]} : vector<8x128xf32> to vector<8x96xf32>
    %cst_112 = arith.constant 5.000000e-01 : f32
    %238 = vector.broadcast %cst_112 : f32 to vector<8x96xf32>
    %239 = arith.mulf %238, %237 : vector<8x96xf32>
    %240 = math.tanh %239 : vector<8x96xf32>
    %cst_113 = arith.constant 5.000000e-01 : f32
    %241 = vector.broadcast %cst_113 : f32 to vector<8x96xf32>
    %242 = arith.mulf %241, %240 : vector<8x96xf32>
    %cst_114 = arith.constant 5.000000e-01 : f32
    %243 = vector.broadcast %cst_114 : f32 to vector<8x96xf32>
    %244 = arith.addf %242, %243 : vector<8x96xf32>
    %245 = vector.extract_strided_slice %244 {offsets = [0, 0], sizes = [8, 32], strides = [1, 1]} : vector<8x96xf32> to vector<8x32xf32>
    %246 = vector.extract_strided_slice %244 {offsets = [0, 32], sizes = [8, 32], strides = [1, 1]} : vector<8x96xf32> to vector<8x32xf32>
    %247 = vector.extract_strided_slice %244 {offsets = [0, 64], sizes = [8, 32], strides = [1, 1]} : vector<8x96xf32> to vector<8x32xf32>
    %248 = vector.extract_strided_slice %236 {offsets = [0, 96], sizes = [8, 32], strides = [1, 1]} : vector<8x128xf32> to vector<8x32xf32>
    %249 = math.tanh %248 : vector<8x32xf32>
    %250 = arith.mulf %246, %224 : vector<8x32xf32>
    %251 = arith.mulf %245, %249 : vector<8x32xf32>
    %252 = arith.addf %250, %251 : vector<8x32xf32>
    %253 = math.tanh %252 : vector<8x32xf32>
    %254 = arith.mulf %247, %253 : vector<8x32xf32>
    %c7_115 = arith.constant 7 : index
    %c0_116 = arith.constant 0 : index
    %c0_117 = arith.constant 0 : index
    %255 = vector.load %arg16[%c7_115, %c0_116, %c0_117] : memref<8x8x64xf32, #tpu.memory_space<vmem>>, vector<1x8x32xf32>
    %256 = vector.shape_cast %255 : vector<1x8x32xf32> to vector<8x32xf32>
    %257 = vector.shape_cast %254 : vector<8x32xf32> to vector<1x8x32xf32>
    tpu.vector_store %arg16[%c7_115, %c0_116, %c0_117], %257 {strides = array<i32>} : memref<8x8x64xf32, #tpu.memory_space<vmem>>, vector<1x8x32xf32>,
    %c0_118 = arith.constant 0 : index
    %c0_119 = arith.constant 0 : index
    %c32_120 = arith.constant 32 : index
    %258 = vector.load %arg16[%c0_118, %c0_119, %c32_120] : memref<8x8x64xf32, #tpu.memory_space<vmem>>, vector<1x8x32xf32>
    %259 = vector.shape_cast %258 : vector<1x8x32xf32> to vector<8x32xf32>
    %260 = vector.shape_cast %254 : vector<8x32xf32> to vector<1x8x32xf32>
    tpu.vector_store %arg16[%c0_118, %c0_119, %c32_120], %260 {strides = array<i32>} : memref<8x8x64xf32, #tpu.memory_space<vmem>>, vector<1x8x32xf32>,
    %c0_121 = arith.constant 0 : index
    %c0_122 = arith.constant 0 : index
    %c0_123 = arith.constant 0 : index
    %261 = vector.load %arg16[%c0_121, %c0_122, %c0_123] : memref<8x8x64xf32, #tpu.memory_space<vmem>>, vector<8x8x64xf32>
    %262 = vector.shape_cast %261 : vector<8x8x64xf32> to vector<64x64xf32>
    %c0_124 = arith.constant 0 : index
    %c0_125 = arith.constant 0 : index
    %263 = vector.load %arg6[%c0_124, %c0_125] : memref<64x128xf32, #tpu.memory_space<vmem>>, vector<64x128xf32>
    %cst_126 = arith.constant dense<0.000000e+00> : vector<64x128xf32>
    %264 = tpu.matmul %262, %263, %cst_126 {dimension_numbers = #tpu.dot_dimension_numbers<[1], [0], [0], [1], [0, 0, 1, 1], [], []>} : vector<64x64xf32>, vector<64x128xf32>, vector<64x128xf32> -> vector<64x128xf32>
    %265 = vector.shape_cast %264 : vector<64x128xf32> to vector<8x8x128xf32>
    %c1_127 = arith.constant 1 : index
    %c0_128 = arith.constant 0 : index
    %266 = vector.load %arg8[%c1_127, %c0_128] : memref<2x128xf32, #tpu.memory_space<vmem>>, vector<1x128xf32>
    %267 = vector.shape_cast %266 : vector<1x128xf32> to vector<1x1x128xf32>
    %268 = vector.broadcast %267 : vector<1x1x128xf32> to vector<8x8x128xf32>
    %269 = arith.addf %265, %268 : vector<8x8x128xf32>
    %c0_129 = arith.constant 0 : index
    %c0_130 = arith.constant 0 : index
    %c0_131 = arith.constant 0 : index
    %270 = vector.load %arg15[%c0_129, %c0_130, %c0_131] : memref<8x8x128xf32, #tpu.memory_space<vmem>>, vector<8x8x128xf32>
    tpu.vector_store %arg15[%c0_129, %c0_130, %c0_131], %269 {strides = array<i32>} : memref<8x8x128xf32, #tpu.memory_space<vmem>>, vector<8x8x128xf32>,
    %c0_132 = arith.constant 0 : index
    %c0_133 = arith.constant 0 : index
    %271 = vector.load %arg7[%c0_132, %c0_133] : memref<32x128xf32, #tpu.memory_space<vmem>>, vector<32x128xf32>
    %cst_134 = arith.constant 0.000000e+00 : f32
    %272 = vector.broadcast %cst_134 : f32 to vector<8x32xf32>
    %cst_135 = arith.constant 0.000000e+00 : f32
    %273 = vector.broadcast %cst_135 : f32 to vector<8x32xf32>
    %c0_136 = arith.constant 0 : index
    %c0_137 = arith.constant 0 : index
    %c0_138 = arith.constant 0 : index
    %274 = vector.load %arg15[%c0_136, %c0_137, %c0_138] : memref<8x8x128xf32, #tpu.memory_space<vmem>>, vector<1x8x128xf32>
    %275 = vector.shape_cast %274 : vector<1x8x128xf32> to vector<8x128xf32>
    %cst_139 = arith.constant dense<0.000000e+00> : vector<8x128xf32>
    %276 = tpu.matmul %272, %271, %cst_139 {dimension_numbers = #tpu.dot_dimension_numbers<[1], [0], [0], [1], [0, 0, 1, 1], [], []>} : vector<8x32xf32>, vector<32x128xf32>, vector<8x128xf32> -> vector<8x128xf32>
    %277 = arith.addf %275, %276 : vector<8x128xf32>
    %278 = vector.extract_strided_slice %277 {offsets = [0, 0], sizes = [8, 96], strides = [1, 1]} : vector<8x128xf32> to vector<8x96xf32>
    %cst_140 = arith.constant 5.000000e-01 : f32
    %279 = vector.broadcast %cst_140 : f32 to vector<8x96xf32>
    %280 = arith.mulf %279, %278 : vector<8x96xf32>
    %281 = math.tanh %280 : vector<8x96xf32>
    %cst_141 = arith.constant 5.000000e-01 : f32
    %282 = vector.broadcast %cst_141 : f32 to vector<8x96xf32>
    %283 = arith.mulf %282, %281 : vector<8x96xf32>
    %cst_142 = arith.constant 5.000000e-01 : f32
    %284 = vector.broadcast %cst_142 : f32 to vector<8x96xf32>
    %285 = arith.addf %283, %284 : vector<8x96xf32>
    %286 = vector.extract_strided_slice %285 {offsets = [0, 0], sizes = [8, 32], strides = [1, 1]} : vector<8x96xf32> to vector<8x32xf32>
    %287 = vector.extract_strided_slice %285 {offsets = [0, 32], sizes = [8, 32], strides = [1, 1]} : vector<8x96xf32> to vector<8x32xf32>
    %288 = vector.extract_strided_slice %285 {offsets = [0, 64], sizes = [8, 32], strides = [1, 1]} : vector<8x96xf32> to vector<8x32xf32>
    %289 = vector.extract_strided_slice %277 {offsets = [0, 96], sizes = [8, 32], strides = [1, 1]} : vector<8x128xf32> to vector<8x32xf32>
    %290 = math.tanh %289 : vector<8x32xf32>
    %291 = arith.mulf %287, %273 : vector<8x32xf32>
    %292 = arith.mulf %286, %290 : vector<8x32xf32>
    %293 = arith.addf %291, %292 : vector<8x32xf32>
    %294 = math.tanh %293 : vector<8x32xf32>
    %295 = arith.mulf %288, %294 : vector<8x32xf32>
    %c0_143 = arith.constant 0 : index
    %c0_144 = arith.constant 0 : index
    %c0_145 = arith.constant 0 : index
    %296 = vector.load %arg16[%c0_143, %c0_144, %c0_145] : memref<8x8x64xf32, #tpu.memory_space<vmem>>, vector<1x8x32xf32>
    %297 = vector.shape_cast %296 : vector<1x8x32xf32> to vector<8x32xf32>
    %298 = vector.shape_cast %295 : vector<8x32xf32> to vector<1x8x32xf32>
    tpu.vector_store %arg16[%c0_143, %c0_144, %c0_145], %298 {strides = array<i32>} : memref<8x8x64xf32, #tpu.memory_space<vmem>>, vector<1x8x32xf32>,
    %c7_146 = arith.constant 7 : index
    %c0_147 = arith.constant 0 : index
    %c32_148 = arith.constant 32 : index
    %299 = vector.load %arg16[%c7_146, %c0_147, %c32_148] : memref<8x8x64xf32, #tpu.memory_space<vmem>>, vector<1x8x32xf32>
    %300 = vector.shape_cast %299 : vector<1x8x32xf32> to vector<8x32xf32>
    %301 = vector.shape_cast %295 : vector<8x32xf32> to vector<1x8x32xf32>
    tpu.vector_store %arg16[%c7_146, %c0_147, %c32_148], %301 {strides = array<i32>} : memref<8x8x64xf32, #tpu.memory_space<vmem>>, vector<1x8x32xf32>,
    %c1_149 = arith.constant 1 : index
    %c0_150 = arith.constant 0 : index
    %c0_151 = arith.constant 0 : index
    %302 = vector.load %arg15[%c1_149, %c0_150, %c0_151] : memref<8x8x128xf32, #tpu.memory_space<vmem>>, vector<1x8x128xf32>
    %303 = vector.shape_cast %302 : vector<1x8x128xf32> to vector<8x128xf32>
    %cst_152 = arith.constant dense<0.000000e+00> : vector<8x128xf32>
    %304 = tpu.matmul %295, %271, %cst_152 {dimension_numbers = #tpu.dot_dimension_numbers<[1], [0], [0], [1], [0, 0, 1, 1], [], []>} : vector<8x32xf32>, vector<32x128xf32>, vector<8x128xf32> -> vector<8x128xf32>
    %305 = arith.addf %303, %304 : vector<8x128xf32>
    %306 = vector.extract_strided_slice %305 {offsets = [0, 0], sizes = [8, 96], strides = [1, 1]} : vector<8x128xf32> to vector<8x96xf32>
    %cst_153 = arith.constant 5.000000e-01 : f32
    %307 = vector.broadcast %cst_153 : f32 to vector<8x96xf32>
    %308 = arith.mulf %307, %306 : vector<8x96xf32>
    %309 = math.tanh %308 : vector<8x96xf32>
    %cst_154 = arith.constant 5.000000e-01 : f32
    %310 = vector.broadcast %cst_154 : f32 to vector<8x96xf32>
    %311 = arith.mulf %310, %309 : vector<8x96xf32>
    %cst_155 = arith.constant 5.000000e-01 : f32
    %312 = vector.broadcast %cst_155 : f32 to vector<8x96xf32>
    %313 = arith.addf %311, %312 : vector<8x96xf32>
    %314 = vector.extract_strided_slice %313 {offsets = [0, 0], sizes = [8, 32], strides = [1, 1]} : vector<8x96xf32> to vector<8x32xf32>
    %315 = vector.extract_strided_slice %313 {offsets = [0, 32], sizes = [8, 32], strides = [1, 1]} : vector<8x96xf32> to vector<8x32xf32>
    %316 = vector.extract_strided_slice %313 {offsets = [0, 64], sizes = [8, 32], strides = [1, 1]} : vector<8x96xf32> to vector<8x32xf32>
    %317 = vector.extract_strided_slice %305 {offsets = [0, 96], sizes = [8, 32], strides = [1, 1]} : vector<8x128xf32> to vector<8x32xf32>
    %318 = math.tanh %317 : vector<8x32xf32>
    %319 = arith.mulf %315, %293 : vector<8x32xf32>
    %320 = arith.mulf %314, %318 : vector<8x32xf32>
    %321 = arith.addf %319, %320 : vector<8x32xf32>
    %322 = math.tanh %321 : vector<8x32xf32>
    %323 = arith.mulf %316, %322 : vector<8x32xf32>
    %c1_156 = arith.constant 1 : index
    %c0_157 = arith.constant 0 : index
    %c0_158 = arith.constant 0 : index
    %324 = vector.load %arg16[%c1_156, %c0_157, %c0_158] : memref<8x8x64xf32, #tpu.memory_space<vmem>>, vector<1x8x32xf32>
    %325 = vector.shape_cast %324 : vector<1x8x32xf32> to vector<8x32xf32>
    %326 = vector.shape_cast %323 : vector<8x32xf32> to vector<1x8x32xf32>
    tpu.vector_store %arg16[%c1_156, %c0_157, %c0_158], %326 {strides = array<i32>} : memref<8x8x64xf32, #tpu.memory_space<vmem>>, vector<1x8x32xf32>,
    %c6_159 = arith.constant 6 : index
    %c0_160 = arith.constant 0 : index
    %c32_161 = arith.constant 32 : index
    %327 = vector.load %arg16[%c6_159, %c0_160, %c32_161] : memref<8x8x64xf32, #tpu.memory_space<vmem>>, vector<1x8x32xf32>
    %328 = vector.shape_cast %327 : vector<1x8x32xf32> to vector<8x32xf32>
    %329 = vector.shape_cast %323 : vector<8x32xf32> to vector<1x8x32xf32>
    tpu.vector_store %arg16[%c6_159, %c0_160, %c32_161], %329 {strides = array<i32>} : memref<8x8x64xf32, #tpu.memory_space<vmem>>, vector<1x8x32xf32>,
    %c2_162 = arith.constant 2 : index
    %c0_163 = arith.constant 0 : index
    %c0_164 = arith.constant 0 : index
    %330 = vector.load %arg15[%c2_162, %c0_163, %c0_164] : memref<8x8x128xf32, #tpu.memory_space<vmem>>, vector<1x8x128xf32>
    %331 = vector.shape_cast %330 : vector<1x8x128xf32> to vector<8x128xf32>
    %cst_165 = arith.constant dense<0.000000e+00> : vector<8x128xf32>
    %332 = tpu.matmul %323, %271, %cst_165 {dimension_numbers = #tpu.dot_dimension_numbers<[1], [0], [0], [1], [0, 0, 1, 1], [], []>} : vector<8x32xf32>, vector<32x128xf32>, vector<8x128xf32> -> vector<8x128xf32>
    %333 = arith.addf %331, %332 : vector<8x128xf32>
    %334 = vector.extract_strided_slice %333 {offsets = [0, 0], sizes = [8, 96], strides = [1, 1]} : vector<8x128xf32> to vector<8x96xf32>
    %cst_166 = arith.constant 5.000000e-01 : f32
    %335 = vector.broadcast %cst_166 : f32 to vector<8x96xf32>
    %336 = arith.mulf %335, %334 : vector<8x96xf32>
    %337 = math.tanh %336 : vector<8x96xf32>
    %cst_167 = arith.constant 5.000000e-01 : f32
    %338 = vector.broadcast %cst_167 : f32 to vector<8x96xf32>
    %339 = arith.mulf %338, %337 : vector<8x96xf32>
    %cst_168 = arith.constant 5.000000e-01 : f32
    %340 = vector.broadcast %cst_168 : f32 to vector<8x96xf32>
    %341 = arith.addf %339, %340 : vector<8x96xf32>
    %342 = vector.extract_strided_slice %341 {offsets = [0, 0], sizes = [8, 32], strides = [1, 1]} : vector<8x96xf32> to vector<8x32xf32>
    %343 = vector.extract_strided_slice %341 {offsets = [0, 32], sizes = [8, 32], strides = [1, 1]} : vector<8x96xf32> to vector<8x32xf32>
    %344 = vector.extract_strided_slice %341 {offsets = [0, 64], sizes = [8, 32], strides = [1, 1]} : vector<8x96xf32> to vector<8x32xf32>
    %345 = vector.extract_strided_slice %333 {offsets = [0, 96], sizes = [8, 32], strides = [1, 1]} : vector<8x128xf32> to vector<8x32xf32>
    %346 = math.tanh %345 : vector<8x32xf32>
    %347 = arith.mulf %343, %321 : vector<8x32xf32>
    %348 = arith.mulf %342, %346 : vector<8x32xf32>
    %349 = arith.addf %347, %348 : vector<8x32xf32>
    %350 = math.tanh %349 : vector<8x32xf32>
    %351 = arith.mulf %344, %350 : vector<8x32xf32>
    %c2_169 = arith.constant 2 : index
    %c0_170 = arith.constant 0 : index
    %c0_171 = arith.constant 0 : index
    %352 = vector.load %arg16[%c2_169, %c0_170, %c0_171] : memref<8x8x64xf32, #tpu.memory_space<vmem>>, vector<1x8x32xf32>
    %353 = vector.shape_cast %352 : vector<1x8x32xf32> to vector<8x32xf32>
    %354 = vector.shape_cast %351 : vector<8x32xf32> to vector<1x8x32xf32>
    tpu.vector_store %arg16[%c2_169, %c0_170, %c0_171], %354 {strides = array<i32>} : memref<8x8x64xf32, #tpu.memory_space<vmem>>, vector<1x8x32xf32>,
    %c5_172 = arith.constant 5 : index
    %c0_173 = arith.constant 0 : index
    %c32_174 = arith.constant 32 : index
    %355 = vector.load %arg16[%c5_172, %c0_173, %c32_174] : memref<8x8x64xf32, #tpu.memory_space<vmem>>, vector<1x8x32xf32>
    %356 = vector.shape_cast %355 : vector<1x8x32xf32> to vector<8x32xf32>
    %357 = vector.shape_cast %351 : vector<8x32xf32> to vector<1x8x32xf32>
    tpu.vector_store %arg16[%c5_172, %c0_173, %c32_174], %357 {strides = array<i32>} : memref<8x8x64xf32, #tpu.memory_space<vmem>>, vector<1x8x32xf32>,
    %c3_175 = arith.constant 3 : index
    %c0_176 = arith.constant 0 : index
    %c0_177 = arith.constant 0 : index
    %358 = vector.load %arg15[%c3_175, %c0_176, %c0_177] : memref<8x8x128xf32, #tpu.memory_space<vmem>>, vector<1x8x128xf32>
    %359 = vector.shape_cast %358 : vector<1x8x128xf32> to vector<8x128xf32>
    %cst_178 = arith.constant dense<0.000000e+00> : vector<8x128xf32>
    %360 = tpu.matmul %351, %271, %cst_178 {dimension_numbers = #tpu.dot_dimension_numbers<[1], [0], [0], [1], [0, 0, 1, 1], [], []>} : vector<8x32xf32>, vector<32x128xf32>, vector<8x128xf32> -> vector<8x128xf32>
    %361 = arith.addf %359, %360 : vector<8x128xf32>
    %362 = vector.extract_strided_slice %361 {offsets = [0, 0], sizes = [8, 96], strides = [1, 1]} : vector<8x128xf32> to vector<8x96xf32>
    %cst_179 = arith.constant 5.000000e-01 : f32
    %363 = vector.broadcast %cst_179 : f32 to vector<8x96xf32>
    %364 = arith.mulf %363, %362 : vector<8x96xf32>
    %365 = math.tanh %364 : vector<8x96xf32>
    %cst_180 = arith.constant 5.000000e-01 : f32
    %366 = vector.broadcast %cst_180 : f32 to vector<8x96xf32>
    %367 = arith.mulf %366, %365 : vector<8x96xf32>
    %cst_181 = arith.constant 5.000000e-01 : f32
    %368 = vector.broadcast %cst_181 : f32 to vector<8x96xf32>
    %369 = arith.addf %367, %368 : vector<8x96xf32>
    %370 = vector.extract_strided_slice %369 {offsets = [0, 0], sizes = [8, 32], strides = [1, 1]} : vector<8x96xf32> to vector<8x32xf32>
    %371 = vector.extract_strided_slice %369 {offsets = [0, 32], sizes = [8, 32], strides = [1, 1]} : vector<8x96xf32> to vector<8x32xf32>
    %372 = vector.extract_strided_slice %369 {offsets = [0, 64], sizes = [8, 32], strides = [1, 1]} : vector<8x96xf32> to vector<8x32xf32>
    %373 = vector.extract_strided_slice %361 {offsets = [0, 96], sizes = [8, 32], strides = [1, 1]} : vector<8x128xf32> to vector<8x32xf32>
    %374 = math.tanh %373 : vector<8x32xf32>
    %375 = arith.mulf %371, %349 : vector<8x32xf32>
    %376 = arith.mulf %370, %374 : vector<8x32xf32>
    %377 = arith.addf %375, %376 : vector<8x32xf32>
    %378 = math.tanh %377 : vector<8x32xf32>
    %379 = arith.mulf %372, %378 : vector<8x32xf32>
    %c3_182 = arith.constant 3 : index
    %c0_183 = arith.constant 0 : index
    %c0_184 = arith.constant 0 : index
    %380 = vector.load %arg16[%c3_182, %c0_183, %c0_184] : memref<8x8x64xf32, #tpu.memory_space<vmem>>, vector<1x8x32xf32>
    %381 = vector.shape_cast %380 : vector<1x8x32xf32> to vector<8x32xf32>
    %382 = vector.shape_cast %379 : vector<8x32xf32> to vector<1x8x32xf32>
    tpu.vector_store %arg16[%c3_182, %c0_183, %c0_184], %382 {strides = array<i32>} : memref<8x8x64xf32, #tpu.memory_space<vmem>>, vector<1x8x32xf32>,
    %c4_185 = arith.constant 4 : index
    %c0_186 = arith.constant 0 : index
    %c32_187 = arith.constant 32 : index
    %383 = vector.load %arg16[%c4_185, %c0_186, %c32_187] : memref<8x8x64xf32, #tpu.memory_space<vmem>>, vector<1x8x32xf32>
    %384 = vector.shape_cast %383 : vector<1x8x32xf32> to vector<8x32xf32>
    %385 = vector.shape_cast %379 : vector<8x32xf32> to vector<1x8x32xf32>
    tpu.vector_store %arg16[%c4_185, %c0_186, %c32_187], %385 {strides = array<i32>} : memref<8x8x64xf32, #tpu.memory_space<vmem>>, vector<1x8x32xf32>,
    %c4_188 = arith.constant 4 : index
    %c0_189 = arith.constant 0 : index
    %c0_190 = arith.constant 0 : index
    %386 = vector.load %arg15[%c4_188, %c0_189, %c0_190] : memref<8x8x128xf32, #tpu.memory_space<vmem>>, vector<1x8x128xf32>
    %387 = vector.shape_cast %386 : vector<1x8x128xf32> to vector<8x128xf32>
    %cst_191 = arith.constant dense<0.000000e+00> : vector<8x128xf32>
    %388 = tpu.matmul %379, %271, %cst_191 {dimension_numbers = #tpu.dot_dimension_numbers<[1], [0], [0], [1], [0, 0, 1, 1], [], []>} : vector<8x32xf32>, vector<32x128xf32>, vector<8x128xf32> -> vector<8x128xf32>
    %389 = arith.addf %387, %388 : vector<8x128xf32>
    %390 = vector.extract_strided_slice %389 {offsets = [0, 0], sizes = [8, 96], strides = [1, 1]} : vector<8x128xf32> to vector<8x96xf32>
    %cst_192 = arith.constant 5.000000e-01 : f32
    %391 = vector.broadcast %cst_192 : f32 to vector<8x96xf32>
    %392 = arith.mulf %391, %390 : vector<8x96xf32>
    %393 = math.tanh %392 : vector<8x96xf32>
    %cst_193 = arith.constant 5.000000e-01 : f32
    %394 = vector.broadcast %cst_193 : f32 to vector<8x96xf32>
    %395 = arith.mulf %394, %393 : vector<8x96xf32>
    %cst_194 = arith.constant 5.000000e-01 : f32
    %396 = vector.broadcast %cst_194 : f32 to vector<8x96xf32>
    %397 = arith.addf %395, %396 : vector<8x96xf32>
    %398 = vector.extract_strided_slice %397 {offsets = [0, 0], sizes = [8, 32], strides = [1, 1]} : vector<8x96xf32> to vector<8x32xf32>
    %399 = vector.extract_strided_slice %397 {offsets = [0, 32], sizes = [8, 32], strides = [1, 1]} : vector<8x96xf32> to vector<8x32xf32>
    %400 = vector.extract_strided_slice %397 {offsets = [0, 64], sizes = [8, 32], strides = [1, 1]} : vector<8x96xf32> to vector<8x32xf32>
    %401 = vector.extract_strided_slice %389 {offsets = [0, 96], sizes = [8, 32], strides = [1, 1]} : vector<8x128xf32> to vector<8x32xf32>
    %402 = math.tanh %401 : vector<8x32xf32>
    %403 = arith.mulf %399, %377 : vector<8x32xf32>
    %404 = arith.mulf %398, %402 : vector<8x32xf32>
    %405 = arith.addf %403, %404 : vector<8x32xf32>
    %406 = math.tanh %405 : vector<8x32xf32>
    %407 = arith.mulf %400, %406 : vector<8x32xf32>
    %c4_195 = arith.constant 4 : index
    %c0_196 = arith.constant 0 : index
    %c0_197 = arith.constant 0 : index
    %408 = vector.load %arg16[%c4_195, %c0_196, %c0_197] : memref<8x8x64xf32, #tpu.memory_space<vmem>>, vector<1x8x32xf32>
    %409 = vector.shape_cast %408 : vector<1x8x32xf32> to vector<8x32xf32>
    %410 = vector.shape_cast %407 : vector<8x32xf32> to vector<1x8x32xf32>
    tpu.vector_store %arg16[%c4_195, %c0_196, %c0_197], %410 {strides = array<i32>} : memref<8x8x64xf32, #tpu.memory_space<vmem>>, vector<1x8x32xf32>,
    %c3_198 = arith.constant 3 : index
    %c0_199 = arith.constant 0 : index
    %c32_200 = arith.constant 32 : index
    %411 = vector.load %arg16[%c3_198, %c0_199, %c32_200] : memref<8x8x64xf32, #tpu.memory_space<vmem>>, vector<1x8x32xf32>
    %412 = vector.shape_cast %411 : vector<1x8x32xf32> to vector<8x32xf32>
    %413 = vector.shape_cast %407 : vector<8x32xf32> to vector<1x8x32xf32>
    tpu.vector_store %arg16[%c3_198, %c0_199, %c32_200], %413 {strides = array<i32>} : memref<8x8x64xf32, #tpu.memory_space<vmem>>, vector<1x8x32xf32>,
    %c5_201 = arith.constant 5 : index
    %c0_202 = arith.constant 0 : index
    %c0_203 = arith.constant 0 : index
    %414 = vector.load %arg15[%c5_201, %c0_202, %c0_203] : memref<8x8x128xf32, #tpu.memory_space<vmem>>, vector<1x8x128xf32>
    %415 = vector.shape_cast %414 : vector<1x8x128xf32> to vector<8x128xf32>
    %cst_204 = arith.constant dense<0.000000e+00> : vector<8x128xf32>
    %416 = tpu.matmul %407, %271, %cst_204 {dimension_numbers = #tpu.dot_dimension_numbers<[1], [0], [0], [1], [0, 0, 1, 1], [], []>} : vector<8x32xf32>, vector<32x128xf32>, vector<8x128xf32> -> vector<8x128xf32>
    %417 = arith.addf %415, %416 : vector<8x128xf32>
    %418 = vector.extract_strided_slice %417 {offsets = [0, 0], sizes = [8, 96], strides = [1, 1]} : vector<8x128xf32> to vector<8x96xf32>
    %cst_205 = arith.constant 5.000000e-01 : f32
    %419 = vector.broadcast %cst_205 : f32 to vector<8x96xf32>
    %420 = arith.mulf %419, %418 : vector<8x96xf32>
    %421 = math.tanh %420 : vector<8x96xf32>
    %cst_206 = arith.constant 5.000000e-01 : f32
    %422 = vector.broadcast %cst_206 : f32 to vector<8x96xf32>
    %423 = arith.mulf %422, %421 : vector<8x96xf32>
    %cst_207 = arith.constant 5.000000e-01 : f32
    %424 = vector.broadcast %cst_207 : f32 to vector<8x96xf32>
    %425 = arith.addf %423, %424 : vector<8x96xf32>
    %426 = vector.extract_strided_slice %425 {offsets = [0, 0], sizes = [8, 32], strides = [1, 1]} : vector<8x96xf32> to vector<8x32xf32>
    %427 = vector.extract_strided_slice %425 {offsets = [0, 32], sizes = [8, 32], strides = [1, 1]} : vector<8x96xf32> to vector<8x32xf32>
    %428 = vector.extract_strided_slice %425 {offsets = [0, 64], sizes = [8, 32], strides = [1, 1]} : vector<8x96xf32> to vector<8x32xf32>
    %429 = vector.extract_strided_slice %417 {offsets = [0, 96], sizes = [8, 32], strides = [1, 1]} : vector<8x128xf32> to vector<8x32xf32>
    %430 = math.tanh %429 : vector<8x32xf32>
    %431 = arith.mulf %427, %405 : vector<8x32xf32>
    %432 = arith.mulf %426, %430 : vector<8x32xf32>
    %433 = arith.addf %431, %432 : vector<8x32xf32>
    %434 = math.tanh %433 : vector<8x32xf32>
    %435 = arith.mulf %428, %434 : vector<8x32xf32>
    %c5_208 = arith.constant 5 : index
    %c0_209 = arith.constant 0 : index
    %c0_210 = arith.constant 0 : index
    %436 = vector.load %arg16[%c5_208, %c0_209, %c0_210] : memref<8x8x64xf32, #tpu.memory_space<vmem>>, vector<1x8x32xf32>
    %437 = vector.shape_cast %436 : vector<1x8x32xf32> to vector<8x32xf32>
    %438 = vector.shape_cast %435 : vector<8x32xf32> to vector<1x8x32xf32>
    tpu.vector_store %arg16[%c5_208, %c0_209, %c0_210], %438 {strides = array<i32>} : memref<8x8x64xf32, #tpu.memory_space<vmem>>, vector<1x8x32xf32>,
    %c2_211 = arith.constant 2 : index
    %c0_212 = arith.constant 0 : index
    %c32_213 = arith.constant 32 : index
    %439 = vector.load %arg16[%c2_211, %c0_212, %c32_213] : memref<8x8x64xf32, #tpu.memory_space<vmem>>, vector<1x8x32xf32>
    %440 = vector.shape_cast %439 : vector<1x8x32xf32> to vector<8x32xf32>
    %441 = vector.shape_cast %435 : vector<8x32xf32> to vector<1x8x32xf32>
    tpu.vector_store %arg16[%c2_211, %c0_212, %c32_213], %441 {strides = array<i32>} : memref<8x8x64xf32, #tpu.memory_space<vmem>>, vector<1x8x32xf32>,
    %c6_214 = arith.constant 6 : index
    %c0_215 = arith.constant 0 : index
    %c0_216 = arith.constant 0 : index
    %442 = vector.load %arg15[%c6_214, %c0_215, %c0_216] : memref<8x8x128xf32, #tpu.memory_space<vmem>>, vector<1x8x128xf32>
    %443 = vector.shape_cast %442 : vector<1x8x128xf32> to vector<8x128xf32>
    %cst_217 = arith.constant dense<0.000000e+00> : vector<8x128xf32>
    %444 = tpu.matmul %435, %271, %cst_217 {dimension_numbers = #tpu.dot_dimension_numbers<[1], [0], [0], [1], [0, 0, 1, 1], [], []>} : vector<8x32xf32>, vector<32x128xf32>, vector<8x128xf32> -> vector<8x128xf32>
    %445 = arith.addf %443, %444 : vector<8x128xf32>
    %446 = vector.extract_strided_slice %445 {offsets = [0, 0], sizes = [8, 96], strides = [1, 1]} : vector<8x128xf32> to vector<8x96xf32>
    %cst_218 = arith.constant 5.000000e-01 : f32
    %447 = vector.broadcast %cst_218 : f32 to vector<8x96xf32>
    %448 = arith.mulf %447, %446 : vector<8x96xf32>
    %449 = math.tanh %448 : vector<8x96xf32>
    %cst_219 = arith.constant 5.000000e-01 : f32
    %450 = vector.broadcast %cst_219 : f32 to vector<8x96xf32>
    %451 = arith.mulf %450, %449 : vector<8x96xf32>
    %cst_220 = arith.constant 5.000000e-01 : f32
    %452 = vector.broadcast %cst_220 : f32 to vector<8x96xf32>
    %453 = arith.addf %451, %452 : vector<8x96xf32>
    %454 = vector.extract_strided_slice %453 {offsets = [0, 0], sizes = [8, 32], strides = [1, 1]} : vector<8x96xf32> to vector<8x32xf32>
    %455 = vector.extract_strided_slice %453 {offsets = [0, 32], sizes = [8, 32], strides = [1, 1]} : vector<8x96xf32> to vector<8x32xf32>
    %456 = vector.extract_strided_slice %453 {offsets = [0, 64], sizes = [8, 32], strides = [1, 1]} : vector<8x96xf32> to vector<8x32xf32>
    %457 = vector.extract_strided_slice %445 {offsets = [0, 96], sizes = [8, 32], strides = [1, 1]} : vector<8x128xf32> to vector<8x32xf32>
    %458 = math.tanh %457 : vector<8x32xf32>
    %459 = arith.mulf %455, %433 : vector<8x32xf32>
    %460 = arith.mulf %454, %458 : vector<8x32xf32>
    %461 = arith.addf %459, %460 : vector<8x32xf32>
    %462 = math.tanh %461 : vector<8x32xf32>
    %463 = arith.mulf %456, %462 : vector<8x32xf32>
    %c6_221 = arith.constant 6 : index
    %c0_222 = arith.constant 0 : index
    %c0_223 = arith.constant 0 : index
    %464 = vector.load %arg16[%c6_221, %c0_222, %c0_223] : memref<8x8x64xf32, #tpu.memory_space<vmem>>, vector<1x8x32xf32>
    %465 = vector.shape_cast %464 : vector<1x8x32xf32> to vector<8x32xf32>
    %466 = vector.shape_cast %463 : vector<8x32xf32> to vector<1x8x32xf32>
    tpu.vector_store %arg16[%c6_221, %c0_222, %c0_223], %466 {strides = array<i32>} : memref<8x8x64xf32, #tpu.memory_space<vmem>>, vector<1x8x32xf32>,
    %c1_224 = arith.constant 1 : index
    %c0_225 = arith.constant 0 : index
    %c32_226 = arith.constant 32 : index
    %467 = vector.load %arg16[%c1_224, %c0_225, %c32_226] : memref<8x8x64xf32, #tpu.memory_space<vmem>>, vector<1x8x32xf32>
    %468 = vector.shape_cast %467 : vector<1x8x32xf32> to vector<8x32xf32>
    %469 = vector.shape_cast %463 : vector<8x32xf32> to vector<1x8x32xf32>
    tpu.vector_store %arg16[%c1_224, %c0_225, %c32_226], %469 {strides = array<i32>} : memref<8x8x64xf32, #tpu.memory_space<vmem>>, vector<1x8x32xf32>,
    %c7_227 = arith.constant 7 : index
    %c0_228 = arith.constant 0 : index
    %c0_229 = arith.constant 0 : index
    %470 = vector.load %arg15[%c7_227, %c0_228, %c0_229] : memref<8x8x128xf32, #tpu.memory_space<vmem>>, vector<1x8x128xf32>
    %471 = vector.shape_cast %470 : vector<1x8x128xf32> to vector<8x128xf32>
    %cst_230 = arith.constant dense<0.000000e+00> : vector<8x128xf32>
    %472 = tpu.matmul %463, %271, %cst_230 {dimension_numbers = #tpu.dot_dimension_numbers<[1], [0], [0], [1], [0, 0, 1, 1], [], []>} : vector<8x32xf32>, vector<32x128xf32>, vector<8x128xf32> -> vector<8x128xf32>
    %473 = arith.addf %471, %472 : vector<8x128xf32>
    %474 = vector.extract_strided_slice %473 {offsets = [0, 0], sizes = [8, 96], strides = [1, 1]} : vector<8x128xf32> to vector<8x96xf32>
    %cst_231 = arith.constant 5.000000e-01 : f32
    %475 = vector.broadcast %cst_231 : f32 to vector<8x96xf32>
    %476 = arith.mulf %475, %474 : vector<8x96xf32>
    %477 = math.tanh %476 : vector<8x96xf32>
    %cst_232 = arith.constant 5.000000e-01 : f32
    %478 = vector.broadcast %cst_232 : f32 to vector<8x96xf32>
    %479 = arith.mulf %478, %477 : vector<8x96xf32>
    %cst_233 = arith.constant 5.000000e-01 : f32
    %480 = vector.broadcast %cst_233 : f32 to vector<8x96xf32>
    %481 = arith.addf %479, %480 : vector<8x96xf32>
    %482 = vector.extract_strided_slice %481 {offsets = [0, 0], sizes = [8, 32], strides = [1, 1]} : vector<8x96xf32> to vector<8x32xf32>
    %483 = vector.extract_strided_slice %481 {offsets = [0, 32], sizes = [8, 32], strides = [1, 1]} : vector<8x96xf32> to vector<8x32xf32>
    %484 = vector.extract_strided_slice %481 {offsets = [0, 64], sizes = [8, 32], strides = [1, 1]} : vector<8x96xf32> to vector<8x32xf32>
    %485 = vector.extract_strided_slice %473 {offsets = [0, 96], sizes = [8, 32], strides = [1, 1]} : vector<8x128xf32> to vector<8x32xf32>
    %486 = math.tanh %485 : vector<8x32xf32>
    %487 = arith.mulf %483, %461 : vector<8x32xf32>
    %488 = arith.mulf %482, %486 : vector<8x32xf32>
    %489 = arith.addf %487, %488 : vector<8x32xf32>
    %490 = math.tanh %489 : vector<8x32xf32>
    %491 = arith.mulf %484, %490 : vector<8x32xf32>
    %c7_234 = arith.constant 7 : index
    %c0_235 = arith.constant 0 : index
    %c0_236 = arith.constant 0 : index
    %492 = vector.load %arg16[%c7_234, %c0_235, %c0_236] : memref<8x8x64xf32, #tpu.memory_space<vmem>>, vector<1x8x32xf32>
    %493 = vector.shape_cast %492 : vector<1x8x32xf32> to vector<8x32xf32>
    %494 = vector.shape_cast %491 : vector<8x32xf32> to vector<1x8x32xf32>
    tpu.vector_store %arg16[%c7_234, %c0_235, %c0_236], %494 {strides = array<i32>} : memref<8x8x64xf32, #tpu.memory_space<vmem>>, vector<1x8x32xf32>,
    %c0_237 = arith.constant 0 : index
    %c0_238 = arith.constant 0 : index
    %c32_239 = arith.constant 32 : index
    %495 = vector.load %arg16[%c0_237, %c0_238, %c32_239] : memref<8x8x64xf32, #tpu.memory_space<vmem>>, vector<1x8x32xf32>
    %496 = vector.shape_cast %495 : vector<1x8x32xf32> to vector<8x32xf32>
    %497 = vector.shape_cast %491 : vector<8x32xf32> to vector<1x8x32xf32>
    tpu.vector_store %arg16[%c0_237, %c0_238, %c32_239], %497 {strides = array<i32>} : memref<8x8x64xf32, #tpu.memory_space<vmem>>, vector<1x8x32xf32>,
    %c0_240 = arith.constant 0 : index
    %c0_241 = arith.constant 0 : index
    %c0_242 = arith.constant 0 : index
    %498 = vector.load %arg16[%c0_240, %c0_241, %c0_242] : memref<8x8x64xf32, #tpu.memory_space<vmem>>, vector<8x8x16xf32>
    %c0_243 = arith.constant 0 : index
    %c0_244 = arith.constant 0 : index
    %c48 = arith.constant 48 : index
    %499 = vector.load %arg16[%c0_243, %c0_244, %c48] : memref<8x8x64xf32, #tpu.memory_space<vmem>>, vector<8x8x16xf32>
    %500 = tpu.concatenate %498, %499 in 2 : vector<8x8x16xf32>, vector<8x8x16xf32> -> vector<8x8x32xf32>
    %501 = vector.shape_cast %500 : vector<8x8x32xf32> to vector<64x32xf32>
    %c0_245 = arith.constant 0 : index
    %c0_246 = arith.constant 0 : index
    %502 = vector.load %arg9[%c0_245, %c0_246] : memref<32x16xf32, #tpu.memory_space<vmem>>, vector<32x16xf32>
    %cst_247 = arith.constant dense<0.000000e+00> : vector<64x16xf32>
    %503 = tpu.matmul %501, %502, %cst_247 {dimension_numbers = #tpu.dot_dimension_numbers<[1], [0], [0], [1], [0, 0, 1, 1], [], []>} : vector<64x32xf32>, vector<32x16xf32>, vector<64x16xf32> -> vector<64x16xf32>
    %c0_248 = arith.constant 0 : index
    %c0_249 = arith.constant 0 : index
    %504 = vector.load %arg13[%c0_248, %c0_249] : memref<4x128xf32, #tpu.memory_space<vmem>>, vector<1x16xf32>
    %505 = vector.broadcast %504 : vector<1x16xf32> to vector<64x16xf32>
    %506 = arith.addf %503, %505 : vector<64x16xf32>
    %cst_250 = arith.constant 0.000000e+00 : f32
    %507 = vector.broadcast %cst_250 : f32 to vector<64x16xf32>
    %508 = arith.maximumf %506, %507 : vector<64x16xf32>
    %509 = vector.shape_cast %508 : vector<64x16xf32> to vector<8x8x16xf32>
    %c0_251 = arith.constant 0 : index
    %c0_252 = arith.constant 0 : index
    %510 = vector.load %arg10[%c0_251, %c0_252] : memref<1x16xf32, #tpu.memory_space<vmem>>, vector<1x16xf32>
    %511 = vector.shape_cast %510 : vector<1x16xf32> to vector<1x1x16xf32>
    %512 = vector.broadcast %511 : vector<1x1x16xf32> to vector<8x8x16xf32>
    %513 = arith.mulf %509, %512 : vector<8x8x16xf32>
    %cst_253 = arith.constant dense<0.000000e+00> : vector<8x8xf32>
    %514 = vector.multi_reduction <add>, %513, %cst_253 [2] : vector<8x8x16xf32> to vector<8x8xf32>
    %515 = vector.shape_cast %514 : vector<8x8xf32> to vector<8x8x1xf32>
    %c1_254 = arith.constant 1 : index
    %c0_255 = arith.constant 0 : index
    %516 = vector.load %arg13[%c1_254, %c0_255] : memref<4x128xf32, #tpu.memory_space<vmem>>, vector<1x1xf32>
    %517 = vector.shape_cast %516 : vector<1x1xf32> to vector<1x1x1xf32>
    %518 = vector.broadcast %517 : vector<1x1x1xf32> to vector<8x8x1xf32>
    %519 = arith.addf %515, %518 : vector<8x8x1xf32>
    %cst_256 = arith.constant dense<0xFF800000> : vector<8x1xf32>
    %520 = vector.multi_reduction <maximumf>, %519, %cst_256 [0] : vector<8x8x1xf32> to vector<8x1xf32>
    %521 = vector.shape_cast %520 : vector<8x1xf32> to vector<1x8x1xf32>
    %522 = vector.broadcast %521 : vector<1x8x1xf32> to vector<8x8x1xf32>
    %523 = arith.subf %519, %522 : vector<8x8x1xf32>
    %524 = math.exp %523 : vector<8x8x1xf32>
    %cst_257 = arith.constant dense<0.000000e+00> : vector<8x1xf32>
    %525 = vector.multi_reduction <add>, %524, %cst_257 [0] : vector<8x8x1xf32> to vector<8x1xf32>
    %526 = vector.shape_cast %525 : vector<8x1xf32> to vector<1x8x1xf32>
    %527 = vector.broadcast %526 : vector<1x8x1xf32> to vector<8x8x1xf32>
    %528 = arith.divf %524, %527 : vector<8x8x1xf32>
    %529 = vector.broadcast %528 : vector<8x8x1xf32> to vector<8x8x32xf32>
    %530 = arith.mulf %500, %529 : vector<8x8x32xf32>
    %cst_258 = arith.constant dense<0.000000e+00> : vector<8x32xf32>
    %531 = vector.multi_reduction <add>, %530, %cst_258 [0] : vector<8x8x32xf32> to vector<8x32xf32>
    %c0_259 = arith.constant 0 : index
    %c0_260 = arith.constant 0 : index
    %532 = vector.load %arg11[%c0_259, %c0_260] : memref<32x32xf32, #tpu.memory_space<vmem>>, vector<32x32xf32>
    %cst_261 = arith.constant dense<0.000000e+00> : vector<8x32xf32>
    %533 = tpu.matmul %531, %532, %cst_261 {dimension_numbers = #tpu.dot_dimension_numbers<[1], [0], [0], [1], [0, 0, 1, 1], [], []>} : vector<8x32xf32>, vector<32x32xf32>, vector<8x32xf32> -> vector<8x32xf32>
    %c2_262 = arith.constant 2 : index
    %c0_263 = arith.constant 0 : index
    %534 = vector.load %arg13[%c2_262, %c0_263] : memref<4x128xf32, #tpu.memory_space<vmem>>, vector<1x32xf32>
    %535 = vector.broadcast %534 : vector<1x32xf32> to vector<8x32xf32>
    %536 = arith.addf %533, %535 : vector<8x32xf32>
    %cst_264 = arith.constant 0.000000e+00 : f32
    %537 = vector.broadcast %cst_264 : f32 to vector<8x32xf32>
    %538 = arith.maximumf %536, %537 : vector<8x32xf32>
    %c0_265 = arith.constant 0 : index
    %c0_266 = arith.constant 0 : index
    %539 = vector.load %arg12[%c0_265, %c0_266] : memref<32x128xf32, #tpu.memory_space<vmem>>, vector<32x128xf32>
    %cst_267 = arith.constant dense<0.000000e+00> : vector<8x128xf32>
    %540 = tpu.matmul %538, %539, %cst_267 {dimension_numbers = #tpu.dot_dimension_numbers<[1], [0], [0], [1], [0, 0, 1, 1], [], []>} : vector<8x32xf32>, vector<32x128xf32>, vector<8x128xf32> -> vector<8x128xf32>
    %c3_268 = arith.constant 3 : index
    %c0_269 = arith.constant 0 : index
    %541 = vector.load %arg13[%c3_268, %c0_269] : memref<4x128xf32, #tpu.memory_space<vmem>>, vector<1x128xf32>
    %542 = vector.broadcast %541 : vector<1x128xf32> to vector<8x128xf32>
    %543 = arith.addf %540, %542 : vector<8x128xf32>
    %c0_270 = arith.constant 0 : index
    %c0_271 = arith.constant 0 : index
    %544 = vector.load %arg14[%c0_270, %c0_271] : memref<8x128xf32, #tpu.memory_space<vmem>>, vector<8x128xf32>
    tpu.vector_store %arg14[%c0_270, %c0_271], %543 {strides = array<i32>} : memref<8x128xf32, #tpu.memory_space<vmem>>, vector<8x128xf32>,
    return
  }
  func.func @transform_0(%arg0: i32) -> (i32, i32, i32) {
    %c0_i32 = arith.constant 0 : i32
    %c0_i32_0 = arith.constant 0 : i32
    %c0_i32_1 = arith.constant 0 : i32
    return %arg0, %c0_i32, %c0_i32_0 : i32, i32, i32
  }
  func.func @transform_1(%arg0: i32) -> (i32, i32, i32) {
    %c0_i32 = arith.constant 0 : i32
    %c0_i32_0 = arith.constant 0 : i32
    %c0_i32_1 = arith.constant 0 : i32
    return %arg0, %c0_i32, %c0_i32_0 : i32, i32, i32
  }
  func.func @transform_2(%arg0: i32) -> (i32, i32) {
    %c0_i32 = arith.constant 0 : i32
    %c0_i32_0 = arith.constant 0 : i32
    %c0_i32_1 = arith.constant 0 : i32
    return %c0_i32, %c0_i32_0 : i32, i32
  }
  func.func @transform_3(%arg0: i32) -> (i32, i32) {
    %c0_i32 = arith.constant 0 : i32
    %c0_i32_0 = arith.constant 0 : i32
    %c0_i32_1 = arith.constant 0 : i32
    return %c0_i32, %c0_i32_0 : i32, i32
  }
  func.func @transform_4(%arg0: i32) -> (i32, i32) {
    %c0_i32 = arith.constant 0 : i32
    %c0_i32_0 = arith.constant 0 : i32
    %c0_i32_1 = arith.constant 0 : i32
    return %c0_i32, %c0_i32_0 : i32, i32
  }
  func.func @transform_5(%arg0: i32) -> (i32, i32) {
    %c0_i32 = arith.constant 0 : i32
    %c0_i32_0 = arith.constant 0 : i32
    %c0_i32_1 = arith.constant 0 : i32
    return %c0_i32, %c0_i32_0 : i32, i32
  }
  func.func @transform_6(%arg0: i32) -> (i32, i32) {
    %c0_i32 = arith.constant 0 : i32
    %c0_i32_0 = arith.constant 0 : i32
    %c0_i32_1 = arith.constant 0 : i32
    return %c0_i32, %c0_i32_0 : i32, i32
  }
  func.func @transform_7(%arg0: i32) -> (i32, i32) {
    %c0_i32 = arith.constant 0 : i32
    %c0_i32_0 = arith.constant 0 : i32
    %c0_i32_1 = arith.constant 0 : i32
    return %c0_i32, %c0_i32_0 : i32, i32
  }
  func.func @transform_8(%arg0: i32) -> (i32, i32) {
    %c0_i32 = arith.constant 0 : i32
    %c0_i32_0 = arith.constant 0 : i32
    %c0_i32_1 = arith.constant 0 : i32
    return %c0_i32, %c0_i32_0 : i32, i32
  }
  func.func @transform_9(%arg0: i32) -> (i32, i32) {
    %c0_i32 = arith.constant 0 : i32
    %c0_i32_0 = arith.constant 0 : i32
    %c0_i32_1 = arith.constant 0 : i32
    return %c0_i32, %c0_i32_0 : i32, i32
  }
  func.func @transform_10(%arg0: i32) -> (i32, i32) {
    %c0_i32 = arith.constant 0 : i32
    %c0_i32_0 = arith.constant 0 : i32
    %c0_i32_1 = arith.constant 0 : i32
    return %c0_i32, %c0_i32_0 : i32, i32
  }
  func.func @transform_11(%arg0: i32) -> (i32, i32) {
    %c0_i32 = arith.constant 0 : i32
    %c0_i32_0 = arith.constant 0 : i32
    %c0_i32_1 = arith.constant 0 : i32
    return %c0_i32, %c0_i32_0 : i32, i32
  }
  func.func @transform_12(%arg0: i32) -> (i32, i32) {
    %c0_i32 = arith.constant 0 : i32
    %c0_i32_0 = arith.constant 0 : i32
    %c0_i32_1 = arith.constant 0 : i32
    return %c0_i32, %c0_i32_0 : i32, i32
  }
  func.func @transform_13(%arg0: i32) -> (i32, i32) {
    %c0_i32 = arith.constant 0 : i32
    %c0_i32_0 = arith.constant 0 : i32
    return %arg0, %c0_i32 : i32, i32
  }
}

</mosaic_0001>

<bundles_post_ra>
// kernel: tpu_custom_call.1
= control target key start
LH: loop header
LB: loop body
LE: loop exit
PB: predicated region body
PF: predicated region fallthrough
CT: control target
= control target key end

     0   :  { %18 = vsyncpa [#allocation5], 0  ;;  %s2697_s0 = inlined_call_operand.vmem [shape: f32[1,8,8], index: 0, kind: input, shape index: {}]   ;;  %s2698_s1 = inlined_call_operand.vmem [shape: f32[1,8,8], index: 1, kind: input, shape index: {}]   ;;  %s2699_s2 = inlined_call_operand.vmem [shape: f32[8,4], index: 2, kind: input, shape index: {}]   ;;  %s2700_s3 = inlined_call_operand.hbm [shape: f32[2,128], index: 3, kind: input, shape index: {}]   ;;  %s2701_s4 = inlined_call_operand.vmem [shape: f32[32,128], index: 4, kind: input, shape index: {}]   ;;  %s2702_s5 = inlined_call_operand.hbm [shape: f32[64,128], index: 5, kind: input, shape index: {}]   ;;  %s2703_s6 = inlined_call_operand.hbm [shape: f32[32,128], index: 6, kind: input, shape index: {}]   ;;  %s2704_s7 = inlined_call_operand.hbm [shape: f32[2,128], index: 7, kind: input, shape index: {}]   ;;  %s2705_s8 = inlined_call_operand.vmem [shape: f32[32,16], index: 8, kind: input, shape index: {}]   ;;  %s2706_s9 = inlined_call_operand.hbm [shape: f32[1,16], index: 9, kind: input, shape index: {}]   ;;  %s2707_s10 = inlined_call_operand.hbm [shape: f32[32,32], index: 10, kind: input, shape index: {}]   ;;  %s2708_s11 = inlined_call_operand.hbm [shape: f32[32,128], index: 11, kind: input, shape index: {}]   ;;  %s2709_s12 = inlined_call_operand.vmem [shape: f32[4,128], index: 12, kind: input, shape index: {}]   ;;  %s2710_s13 = inlined_call_operand.hbm [shape: f32[8,128], index: 13, kind: output, shape index: {}]  }
   0x1   :  { %19 = vsyncpa [#allocation8], 0 }
   0x2   :  { %20 = vsyncpa [#allocation11], 0 }
   0x3   :  { %21 = vsyncpa [#allocation14], 0  ;;  %s46_s27 = sshll.u32 %s2702_s5, 4  ;;  %s47_s27 = int_to_ptr.hbm [resolvable:$true] %s46_s27 }
   0x4   :  { %22 = vsyncpa [#allocation6], 0  ;;  %s2124_s28 = smov [#allocation7]   ;;  %s73_s15 = sshll.u32 %s2704_s7, 4  ;;  %s74_s15 = int_to_ptr.hbm [resolvable:$true] %s73_s15 }
   0x5   :  { %s48_s29 = sshll.u32 %s2124_s28, 4  ;;  %s2125_s16 = smov 128   ;;  %s49_s29 = int_to_ptr.vmem [resolvable:$true] %s48_s29 }
   0x6   :  { %s2126_s17 = smov 8   ;;  %s2127_s18 = smov [#allocation10]  }
   0x7   :  { %54 = dma.hbm_to_vmem [thread:$0]  %s47_s27, 1024, %s49_s29, [#allocation8], %s2125_s16, %s2125_s16, %s2126_s17  }
   0x8   :  { %s75_s19 = sshll.u32 %s2127_s18, 4  ;;  %s96_s21 = sshll.u32 %s2707_s10, 4  ;;  %s76_s19 = int_to_ptr.vmem [resolvable:$true] %s75_s19  ;;  %s97_s21 = int_to_ptr.hbm [resolvable:$true] %s96_s21 }
   0x9   :  { %78 = dma.hbm_to_vmem [thread:$0]  %s74_s15, 32, %s76_s19, [#allocation11]  }
   0xa   :  { %s34_s7 = sshll.u32 %s2700_s3, 4  ;;  %s2128_s24 = smov [#allocation13]   ;;  %s35_s7 = int_to_ptr.hbm [resolvable:$true] %s34_s7 }
   0xb   :  { %s98_s25 = sshll.u32 %s2128_s24, 4  ;;  %s2129_s26 = smov [#allocation4]   ;;  %s99_s25 = int_to_ptr.vmem [resolvable:$true] %s98_s25 }
   0xc   :  { %104 = dma.hbm_to_vmem [thread:$0]  %s97_s21, 512, %s99_s25, [#allocation14], %s2125_s16, %s2125_s16, %s2126_s17  }
   0xd   :  { %s36_s27 = sshll.u32 %s2129_s26, 4  ;;  %s59_s10 = sshll.u32 %s2703_s6, 4  ;;  %s37_s27 = int_to_ptr.vmem [resolvable:$true] %s36_s27  ;;  %s60_s10 = int_to_ptr.hbm [resolvable:$true] %s59_s10 }
   0xe   :  { %39 = dma.hbm_to_vmem [thread:$0]  %s35_s7, 32, %s37_s27, [#allocation5]  }
   0xf   :  { %s86_s3 = sshll.u32 %s2706_s9, 4  ;;  %s2130_s15 = smov [#allocation9]   ;;  %s87_s3 = int_to_ptr.hbm [resolvable:$true] %s86_s3 }
  0x10   :  { %s61_s18 = sshll.u32 %s2130_s15, 4  ;;  %s2131_s19 = smov [#allocation12]   ;;  %s62_s18 = int_to_ptr.vmem [resolvable:$true] %s61_s18 }
  0x11   :  { %67 = dma.hbm_to_vmem [thread:$0]  %s60_s10, 512, %s62_s18, [#allocation8], %s2125_s16, %s2125_s16, %s2126_s17  }
  0x12   :  { %s88_s20 = sshll.u32 %s2131_s19, 4  ;;  %s109_s6 = sshll.u32 %s2708_s11, 4  ;;  %s89_s20 = int_to_ptr.vmem [resolvable:$true] %s88_s20  ;;  %s110_s6 = int_to_ptr.hbm [resolvable:$true] %s109_s6 }
  0x13   :  { %91 = dma.hbm_to_vmem [thread:$0]  %s87_s3, 16, %s89_s20, [#allocation11]  }
  0x14   :  { %s2132_s22 = smov [#allocation15]  }
  0x15   :  { %s111_s23 = sshll.u32 %s2132_s22, 4  ;;  %s112_s23 = int_to_ptr.vmem [resolvable:$true] %s111_s23 }
  0x16   :  { %117 = dma.hbm_to_vmem [thread:$0]  %s110_s6, 512, %s112_s23, [#allocation14], %s2125_s16, %s2125_s16, %s2126_s17  }
  0x17   :  { %2114 = dma.done.wait [#allocation5], 32  }
  0x18   :  { %2115 = vsyncadd [#allocation5], 4294967264 }
  0x19   :  { %2116 = dma.done.wait [#allocation8], 1536  }
  0x1a   :  { %2117 = vsyncadd [#allocation8], 4294965760 }
  0x1b   :  { %2118 = dma.done.wait [#allocation11], 48  }
  0x1c   :  { %2119 = vsyncadd [#allocation11], 4294967248 }
  0x1d   :  { %2120 = dma.done.wait [#allocation14], 1024  }
  0x1e   :  { %2121 = vsyncadd [#allocation14], 4294966272  ;;  %v2133_v0 = vmov 0   ;;  %v2134_v1 = vmov 1   ;;  %v173_v2 = vlaneseq  ;;  %v149_v4 = vld [vmem:[%s2699_s2] sm:$0xff]  ;;  %v333_v5 = vld [vmem:[%s2701_s4 + $0x18] sm:$0xff] }
  0x1f   :  { %1789 = vset.pattern.permute.xlu0 %v2133_v0  ;;  %1791 = vset.pattern.permute.xlu1 %v2134_v1  ;;  %v332_v6 = vld [vmem:[%s2701_s4 + $0x10] sm:$0xff]  ;;  %v331_v7 = vld [vmem:[%s2701_s4 + $0x8] sm:$0xff]  ;;  %v330_v8 = vld [vmem:[%s2701_s4] sm:$0xff]  ;;  %v2135_v9 = vmov 2   ;;  %v2136_v10 = vmov 3   ;;  %v2137_v11 = vmov 0.0  }
  0x20   :  { %v174_v3 = vshrl.u32 %v173_v2, 7  ;;  %152 = vperm.xlu0 %1789, %v149_v4   ;;  %157 = vperm.xlu1 %1791, %v149_v4   ;;  %v148_v12 = vld [vmem:[%s2697_s0] sm:$0xff]  ;;  %s2138_s0 = smov 32   ;;  %vm335_vm0 = vcmask 261120   ;;  %s2140_s30 = smov 96   ;;  %vm391_vm1 = vcmask 523520  }
  0x21   :  { %351 = vmatpush.msra.mxu0 %v333_v5  ;;  %409 = vmatpush.msra.mxu1 %v333_v5  ;;  %v161_v18 = vld [vmem:[%s2698_s1] sm:$0xff]  ;;  %s2139_s1 = smov 64   ;;  %vm807_vm2 = vcmask 523264   ;;  %vm1373_vm3 = vcmask 130048   ;;  %vm1507_vm4 = vcmask 7168   ;;  %s2141_s7 = smov [#allocation16]  }
  0x22   :  { %1793 = vset.pattern.permute.xlu2 %v174_v3  ;;  %467 = vmatpush.msra.mxu2 %v333_v5  ;;  %v2274_v25 = vld [vmem:[#allocation4] ss:$0 sm:$0xff]  ;;  %v2276_v26 = vld [vmem:[#allocation4 + $0x1] ss:$0 sm:$0xff]  ;;  %v2280_v30 = vld [vmem:[#allocation10] ss:$0 sm:$0xff] }
  0x23   :  { %525 = vmatpush.msra.mxu3 %v333_v5  ;;  %352 = vmatpush.msra.mxu0 %v332_v6  ;;  %s1712_s24 = sshll.u32 %s2141_s7, 4  ;;  %s1714_s2 = sshll.u32 %s2710_s13, 4  ;;  %s1713_s24 = int_to_ptr.vmem [resolvable:$true] %s1712_s24  ;;  %s1715_s2 = int_to_ptr.hbm [resolvable:$true] %s1714_s2 }
  0x24   :  { %410 = vmatpush.msra.mxu1 %v332_v6  ;;  %468 = vmatpush.msra.mxu2 %v332_v6 }
  0x25   :  { %526 = vmatpush.msra.mxu3 %v332_v6  ;;  %353 = vmatpush.msra.mxu0 %v331_v7 }
  0x26   :  { %411 = vmatpush.msra.mxu1 %v331_v7  ;;  %469 = vmatpush.msra.mxu2 %v331_v7 }
  0x27   :  { %527 = vmatpush.msra.mxu3 %v331_v7  ;;  %354 = vmatpush.msra.mxu0 %v330_v8 }
  0x28   :  { %412 = vmatpush.msra.mxu1 %v330_v8  ;;  %1790 = vset.pattern.permute.xlu0 %v2135_v9 }
  0x29   :  { %1792 = vset.pattern.permute.xlu1 %v2136_v10  ;;  %163 = vperm.xlu0 %1790, %v149_v4  }
  0x2a   :  { %168 = vperm.xlu1 %1792, %v149_v4   ;;  %355 = vmatmul.f32.vlgmr.msra.gmra.mxu0 %v2137_v11 }
  0x2b   :  { %470 = vmatpush.msra.mxu2 %v330_v8  ;;  %528 = vmatpush.msra.mxu3 %v330_v8 }
  0x2c   :  { %583 = vmatpush.msrb.mxu0 %v333_v5  ;;  %639 = vmatpush.msrb.mxu1 %v333_v5 }
  0x2d   :  { %695 = vmatpush.msrb.mxu2 %v333_v5  ;;  %751 = vmatpush.msrb.mxu3 %v333_v5 }
  0x2e   :  { %584 = vmatpush.msrb.mxu0 %v332_v6  ;;  %640 = vmatpush.msrb.mxu1 %v332_v6 }
  0x2f   :  { %696 = vmatpush.msrb.mxu2 %v332_v6  ;;  %752 = vmatpush.msrb.mxu3 %v332_v6 }
  0x30   :  { %585 = vmatpush.msrb.mxu0 %v331_v7  ;;  %641 = vmatpush.msrb.mxu1 %v331_v7 }
  0x31   :  { %697 = vmatpush.msrb.mxu2 %v331_v7  ;;  %1794 = vset.pattern.permute.xlu0 %v174_v3 }
  0x32   :  { %1795 = vset.pattern.permute.xlu1 %v174_v3  ;;  %586 = vmatpush.msrb.mxu0 %v330_v8 }
  0x33   :  { %642 = vmatpush.msrb.mxu1 %v330_v8  ;;  %698 = vmatpush.msrb.mxu2 %v330_v8 }
  0x34   :  { %753 = vmatpush.msrb.mxu3 %v331_v7 }
  0x36   :  { %754 = vmatpush.msrb.mxu3 %v330_v8 }
  0x92   :  { %v153_v13 = vpop.permute.xlu0 %152  ;;  %v158_v14 = vpop.permute.xlu1 %157 }
  0x93   :  { %v155_v15 = vmul.f32 %v153_v13, %v148_v12 }
  0x95   :  { %v2265_v16 = vadd.f32 %v158_v14, %v155_v15 }
  0x97   :  { %v172_v17 = vperm.slane %v2265_v16, 0  ;;  %v179_v42 = vperm.slane %v2265_v16, 1  ;;  %v186_v48 = vperm.slane %v2265_v16, 2 }
  0x99   :  { %177 = vperm.xlu2 %1793, %v172_v17  }
  0x9b   :  { %v164_v19 = vpop.permute.xlu0 %163 }
  0x9c   :  { %v169_v20 = vpop.permute.xlu1 %168  ;;  %v166_v21 = vmul.f32 %v164_v19, %v161_v18 }
  0x9e   :  { %v2271_v22 = vadd.f32 %v169_v20, %v166_v21 }
  0xa0   :  { %v238_v23 = vperm.slane %v2271_v22, 0  ;;  %v245_v47 = vperm.slane %v2271_v22, 1  ;;  %v252_v8 = vperm.slane %v2271_v22, 2 }
  0xa2   :  { %243 = vperm.xlu2 %1793, %v238_v23  }
  0xa7   :  { %v356_v32 = vpop.f32.mrf.mxu0 }
  0xf3   :  { %v178_v24 = vpop.permute.xlu2 %177 }
  0xf4   :  { %v230_v28 = vmul.f32 %v2274_v25, %v178_v24 }
  0xfc   :  { %v244_v27 = vpop.permute.xlu2 %243 }
  0xfd   :  { %v296_v29 = vmul.f32 %v2276_v26, %v244_v27 }
  0xff   :  { %v304_v31 = vadd.f32 %v296_v29, %v230_v28 }
 0x101   :  { %v314_v33 = vadd.f32 %v2280_v30, %v304_v31 }
 0x103   :  { %v359_v34 = vadd.f32 %v356_v32, %v314_v33  ;;  %v193_v33 = vperm.slane %v2265_v16, 3 }
 0x105   :  { %1808 = vtanh.f32 %v359_v34  ;;  %v360_v36 = vmul.f32 0.5, %v359_v34 }
 0x107   :  { %1810 = vtanh.f32 %v360_v36 }
 0x10b   :  { %v1809_v35 = vpop.eup %1808 }
 0x10c   :  { %367 = vrot.lane.b32.xlu1 %v1809_v35, %s2138_s0 }
 0x10d   :  { %v1811_v37 = vpop.eup %1810 }
 0x10e   :  { %v362_v38 = vmul.f32 0.5, %v1811_v37 }
 0x110   :  { %v363_v39 = vadd.f32 0.5, %v362_v38  ;;  %v259_v38 = vperm.slane %v2271_v22, 3 }
 0x112   :  { %v365_v43 = vmul.f32 0.0, %v363_v39 }
 0x17e   :  { %v368_v40 = vpop.permute.xlu1 %367 }
 0x17f   :  { %v370_v41 = vmul.f32 %v368_v40, %v363_v39 }
 0x181   :  { %372 = vrot.lane.b32.xlu2 %v370_v41, %s2138_s0 }
 0x189   :  { %184 = vperm.xlu2 %1793, %v179_v42  }
 0x191   :  { %1798 = vset.pattern.permute.xlu2 %v2133_v0 }
 0x1db   :  { %v373_v44 = vpop.permute.xlu2 %372 }
 0x1dc   :  { %v375_v45 = vadd.f32 %v373_v44, %v365_v43 }
 0x1de   :  { %1812 = vtanh.f32 %v375_v45 }
 0x1e3   :  { %v185_v53 = vpop.permute.xlu2 %184 }
 0x1e4   :  { %v1813_v46 = vpop.eup %1812  ;;  %v231_v55 = vmul.f32 %v2274_v25, %v185_v53 }
 0x1e5   :  { %378 = vrot.lane.b32.xlu0 %v1813_v46, %s2138_s0 }
 0x1ed   :  { %250 = vperm.xlu0 %1794, %v245_v47  }
 0x1f5   :  { %191 = vperm.xlu0 %1794, %v186_v48  }
 0x257   :  { %v379_v49 = vpop.permute.xlu0 %378 }
 0x258   :  { %v2290_v50 = vmul.f32 %v379_v49, %v363_v39 }
 0x25a   :  { %383 = vrot.lane.b32.xlu1 %v2290_v50, %s2139_s1 }
 0x25f   :  { %v251_v52 = vpop.permute.xlu0 %250 }
 0x260   :  { %v297_v54 = vmul.f32 %v2276_v26, %v251_v52 }
 0x262   :  { %v305_v56 = vadd.f32 %v297_v54, %v231_v55 }
 0x264   :  { %v315_v57 = vadd.f32 %v2280_v30, %v305_v56 }
 0x267   :  { %v192_v14 = vpop.permute.xlu0 %191 }
 0x268   :  { %v232_v17 = vmul.f32 %v2274_v25, %v192_v14 }
 0x2cc   :  { %v384_v51 = vpop.permute.xlu1 %383 }
 0x2cd   :  { %386 = vst.msk [vmem:[#allocation3] sm:$0xff] %vm335_vm0, %v384_v51  ;;  %1727 = vmatmul.msk.f32.vlgmr.msra.gmra.mxu1 %vm335_vm0, %v384_v51 }
 0x34a   :  { %v414_v58 = vpop.f32.mrf.mxu1 }
 0x34b   :  { %v417_v59 = vadd.f32 %v414_v58, %v315_v57  ;;  %v200_v58 = vperm.slane %v2265_v16, 4 }
 0x34d   :  { %1814 = vtanh.f32 %v417_v59  ;;  %v418_v61 = vmul.f32 0.5, %v417_v59 }
 0x34f   :  { %1816 = vtanh.f32 %v418_v61 }
 0x353   :  { %v1815_v60 = vpop.eup %1814 }
 0x354   :  { %425 = vrot.lane.b32.xlu1 %v1815_v60, %s2138_s0 }
 0x355   :  { %v1817_v62 = vpop.eup %1816 }
 0x356   :  { %v420_v63 = vmul.f32 0.5, %v1817_v62 }
 0x358   :  { %v421_v1 = vadd.f32 0.5, %v420_v63  ;;  %v266_v63 = vperm.slane %v2271_v22, 4 }
 0x35a   :  { %v423_v4 = vmul.f32 %v421_v1, %v375_v45 }
 0x3c6   :  { %v426_v2 = vpop.permute.xlu1 %425 }
 0x3c7   :  { %v428_v3 = vmul.f32 %v426_v2, %v421_v1 }
 0x3c9   :  { %430 = vrot.lane.b32.xlu2 %v428_v3, %s2138_s0 }
 0x423   :  { %v431_v5 = vpop.permute.xlu2 %430 }
 0x424   :  { %v433_v6 = vadd.f32 %v431_v5, %v423_v4 }
 0x426   :  { %1818 = vtanh.f32 %v433_v6 }
 0x42c   :  { %v1819_v7 = vpop.eup %1818 }
 0x42d   :  { %436 = vrot.lane.b32.xlu1 %v1819_v7, %s2138_s0 }
 0x435   :  { %257 = vperm.xlu1 %1795, %v252_v8  }
 0x49f   :  { %v437_v9 = vpop.permute.xlu1 %436 }
 0x4a0   :  { %v2303_v10 = vmul.f32 %v437_v9, %v421_v1 }
 0x4a2   :  { %441 = vrot.lane.b32.xlu2 %v2303_v10, %s2139_s1 }
 0x4a7   :  { %v258_v13 = vpop.permute.xlu1 %257 }
 0x4a8   :  { %v298_v15 = vmul.f32 %v2276_v26, %v258_v13 }
 0x4aa   :  { %v306_v18 = vadd.f32 %v298_v15, %v232_v17 }
 0x4ac   :  { %v316_v19 = vadd.f32 %v2280_v30, %v306_v18 }
 0x4fc   :  { %v442_v12 = vpop.permute.xlu2 %441 }
 0x4fd   :  { %445 = vst.msk [vmem:[#allocation3 + $0x8] sm:$0xff] %vm335_vm0, %v442_v12  ;;  %1728 = vmatmul.msk.f32.vlgmr.msra.gmra.mxu2 %vm335_vm0, %v442_v12 }
 0x580   :  { %v472_v20 = vpop.f32.mrf.mxu2 }
 0x581   :  { %v475_v21 = vadd.f32 %v472_v20, %v316_v19 }
 0x583   :  { %1820 = vtanh.f32 %v475_v21  ;;  %v476_v24 = vmul.f32 0.5, %v475_v21 }
 0x585   :  { %1822 = vtanh.f32 %v476_v24 }
 0x589   :  { %v1821_v23 = vpop.eup %1820 }
 0x58a   :  { %483 = vrot.lane.b32.xlu2 %v1821_v23, %s2138_s0  ;;  %v207_v23 = vperm.slane %v2265_v16, 5 }
 0x58b   :  { %v1823_v27 = vpop.eup %1822 }
 0x58c   :  { %v478_v28 = vmul.f32 0.5, %v1823_v27 }
 0x58e   :  { %v479_v29 = vadd.f32 0.5, %v478_v28 }
 0x590   :  { %v481_v34 = vmul.f32 %v479_v29, %v433_v6 }
 0x5e4   :  { %v484_v31 = vpop.permute.xlu2 %483 }
 0x5e5   :  { %v486_v32 = vmul.f32 %v484_v31, %v479_v29  ;;  %v273_v31 = vperm.slane %v2271_v22, 5 }
 0x5e7   :  { %488 = vrot.lane.b32.xlu0 %v486_v32, %s2138_s0 }
 0x5ef   :  { %198 = vperm.xlu0 %1794, %v193_v33  }
 0x659   :  { %v489_v35 = vpop.permute.xlu0 %488 }
 0x65a   :  { %v491_v36 = vadd.f32 %v489_v35, %v481_v34 }
 0x65c   :  { %1824 = vtanh.f32 %v491_v36 }
 0x661   :  { %v199_v43 = vpop.permute.xlu0 %198 }
 0x662   :  { %v1825_v37 = vpop.eup %1824  ;;  %v233_v45 = vmul.f32 %v2274_v25, %v199_v43 }
 0x663   :  { %494 = vrot.lane.b32.xlu1 %v1825_v37, %s2138_s0 }
 0x66b   :  { %264 = vperm.xlu1 %1795, %v259_v38  }
 0x6d5   :  { %v495_v39 = vpop.permute.xlu1 %494 }
 0x6d6   :  { %v2317_v40 = vmul.f32 %v495_v39, %v479_v29 }
 0x6d8   :  { %499 = vrot.lane.b32.xlu2 %v2317_v40, %s2139_s1 }
 0x6dd   :  { %v265_v42 = vpop.permute.xlu1 %264 }
 0x6de   :  { %v299_v44 = vmul.f32 %v2276_v26, %v265_v42 }
 0x6e0   :  { %v307_v46 = vadd.f32 %v299_v44, %v233_v45 }
 0x6e2   :  { %v317_v47 = vadd.f32 %v2280_v30, %v307_v46 }
 0x732   :  { %v500_v41 = vpop.permute.xlu2 %499 }
 0x733   :  { %503 = vst.msk [vmem:[#allocation3 + $0x10] sm:$0xff] %vm335_vm0, %v500_v41  ;;  %1729 = vmatmul.msk.f32.vlgmr.msra.gmra.mxu3 %vm335_vm0, %v500_v41 }
 0x7b6   :  { %v530_v48 = vpop.f32.mrf.mxu3 }
 0x7b7   :  { %v533_v49 = vadd.f32 %v530_v48, %v317_v47 }
 0x7b9   :  { %1826 = vtanh.f32 %v533_v49  ;;  %v534_v52 = vmul.f32 0.5, %v533_v49 }
 0x7bb   :  { %1828 = vtanh.f32 %v534_v52  ;;  %v214_v52 = vperm.slane %v2265_v16, 6 }
 0x7bf   :  { %v1827_v51 = vpop.eup %1826 }
 0x7c0   :  { %541 = vrot.lane.b32.xlu2 %v1827_v51, %s2138_s0 }
 0x7c1   :  { %v1829_v53 = vpop.eup %1828 }
 0x7c2   :  { %v536_v54 = vmul.f32 0.5, %v1829_v53 }
 0x7c4   :  { %v537_v55 = vadd.f32 0.5, %v536_v54 }
 0x7c6   :  { %v539_v59 = vmul.f32 %v537_v55, %v491_v36 }
 0x81a   :  { %v542_v56 = vpop.permute.xlu2 %541 }
 0x81b   :  { %v544_v57 = vmul.f32 %v542_v56, %v537_v55 }
 0x81d   :  { %546 = vrot.lane.b32.xlu0 %v544_v57, %s2138_s0  ;;  %v280_v57 = vperm.slane %v2271_v22, 6 }
 0x825   :  { %205 = vperm.xlu0 %1794, %v200_v58  }
 0x88f   :  { %v547_v60 = vpop.permute.xlu0 %546 }
 0x890   :  { %v549_v61 = vadd.f32 %v547_v60, %v539_v59 }
 0x892   :  { %1830 = vtanh.f32 %v549_v61 }
 0x897   :  { %v206_v5 = vpop.permute.xlu0 %205 }
 0x898   :  { %v1831_v62 = vpop.eup %1830  ;;  %v234_v7 = vmul.f32 %v2274_v25, %v206_v5 }
 0x899   :  { %552 = vrot.lane.b32.xlu1 %v1831_v62, %s2138_s0 }
 0x8a1   :  { %271 = vperm.xlu1 %1795, %v266_v63  }
 0x90b   :  { %v553_v1 = vpop.permute.xlu1 %552 }
 0x90c   :  { %v2331_v2 = vmul.f32 %v553_v1, %v537_v55 }
 0x90e   :  { %557 = vrot.lane.b32.xlu2 %v2331_v2, %s2139_s1 }
 0x913   :  { %v272_v4 = vpop.permute.xlu1 %271 }
 0x914   :  { %v300_v6 = vmul.f32 %v2276_v26, %v272_v4 }
 0x916   :  { %v308_v8 = vadd.f32 %v300_v6, %v234_v7 }
 0x918   :  { %v318_v9 = vadd.f32 %v2280_v30, %v308_v8 }
 0x968   :  { %v558_v3 = vpop.permute.xlu2 %557 }
 0x969   :  { %561 = vst.msk [vmem:[#allocation3 + $0x18] sm:$0xff] %vm335_vm0, %v558_v3  ;;  %1730 = vmatmul.msk.f32.vlgmr.msrb.gmra.mxu0 %vm335_vm0, %v558_v3 }
 0x9e6   :  { %v588_v12 = vpop.f32.mrf.mxu0 }
 0x9e7   :  { %v591_v13 = vadd.f32 %v588_v12, %v318_v9 }
 0x9e9   :  { %1832 = vtanh.f32 %v591_v13  ;;  %v592_v15 = vmul.f32 0.5, %v591_v13 }
 0x9eb   :  { %1834 = vtanh.f32 %v592_v15 }
 0x9ef   :  { %v1833_v14 = vpop.eup %1832 }
 0x9f0   :  { %599 = vrot.lane.b32.xlu2 %v1833_v14, %s2138_s0 }
 0x9f1   :  { %v1835_v17 = vpop.eup %1834 }
 0x9f2   :  { %v594_v18 = vmul.f32 0.5, %v1835_v17  ;;  %v221_v17 = vperm.slane %v2265_v16, 7 }
 0x9f4   :  { %v595_v19 = vadd.f32 0.5, %v594_v18 }
 0x9f6   :  { %v597_v24 = vmul.f32 %v595_v19, %v549_v61 }
 0xa4a   :  { %v600_v20 = vpop.permute.xlu2 %599 }
 0xa4b   :  { %v602_v21 = vmul.f32 %v600_v20, %v595_v19 }
 0xa4d   :  { %604 = vrot.lane.b32.xlu0 %v602_v21, %s2138_s0 }
 0xa55   :  { %212 = vperm.xlu0 %1794, %v207_v23   ;;  %v287_v23 = vperm.slane %v2271_v22, 7 }
 0xabf   :  { %v605_v27 = vpop.permute.xlu0 %604 }
 0xac0   :  { %v607_v28 = vadd.f32 %v605_v27, %v597_v24 }
 0xac2   :  { %1836 = vtanh.f32 %v607_v28 }
 0xac7   :  { %v213_v36 = vpop.permute.xlu0 %212 }
 0xac8   :  { %v1837_v29 = vpop.eup %1836  ;;  %v235_v38 = vmul.f32 %v2274_v25, %v213_v36 }
 0xac9   :  { %610 = vrot.lane.b32.xlu1 %v1837_v29, %s2138_s0 }
 0xad1   :  { %278 = vperm.xlu1 %1795, %v273_v31  }
 0xb3b   :  { %v611_v32 = vpop.permute.xlu1 %610 }
 0xb3c   :  { %v2345_v33 = vmul.f32 %v611_v32, %v595_v19 }
 0xb3e   :  { %615 = vrot.lane.b32.xlu2 %v2345_v33, %s2139_s1 }
 0xb43   :  { %v279_v35 = vpop.permute.xlu1 %278 }
 0xb44   :  { %v301_v37 = vmul.f32 %v2276_v26, %v279_v35 }
 0xb46   :  { %v309_v39 = vadd.f32 %v301_v37, %v235_v38 }
 0xb48   :  { %v319_v41 = vadd.f32 %v2280_v30, %v309_v39 }
 0xb98   :  { %v2349_v34 = vpop.permute.xlu2 %615 }
 0xb99   :  { %1731 = vmatmul.msk.f32.vlgmr.msrb.gmra.mxu1 %vm335_vm0, %v2349_v34 }
 0xc16   :  { %v644_v42 = vpop.f32.mrf.mxu1 }
 0xc17   :  { %v647_v43 = vadd.f32 %v644_v42, %v319_v41 }
 0xc19   :  { %1838 = vtanh.f32 %v647_v43  ;;  %v648_v45 = vmul.f32 0.5, %v647_v43 }
 0xc1b   :  { %1840 = vtanh.f32 %v648_v45 }
 0xc1f   :  { %v1839_v44 = vpop.eup %1838 }
 0xc20   :  { %655 = vrot.lane.b32.xlu2 %v1839_v44, %s2138_s0 }
 0xc21   :  { %v1841_v46 = vpop.eup %1840 }
 0xc22   :  { %v650_v47 = vmul.f32 0.5, %v1841_v46  ;;  %v806_v46 = vld [vmem:[#allocation7 + $0x38] sm:$0xff] }
 0xc23   :  { %840 = vmatpush.msra.mxu0 %v806_v46  ;;  %1759 = vmatpush.msra.mxu2 %v806_v46 }
 0xc24   :  { %v651_v48 = vadd.f32 0.5, %v650_v47  ;;  %v805_v47 = vld [vmem:[#allocation7 + $0x30] sm:$0xff] }
 0xc25   :  { %841 = vmatpush.msra.mxu0 %v805_v47  ;;  %1760 = vmatpush.msra.mxu2 %v805_v47 }
 0xc26   :  { %v653_v53 = vmul.f32 %v651_v48, %v607_v28 }
 0xc7a   :  { %v656_v49 = vpop.permute.xlu2 %655 }
 0xc7b   :  { %v658_v51 = vmul.f32 %v656_v49, %v651_v48  ;;  %v803_v49 = vld [vmem:[#allocation7 + $0x20] sm:$0xff] }
 0xc7d   :  { %660 = vrot.lane.b32.xlu0 %v658_v51, %s2138_s0 }
 0xc85   :  { %219 = vperm.xlu0 %1794, %v214_v52  }
 0xcef   :  { %v661_v54 = vpop.permute.xlu0 %660 }
 0xcf0   :  { %v663_v55 = vadd.f32 %v661_v54, %v653_v53  ;;  %v802_v53 = vld [vmem:[#allocation7 + $0x18] sm:$0xff] }
 0xcf1   :  { %v2397_v54 = vld [vmem:[#allocation9 + $0x18] sm:$0xff] }
 0xcf2   :  { %1842 = vtanh.f32 %v663_v55  ;;  %908 = vmatpush.msra.mxu1 %v2397_v54  ;;  %1018 = vmatpush.msra.mxu3 %v2397_v54 }
 0xcf7   :  { %v220_v62 = vpop.permute.xlu0 %219 }
 0xcf8   :  { %v1843_v56 = vpop.eup %1842  ;;  %v236_v1 = vmul.f32 %v2274_v25, %v220_v62  ;;  %v2409_v62 = vld [vmem:[#allocation9] sm:$0xff] }
 0xcf9   :  { %666 = vrot.lane.b32.xlu1 %v1843_v56, %s2138_s0  ;;  %v2400_v56 = vld [vmem:[#allocation9 + $0x10] sm:$0xff] }
 0xcfa   :  { %909 = vmatpush.msra.mxu1 %v2400_v56  ;;  %1019 = vmatpush.msra.mxu3 %v2400_v56 }
 0xd01   :  { %285 = vperm.xlu1 %1795, %v280_v57   ;;  %v800_v57 = vld [vmem:[#allocation7 + $0x8] sm:$0xff] }
 0xd6b   :  { %v667_v58 = vpop.permute.xlu1 %666 }
 0xd6c   :  { %v2361_v59 = vmul.f32 %v667_v58, %v651_v48  ;;  %v804_v48 = vld [vmem:[#allocation7 + $0x28] sm:$0xff] }
 0xd6d   :  { %842 = vmatpush.msra.mxu0 %v804_v48  ;;  %1761 = vmatpush.msra.mxu2 %v804_v48  ;;  %v2402_v58 = vld [vmem:[#allocation9 + $0x8] sm:$0xff] }
 0xd6e   :  { %671 = vrot.lane.b32.xlu2 %v2361_v59, %s2139_s1  ;;  %910 = vmatpush.msra.mxu1 %v2402_v58 }
 0xd6f   :  { %843 = vmatpush.msra.mxu0 %v803_v49  ;;  %1762 = vmatpush.msra.mxu2 %v803_v49 }
 0xd70   :  { %1020 = vmatpush.msra.mxu3 %v2402_v58  ;;  %911 = vmatpush.msra.mxu1 %v2409_v62 }
 0xd71   :  { %844 = vmatpush.msra.mxu0 %v802_v53  ;;  %1763 = vmatpush.msra.mxu2 %v802_v53 }
 0xd72   :  { %912 = vmatmul.f32.vlgmr.msra.gmra.mxu1 %v2137_v11  ;;  %1021 = vmatpush.msra.mxu3 %v2409_v62 }
 0xd73   :  { %v286_v61 = vpop.permute.xlu1 %285  ;;  %1073 = vmatpush.msrb.mxu1 %v2397_v54 }
 0xd74   :  { %v302_v63 = vmul.f32 %v2276_v26, %v286_v61  ;;  %v799_v61 = vld [vmem:[#allocation7] sm:$0xff] }
 0xd75   :  { %1074 = vmatpush.msrb.mxu1 %v2400_v56 }
 0xd76   :  { %v310_v3 = vadd.f32 %v302_v63, %v236_v1  ;;  %v2432_v1 = vld [vmem:[#allocation10 + $0x1] ss:$0 sm:$0xff] }
 0xd77   :  { %1075 = vmatpush.msrb.mxu1 %v2402_v58 }
 0xd78   :  { %v320_v4 = vadd.f32 %v2280_v30, %v310_v3 }
 0xd79   :  { %1076 = vmatpush.msrb.mxu1 %v2409_v62 }
 0xd7b   :  { %1238 = vmatpush.msra.mxu1 %v2397_v54 }
 0xd7d   :  { %1239 = vmatpush.msra.mxu1 %v2400_v56 }
 0xd7f   :  { %1240 = vmatpush.msra.mxu1 %v2402_v58 }
 0xd81   :  { %1241 = vmatpush.msra.mxu1 %v2409_v62 }
 0xdc8   :  { %v2365_v60 = vpop.permute.xlu2 %671 }
 0xdc9   :  { %1732 = vmatmul.msk.f32.vlgmr.msrb.gmra.mxu2 %vm335_vm0, %v2365_v60 }
 0xe4c   :  { %v700_v5 = vpop.f32.mrf.mxu2 }
 0xe4d   :  { %v703_v6 = vadd.f32 %v700_v5, %v320_v4  ;;  %v913_v4 = vpop.f32.mrf.mxu1 }
 0xe4f   :  { %1844 = vtanh.f32 %v703_v6  ;;  %v704_v8 = vmul.f32 0.5, %v703_v6 }
 0xe51   :  { %1846 = vtanh.f32 %v704_v8 }
 0xe55   :  { %v1845_v7 = vpop.eup %1844 }
 0xe56   :  { %711 = vrot.lane.b32.xlu2 %v1845_v7, %s2138_s0 }
 0xe57   :  { %v1847_v9 = vpop.eup %1846 }
 0xe58   :  { %v706_v12 = vmul.f32 0.5, %v1847_v9 }
 0xe5a   :  { %v707_v13 = vadd.f32 0.5, %v706_v12 }
 0xe5c   :  { %v709_v18 = vmul.f32 %v707_v13, %v663_v55  ;;  %v801_v55 = vld [vmem:[#allocation7 + $0x10] sm:$0xff] }
 0xe5d   :  { %845 = vmatpush.msra.mxu0 %v801_v55  ;;  %1764 = vmatpush.msra.mxu2 %v801_v55 }
 0xe5f   :  { %846 = vmatpush.msra.mxu0 %v800_v57  ;;  %1765 = vmatpush.msra.mxu2 %v800_v57 }
 0xe61   :  { %847 = vmatpush.msra.mxu0 %v799_v61  ;;  %1766 = vmatpush.msra.mxu2 %v799_v61 }
 0xe63   :  { %963 = vmatpush.msrb.mxu2 %v2397_v54 }
 0xe65   :  { %964 = vmatpush.msrb.mxu2 %v2400_v56 }
 0xe67   :  { %965 = vmatpush.msrb.mxu2 %v2402_v58 }
 0xe69   :  { %966 = vmatpush.msrb.mxu2 %v2409_v62 }
 0xeb0   :  { %v712_v14 = vpop.permute.xlu2 %711 }
 0xeb1   :  { %v714_v15 = vmul.f32 %v712_v14, %v707_v13 }
 0xeb3   :  { %716 = vrot.lane.b32.xlu0 %v714_v15, %s2138_s0 }
 0xebb   :  { %226 = vperm.xlu0 %1794, %v221_v17  }
 0xec3   :  { %1796 = vset.pattern.permute.xlu0 %v2133_v0 }
 0xf25   :  { %v717_v19 = vpop.permute.xlu0 %716 }
 0xf26   :  { %v719_v20 = vadd.f32 %v717_v19, %v709_v18 }
 0xf28   :  { %1848 = vtanh.f32 %v719_v20 }
 0xf2d   :  { %v227_v29 = vpop.permute.xlu0 %226 }
 0xf2e   :  { %v1849_v21 = vpop.eup %1848  ;;  %v237_v22 = vmul.f32 %v2274_v25, %v227_v29 }
 0xf2f   :  { %722 = vrot.lane.b32.xlu1 %v1849_v21, %s2138_s0 }
 0xf37   :  { %292 = vperm.xlu1 %1795, %v287_v23  }
 0xf3f   :  { %1797 = vset.pattern.permute.xlu1 %v2133_v0 }
 0xfa1   :  { %v723_v24 = vpop.permute.xlu1 %722 }
 0xfa2   :  { %v2379_v27 = vmul.f32 %v723_v24, %v707_v13 }
 0xfa4   :  { %727 = vrot.lane.b32.xlu2 %v2379_v27, %s2139_s1 }
 0xfa9   :  { %v293_v28 = vpop.permute.xlu1 %292 }
 0xfaa   :  { %v303_v31 = vmul.f32 %v2276_v26, %v293_v28 }
 0xfac   :  { %v311_v32 = vadd.f32 %v303_v31, %v237_v22 }
 0xfae   :  { %v321_v0 = vadd.f32 %v2280_v30, %v311_v32 }
 0xffe   :  { %v2383_v16 = vpop.permute.xlu2 %727 }
 0xfff   :  { %1733 = vmatmul.msk.f32.vlgmr.msrb.gmra.mxu3 %vm335_vm0, %v2383_v16 }
0x1000   :  { %1183 = vmatpush.msrb.mxu3 %v2397_v54 }
0x1002   :  { %1184 = vmatpush.msrb.mxu3 %v2400_v56 }
0x1004   :  { %1185 = vmatpush.msrb.mxu3 %v2402_v58 }
0x1006   :  { %1186 = vmatpush.msrb.mxu3 %v2409_v62 }
0x1082   :  { %v756_v35 = vpop.f32.mrf.mxu3 }
0x1083   :  { %v759_v36 = vadd.f32 %v756_v35, %v321_v0 }
0x1085   :  { %1850 = vtanh.f32 %v759_v36  ;;  %v760_v38 = vmul.f32 0.5, %v759_v36 }
0x1087   :  { %1852 = vtanh.f32 %v760_v38 }
0x108b   :  { %v1851_v37 = vpop.eup %1850 }
0x108c   :  { %767 = vrot.lane.b32.xlu2 %v1851_v37, %s2138_s0 }
0x108d   :  { %v1853_v39 = vpop.eup %1852 }
0x108e   :  { %v762_v41 = vmul.f32 0.5, %v1853_v39 }
0x1090   :  { %v763_v42 = vadd.f32 0.5, %v762_v41 }
0x1092   :  { %v765_v26 = vmul.f32 %v763_v42, %v719_v20 }
0x10e6   :  { %v768_v43 = vpop.permute.xlu2 %767 }
0x10e7   :  { %v770_v44 = vmul.f32 %v768_v43, %v763_v42 }
0x10e9   :  { %772 = vrot.lane.b32.xlu0 %v770_v44, %s2138_s0 }
0x115b   :  { %v773_v25 = vpop.permute.xlu0 %772 }
0x115c   :  { %v775_v45 = vadd.f32 %v773_v25, %v765_v26 }
0x115e   :  { %1854 = vtanh.f32 %v775_v45 }
0x1164   :  { %v1855_v30 = vpop.eup %1854 }
0x1165   :  { %778 = vrot.lane.b32.xlu1 %v1855_v30, %s2138_s0 }
0x11d7   :  { %v779_v51 = vpop.permute.xlu1 %778 }
0x11d8   :  { %v2393_v52 = vmul.f32 %v779_v51, %v763_v42 }
0x11da   :  { %787 = vrot.lane.b32.xlu2 %v2393_v52, %s2140_s30 }
0x1234   :  { %v788_v11 = vpop.permute.xlu2 %787 }
0x1235   :  { %790 = vst.msk [vmem:[#allocation3] sm:$0xff] %vm391_vm1, %v788_v11 }
0x123c   :  { %v791_v63 = vld [vmem:[#allocation3] sm:$0xff] }
0x123d   :  { %1734 = vmatmul.msk.f32.vlgmr.msra.gmra.mxu0 %vm807_vm2, %v791_v63 }
0x12ba   :  { %v849_v3 = vpop.f32.mrf.mxu0 }
0x12bb   :  { %v875_v5 = vadd.f32 %v2432_v1, %v849_v3 }
0x12bd   :  { %v916_v6 = vadd.f32 %v913_v4, %v875_v5 }
0x12bf   :  { %1856 = vtanh.f32 %v916_v6  ;;  %v917_v8 = vmul.f32 0.5, %v916_v6 }
0x12c1   :  { %1858 = vtanh.f32 %v917_v8 }
0x12c5   :  { %v1857_v7 = vpop.eup %1856 }
0x12c6   :  { %924 = vrot.lane.b32.xlu0 %v1857_v7, %s2138_s0 }
0x12c7   :  { %v1859_v9 = vpop.eup %1858 }
0x12c8   :  { %v919_v12 = vmul.f32 0.5, %v1859_v9 }
0x12ca   :  { %v920_v13 = vadd.f32 0.5, %v919_v12 }
0x12cc   :  { %v922_v20 = vmul.f32 0.0, %v920_v13 }
0x12ce   :  { %446 = vrot.lane.b32.xlu0 %v2303_v10, %s2140_s30 }
0x12d6   :  { %731 = vrot.lane.b32.xlu0 %v2379_v27, %s2140_s30 }
0x1338   :  { %v925_v14 = vpop.permute.xlu0 %924 }
0x1339   :  { %v927_v15 = vmul.f32 %v925_v14, %v920_v13 }
0x133b   :  { %929 = vrot.lane.b32.xlu1 %v927_v15, %s2138_s0 }
0x1340   :  { %v447_v17 = vpop.permute.xlu0 %446 }
0x1341   :  { %450 = vst.msk [vmem:[#allocation3 + $0x30] sm:$0xff] %vm391_vm1, %v447_v17 }
0x1342   :  { %730 = vst.msk [vmem:[#allocation3 + $0x30] sm:$0xff] %vm335_vm0, %v2383_v16 }
0x1343   :  { %387 = vrot.lane.b32.xlu1 %v2290_v50, %s2140_s30 }
0x1348   :  { %v732_v10 = vpop.permute.xlu0 %731 }
0x1349   :  { %734 = vst.msk [vmem:[#allocation3 + $0x8] sm:$0xff] %vm391_vm1, %v732_v10  ;;  %v797_v18 = vld [vmem:[#allocation3 + $0x30] sm:$0xff] }
0x134a   :  { %1740 = vmatmul.msk.f32.vlgmr.msra.gmra.mxu2 %vm807_vm2, %v797_v18 }
0x134b   :  { %1128 = vmatpush.msra.mxu2 %v2397_v54 }
0x134d   :  { %1129 = vmatpush.msra.mxu2 %v2400_v56 }
0x134f   :  { %1130 = vmatpush.msra.mxu2 %v2402_v58 }
0x1350   :  { %v792_v19 = vld [vmem:[#allocation3 + $0x8] sm:$0xff] }
0x1351   :  { %1735 = vmatmul.msk.f32.gmra.mxu0 %vm807_vm2, %v792_v19  ;;  %1131 = vmatpush.msra.mxu2 %v2409_v62 }
0x13ad   :  { %v930_v21 = vpop.permute.xlu1 %929 }
0x13ae   :  { %v932_v50 = vadd.f32 %v930_v21, %v922_v20 }
0x13b0   :  { %1860 = vtanh.f32 %v932_v50 }
0x13b5   :  { %v388_v23 = vpop.permute.xlu1 %387 }
0x13b6   :  { %v1861_v24 = vpop.eup %1860  ;;  %392 = vst.msk [vmem:[#allocation3 + $0x38] sm:$0xff] %vm391_vm1, %v388_v23 }
0x13b7   :  { %935 = vrot.lane.b32.xlu2 %v1861_v24, %s2138_s0 }
0x13bf   :  { %783 = vrot.lane.b32.xlu2 %v2393_v52, %s2139_s1 }
0x13cd   :  { %v2469_v22 = vpop.f32.mrf.mxu2 }
0x13ce   :  { %v852_v0 = vpop.f32.mrf.mxu0 }
0x13cf   :  { %v876_v35 = vadd.f32 %v2432_v1, %v852_v0 }
0x1411   :  { %v936_v27 = vpop.permute.xlu2 %935 }
0x1412   :  { %v2457_v16 = vmul.f32 %v936_v27, %v920_v13 }
0x1414   :  { %940 = vrot.lane.b32.xlu1 %v2457_v16, %s2139_s1 }
0x1419   :  { %v784_v28 = vpop.permute.xlu2 %783 }
0x141a   :  { %786 = vst.msk [vmem:[#allocation3 + $0x38] sm:$0xff] %vm335_vm0, %v784_v28 }
0x1421   :  { %v798_v29 = vld [vmem:[#allocation3 + $0x38] sm:$0xff] }
0x1422   :  { %1741 = vmatmul.msk.f32.gmra.mxu2 %vm807_vm2, %v798_v29 }
0x1486   :  { %v941_v31 = vpop.permute.xlu1 %940 }
0x1487   :  { %943 = vst.msk [vmem:[#allocation3] sm:$0xff] %vm335_vm0, %v941_v31  ;;  %1742 = vmatmul.msk.f32.vlgmr.msrb.gmra.mxu2 %vm335_vm0, %v941_v31 }
0x1488   :  { %1293 = vmatpush.msrb.mxu2 %v2397_v54 }
0x148a   :  { %1294 = vmatpush.msrb.mxu2 %v2400_v56 }
0x148c   :  { %1295 = vmatpush.msrb.mxu2 %v2402_v58 }
0x148e   :  { %1296 = vmatpush.msrb.mxu2 %v2409_v62 }
0x14a5   :  { %v2471_v32 = vpop.f32.mrf.mxu2 }
0x150a   :  { %v968_v36 = vpop.f32.mrf.mxu2 }
0x150b   :  { %v971_v37 = vadd.f32 %v968_v36, %v876_v35 }
0x150d   :  { %1862 = vtanh.f32 %v971_v37  ;;  %v972_v39 = vmul.f32 0.5, %v971_v37 }
0x150f   :  { %1864 = vtanh.f32 %v972_v39 }
0x1513   :  { %v1863_v38 = vpop.eup %1862 }
0x1514   :  { %979 = vrot.lane.b32.xlu2 %v1863_v38, %s2138_s0 }
0x1515   :  { %v1865_v41 = vpop.eup %1864 }
0x1516   :  { %v974_v42 = vmul.f32 0.5, %v1865_v41 }
0x1518   :  { %v975_v43 = vadd.f32 0.5, %v974_v42 }
0x151a   :  { %v977_v30 = vmul.f32 %v975_v43, %v932_v50 }
0x151c   :  { %675 = vrot.lane.b32.xlu2 %v2361_v59, %s2140_s30 }
0x156e   :  { %v980_v44 = vpop.permute.xlu2 %979 }
0x156f   :  { %v982_v26 = vmul.f32 %v980_v44, %v975_v43 }
0x1571   :  { %984 = vrot.lane.b32.xlu0 %v982_v26, %s2138_s0 }
0x1576   :  { %v676_v25 = vpop.permute.xlu2 %675 }
0x1577   :  { %678 = vst.msk [vmem:[#allocation3 + $0x10] sm:$0xff] %vm391_vm1, %v676_v25 }
0x157e   :  { %v793_v45 = vld [vmem:[#allocation3 + $0x10] sm:$0xff] }
0x157f   :  { %1736 = vmatmul.msk.f32.gmra.mxu0 %vm807_vm2, %v793_v45 }
0x15e3   :  { %v985_v46 = vpop.permute.xlu0 %984 }
0x15e4   :  { %v987_v47 = vadd.f32 %v985_v46, %v977_v30 }
0x15e6   :  { %1866 = vtanh.f32 %v987_v47 }
0x15ec   :  { %v1867_v59 = vpop.eup %1866 }
0x15ed   :  { %990 = vrot.lane.b32.xlu1 %v1867_v59, %s2138_s0 }
0x15fc   :  { %v855_v52 = vpop.f32.mrf.mxu0 }
0x15fd   :  { %v877_v53 = vadd.f32 %v2432_v1, %v855_v52 }
0x165f   :  { %v991_v48 = vpop.permute.xlu1 %990 }
0x1660   :  { %v2481_v49 = vmul.f32 %v991_v48, %v975_v43 }
0x1662   :  { %995 = vrot.lane.b32.xlu0 %v2481_v49, %s2139_s1 }
0x16d4   :  { %v996_v51 = vpop.permute.xlu0 %995 }
0x16d5   :  { %998 = vst.msk [vmem:[#allocation3 + $0x8] sm:$0xff] %vm335_vm0, %v996_v51  ;;  %1743 = vmatmul.msk.f32.vlgmr.msra.gmra.mxu3 %vm335_vm0, %v996_v51 }
0x1758   :  { %v1023_v54 = vpop.f32.mrf.mxu3 }
0x1759   :  { %v1026_v55 = vadd.f32 %v1023_v54, %v877_v53 }
0x175b   :  { %1868 = vtanh.f32 %v1026_v55  ;;  %v1027_v57 = vmul.f32 0.5, %v1026_v55 }
0x175d   :  { %1870 = vtanh.f32 %v1027_v57 }
0x1761   :  { %v1869_v56 = vpop.eup %1868 }
0x1762   :  { %1034 = vrot.lane.b32.xlu1 %v1869_v56, %s2138_s0 }
0x1763   :  { %v1871_v58 = vpop.eup %1870 }
0x1764   :  { %v1029_v61 = vmul.f32 0.5, %v1871_v58 }
0x1766   :  { %v1030_v62 = vadd.f32 0.5, %v1029_v61 }
0x1768   :  { %v1032_v5 = vmul.f32 %v1030_v62, %v987_v47 }
0x176a   :  { %619 = vrot.lane.b32.xlu1 %v2345_v33, %s2140_s30 }
0x17d4   :  { %v1035_v11 = vpop.permute.xlu1 %1034 }
0x17d5   :  { %v1037_v63 = vmul.f32 %v1035_v11, %v1030_v62 }
0x17d7   :  { %1039 = vrot.lane.b32.xlu2 %v1037_v63, %s2138_s0 }
0x17dc   :  { %v620_v3 = vpop.permute.xlu1 %619 }
0x17dd   :  { %622 = vst.msk [vmem:[#allocation3 + $0x18] sm:$0xff] %vm391_vm1, %v620_v3 }
0x17e4   :  { %v794_v4 = vld [vmem:[#allocation3 + $0x18] sm:$0xff] }
0x17e5   :  { %1737 = vmatmul.msk.f32.gmra.mxu0 %vm807_vm2, %v794_v4 }
0x1831   :  { %v1040_v6 = vpop.permute.xlu2 %1039 }
0x1832   :  { %v1042_v7 = vadd.f32 %v1040_v6, %v1032_v5 }
0x1834   :  { %1872 = vtanh.f32 %v1042_v7 }
0x183a   :  { %v1873_v33 = vpop.eup %1872 }
0x183b   :  { %1045 = vrot.lane.b32.xlu0 %v1873_v33, %s2138_s0 }
0x1862   :  { %v858_v13 = vpop.f32.mrf.mxu0 }
0x1863   :  { %v878_v14 = vadd.f32 %v2432_v1, %v858_v13  ;;  %v881_v13 = vadd.f32 %v2432_v1, %v2469_v22 }
0x18ad   :  { %v1046_v8 = vpop.permute.xlu0 %1045 }
0x18ae   :  { %v2495_v9 = vmul.f32 %v1046_v8, %v1030_v62 }
0x18b0   :  { %1050 = vrot.lane.b32.xlu2 %v2495_v9, %s2139_s1 }
0x190a   :  { %v1051_v12 = vpop.permute.xlu2 %1050 }
0x190b   :  { %1053 = vst.msk [vmem:[#allocation3 + $0x10] sm:$0xff] %vm335_vm0, %v1051_v12  ;;  %1744 = vmatmul.msk.f32.vlgmr.msrb.gmra.mxu1 %vm335_vm0, %v1051_v12 }
0x1988   :  { %v1078_v15 = vpop.f32.mrf.mxu1 }
0x1989   :  { %v1081_v17 = vadd.f32 %v1078_v15, %v878_v14 }
0x198b   :  { %1874 = vtanh.f32 %v1081_v17  ;;  %v1082_v18 = vmul.f32 0.5, %v1081_v17 }
0x198d   :  { %1876 = vtanh.f32 %v1082_v18 }
0x1991   :  { %v1875_v10 = vpop.eup %1874 }
0x1992   :  { %1089 = vrot.lane.b32.xlu0 %v1875_v10, %s2138_s0 }
0x1993   :  { %v1877_v19 = vpop.eup %1876 }
0x1994   :  { %v1084_v20 = vmul.f32 0.5, %v1877_v19 }
0x1996   :  { %v1085_v21 = vadd.f32 0.5, %v1084_v20 }
0x1998   :  { %v1087_v28 = vmul.f32 %v1085_v21, %v1042_v7 }
0x199a   :  { %562 = vrot.lane.b32.xlu0 %v2331_v2, %s2140_s30 }
0x1a04   :  { %v1090_v50 = vpop.permute.xlu0 %1089 }
0x1a05   :  { %v1092_v23 = vmul.f32 %v1090_v50, %v1085_v21 }
0x1a07   :  { %1094 = vrot.lane.b32.xlu1 %v1092_v23, %s2138_s0 }
0x1a0c   :  { %v563_v24 = vpop.permute.xlu0 %562 }
0x1a0d   :  { %566 = vst.msk [vmem:[#allocation3 + $0x20] sm:$0xff] %vm391_vm1, %v563_v24 }
0x1a0e   :  { %618 = vst.msk [vmem:[#allocation3 + $0x20] sm:$0xff] %vm335_vm0, %v2349_v34 }
0x1a15   :  { %v795_v27 = vld [vmem:[#allocation3 + $0x20] sm:$0xff] }
0x1a16   :  { %1738 = vmatmul.msk.f32.gmra.mxu0 %vm807_vm2, %v795_v27 }
0x1a79   :  { %v1095_v2 = vpop.permute.xlu1 %1094 }
0x1a7a   :  { %v1097_v29 = vadd.f32 %v1095_v2, %v1087_v28 }
0x1a7c   :  { %1878 = vtanh.f32 %v1097_v29 }
0x1a82   :  { %v1879_v31 = vpop.eup %1878 }
0x1a83   :  { %1100 = vrot.lane.b32.xlu2 %v1879_v31, %s2138_s0  ;;  %v882_v31 = vadd.f32 %v2432_v1, %v2471_v32 }
0x1a93   :  { %v861_v34 = vpop.f32.mrf.mxu0 }
0x1a94   :  { %v879_v37 = vadd.f32 %v2432_v1, %v861_v34 }
0x1add   :  { %v1101_v0 = vpop.permute.xlu2 %1100 }
0x1ade   :  { %v2511_v35 = vmul.f32 %v1101_v0, %v1085_v21 }
0x1ae0   :  { %1105 = vrot.lane.b32.xlu1 %v2511_v35, %s2139_s1 }
0x1b52   :  { %v1106_v36 = vpop.permute.xlu1 %1105 }
0x1b53   :  { %1108 = vst.msk [vmem:[#allocation3 + $0x18] sm:$0xff] %vm335_vm0, %v1106_v36  ;;  %1745 = vmatmul.msk.f32.vlgmr.msra.gmra.mxu2 %vm335_vm0, %v1106_v36 }
0x1bd6   :  { %v1133_v38 = vpop.f32.mrf.mxu2 }
0x1bd7   :  { %v1136_v39 = vadd.f32 %v1133_v38, %v879_v37 }
0x1bd9   :  { %1880 = vtanh.f32 %v1136_v39  ;;  %v1137_v42 = vmul.f32 0.5, %v1136_v39 }
0x1bdb   :  { %1882 = vtanh.f32 %v1137_v42 }
0x1bdf   :  { %v1881_v41 = vpop.eup %1880 }
0x1be0   :  { %1144 = vrot.lane.b32.xlu2 %v1881_v41, %s2138_s0 }
0x1be1   :  { %v1883_v43 = vpop.eup %1882 }
0x1be2   :  { %v1139_v44 = vmul.f32 0.5, %v1883_v43 }
0x1be4   :  { %v1140_v26 = vadd.f32 0.5, %v1139_v44 }
0x1be6   :  { %v1142_v47 = vmul.f32 %v1140_v26, %v1097_v29 }
0x1be8   :  { %504 = vrot.lane.b32.xlu2 %v2317_v40, %s2140_s30 }
0x1c3a   :  { %v1145_v25 = vpop.permute.xlu2 %1144 }
0x1c3b   :  { %v1147_v45 = vmul.f32 %v1145_v25, %v1140_v26 }
0x1c3d   :  { %1149 = vrot.lane.b32.xlu0 %v1147_v45, %s2138_s0 }
0x1c42   :  { %v505_v30 = vpop.permute.xlu2 %504 }
0x1c43   :  { %508 = vst.msk [vmem:[#allocation3 + $0x28] sm:$0xff] %vm391_vm1, %v505_v30 }
0x1c44   :  { %674 = vst.msk [vmem:[#allocation3 + $0x28] sm:$0xff] %vm335_vm0, %v2365_v60 }
0x1c4b   :  { %v796_v46 = vld [vmem:[#allocation3 + $0x28] sm:$0xff] }
0x1c4c   :  { %1739 = vmatmul.msk.f32.gmra.mxu0 %vm807_vm2, %v796_v46 }
0x1caf   :  { %v1150_v40 = vpop.permute.xlu0 %1149 }
0x1cb0   :  { %v1152_v59 = vadd.f32 %v1150_v40, %v1142_v47 }
0x1cb2   :  { %1884 = vtanh.f32 %v1152_v59 }
0x1cb8   :  { %v1885_v48 = vpop.eup %1884 }
0x1cb9   :  { %1155 = vrot.lane.b32.xlu1 %v1885_v48, %s2138_s0 }
0x1cc9   :  { %v864_v60 = vpop.f32.mrf.mxu0 }
0x1cca   :  { %v880_v54 = vadd.f32 %v2432_v1, %v864_v60  ;;  %v1384_v60 = vld [vmem:[%s2705_s8 + $0x10] sm:$0xff] }
0x1d2b   :  { %v1156_v51 = vpop.permute.xlu1 %1155 }
0x1d2c   :  { %v1158_v52 = vmul.f32 %v1156_v51, %v1140_v26 }
0x1d2e   :  { %1160 = vrot.lane.b32.xlu0 %v1158_v52, %s2139_s1 }
0x1da0   :  { %v2528_v53 = vpop.permute.xlu0 %1160 }
0x1da1   :  { %1746 = vmatmul.msk.f32.vlgmr.msrb.gmra.mxu3 %vm335_vm0, %v2528_v53 }
0x1e24   :  { %v1188_v55 = vpop.f32.mrf.mxu3 }
0x1e25   :  { %v1191_v56 = vadd.f32 %v1188_v55, %v880_v54  ;;  %v1383_v54 = vld [vmem:[%s2705_s8 + $0x8] sm:$0xff]  ;;  %v1382_v55 = vld [vmem:[%s2705_s8] sm:$0xff] }
0x1e27   :  { %1886 = vtanh.f32 %v1191_v56  ;;  %v1192_v58 = vmul.f32 0.5, %v1191_v56 }
0x1e29   :  { %1888 = vtanh.f32 %v1192_v58 }
0x1e2d   :  { %v1887_v57 = vpop.eup %1886 }
0x1e2e   :  { %1199 = vrot.lane.b32.xlu1 %v1887_v57, %s2138_s0 }
0x1e2f   :  { %v1889_v61 = vpop.eup %1888 }
0x1e30   :  { %v1194_v62 = vmul.f32 0.5, %v1889_v61 }
0x1e32   :  { %v1195_v11 = vadd.f32 0.5, %v1194_v62 }
0x1e34   :  { %v1197_v4 = vmul.f32 %v1195_v11, %v1152_v59 }
0x1ea0   :  { %v1200_v63 = vpop.permute.xlu1 %1199 }
0x1ea1   :  { %v1202_v3 = vmul.f32 %v1200_v63, %v1195_v11 }
0x1ea3   :  { %1204 = vrot.lane.b32.xlu2 %v1202_v3, %s2138_s0 }
0x1efd   :  { %v1205_v5 = vpop.permute.xlu2 %1204 }
0x1efe   :  { %v1207_v6 = vadd.f32 %v1205_v5, %v1197_v4 }
0x1f00   :  { %1890 = vtanh.f32 %v1207_v6 }
0x1f06   :  { %v1891_v7 = vpop.eup %1890 }
0x1f07   :  { %1210 = vrot.lane.b32.xlu0 %v1891_v7, %s2138_s0 }
0x1f79   :  { %v1211_v33 = vpop.permute.xlu0 %1210 }
0x1f7a   :  { %v1213_v8 = vmul.f32 %v1211_v33, %v1195_v11 }
0x1f7c   :  { %1215 = vrot.lane.b32.xlu1 %v1213_v8, %s2139_s1 }
0x1fee   :  { %v2537_v12 = vpop.permute.xlu1 %1215 }
0x1fef   :  { %1747 = vmatmul.msk.f32.vlgmr.msra.gmra.mxu1 %vm335_vm0, %v2537_v12 }
0x206c   :  { %v1243_v14 = vpop.f32.mrf.mxu1 }
0x206d   :  { %v1246_v15 = vadd.f32 %v1243_v14, %v881_v13 }
0x206f   :  { %1892 = vtanh.f32 %v1246_v15  ;;  %v1247_v10 = vmul.f32 0.5, %v1246_v15 }
0x2071   :  { %1894 = vtanh.f32 %v1247_v10 }
0x2075   :  { %v1893_v17 = vpop.eup %1892 }
0x2076   :  { %1254 = vrot.lane.b32.xlu2 %v1893_v17, %s2138_s0 }
0x2077   :  { %v1895_v18 = vpop.eup %1894 }
0x2078   :  { %v1249_v19 = vmul.f32 0.5, %v1895_v18 }
0x207a   :  { %v1250_v20 = vadd.f32 0.5, %v1249_v19  ;;  %v1803_v19 = vld [vmem:[%s2709_s12] ss:$0 sm:$0xff] }
0x207c   :  { %v1252_v23 = vmul.f32 %v1250_v20, %v1207_v6 }
0x20d0   :  { %v1255_v21 = vpop.permute.xlu2 %1254 }
0x20d1   :  { %v1257_v50 = vmul.f32 %v1255_v21, %v1250_v20 }
0x20d3   :  { %1259 = vrot.lane.b32.xlu0 %v1257_v50, %s2138_s0  ;;  %v1804_v50 = vld [vmem:[#allocation12] ss:$0 sm:$0xff] }
0x2145   :  { %v1260_v24 = vpop.permute.xlu0 %1259 }
0x2146   :  { %v1262_v27 = vadd.f32 %v1260_v24, %v1252_v23 }
0x2148   :  { %1896 = vtanh.f32 %v1262_v27 }
0x214e   :  { %v1897_v22 = vpop.eup %1896 }
0x214f   :  { %1265 = vrot.lane.b32.xlu1 %v1897_v22, %s2138_s0 }
0x21c1   :  { %v1266_v28 = vpop.permute.xlu1 %1265 }
0x21c2   :  { %v1268_v2 = vmul.f32 %v1266_v28, %v1250_v20 }
0x21c4   :  { %1270 = vrot.lane.b32.xlu2 %v1268_v2, %s2139_s1 }
0x221e   :  { %v1271_v29 = vpop.permute.xlu2 %1270 }
0x221f   :  { %1748 = vmatmul.msk.f32.vlgmr.msrb.gmra.mxu2 %vm335_vm0, %v1271_v29 }
0x22a2   :  { %v1298_v0 = vpop.f32.mrf.mxu2 }
0x22a3   :  { %v1301_v36 = vadd.f32 %v1298_v0, %v882_v31 }
0x22a5   :  { %1898 = vtanh.f32 %v1301_v36  ;;  %v1302_v37 = vmul.f32 0.5, %v1301_v36 }
0x22a7   :  { %1900 = vtanh.f32 %v1302_v37 }
0x22ab   :  { %v1899_v34 = vpop.eup %1898 }
0x22ac   :  { %1309 = vrot.lane.b32.xlu0 %v1899_v34, %s2138_s0 }
0x22ad   :  { %v1901_v38 = vpop.eup %1900 }
0x22ae   :  { %v1304_v39 = vmul.f32 0.5, %v1901_v38 }
0x22b0   :  { %v1305_v41 = vadd.f32 0.5, %v1304_v39 }
0x22b2   :  { %v1307_v1 = vmul.f32 %v1305_v41, %v1262_v27 }
0x22b4   :  { %1164 = vrot.lane.b32.xlu0 %v1158_v52, %s2140_s30 }
0x231e   :  { %v1310_v42 = vpop.permute.xlu0 %1309 }
0x231f   :  { %v1312_v43 = vmul.f32 %v1310_v42, %v1305_v41 }
0x2321   :  { %1314 = vrot.lane.b32.xlu1 %v1312_v43, %s2138_s0 }
0x2326   :  { %v1165_v44 = vpop.permute.xlu0 %1164 }
0x2327   :  { %1167 = vst.msk [vmem:[#allocation3 + $0x18] sm:$0xff] %vm391_vm1, %v1165_v44 }
0x2329   :  { %1109 = vrot.lane.b32.xlu1 %v2511_v35, %s2140_s30 }
0x232e   :  { %v1336_v48 = vld [vmem:[#allocation3 + $0x18] sm:$0xff] }
0x2331   :  { %999 = vrot.lane.b32.xlu1 %v2481_v49, %s2140_s30 }
0x2393   :  { %v1315_v32 = vpop.permute.xlu1 %1314 }
0x2394   :  { %v1317_v26 = vadd.f32 %v1315_v32, %v1307_v1 }
0x2396   :  { %1902 = vtanh.f32 %v1317_v26 }
0x239b   :  { %v1110_v25 = vpop.permute.xlu1 %1109 }
0x239c   :  { %v1903_v45 = vpop.eup %1902  ;;  %1112 = vst.msk [vmem:[#allocation3 + $0x20] sm:$0xff] %vm391_vm1, %v1110_v25 }
0x239d   :  { %1163 = vst.msk [vmem:[#allocation3 + $0x20] sm:$0xff] %vm335_vm0, %v2528_v53  ;;  %1320 = vrot.lane.b32.xlu2 %v1903_v45, %s2138_s0 }
0x23a3   :  { %v1000_v30 = vpop.permute.xlu1 %999 }
0x23a4   :  { %1002 = vst.msk [vmem:[#allocation3 + $0x30] sm:$0xff] %vm391_vm1, %v1000_v30  ;;  %v1337_v47 = vld [vmem:[#allocation3 + $0x20] sm:$0xff] }
0x23a5   :  { %1273 = vst.msk [vmem:[#allocation3 + $0x30] sm:$0xff] %vm335_vm0, %v1271_v29  ;;  %1054 = vrot.lane.b32.xlu2 %v2495_v9, %s2140_s30 }
0x23ac   :  { %v1339_v59 = vld [vmem:[#allocation3 + $0x30] sm:$0xff] }
0x23ad   :  { %1274 = vrot.lane.b32.xlu2 %v1268_v2, %s2140_s30 }
0x23b5   :  { %1219 = vrot.lane.b32.xlu2 %v1213_v8, %s2140_s30 }
0x23f7   :  { %v1321_v49 = vpop.permute.xlu2 %1320 }
0x23f8   :  { %v1323_v35 = vmul.f32 %v1321_v49, %v1305_v41 }
0x23fa   :  { %1325 = vrot.lane.b32.xlu1 %v1323_v35, %s2139_s1  ;;  %1329 = vrot.lane.b32.xlu0 %v1323_v35, %s2140_s30 }
0x23ff   :  { %v1055_v46 = vpop.permute.xlu2 %1054 }
0x2400   :  { %1057 = vst.msk [vmem:[#allocation3 + $0x28] sm:$0xff] %vm391_vm1, %v1055_v46 }
0x2401   :  { %1218 = vst.msk [vmem:[#allocation3 + $0x28] sm:$0xff] %vm335_vm0, %v2537_v12 }
0x2402   :  { %1357 = vrot.lane.b32.xlu1 %v1337_v47, %s2140_s30  ;;  %944 = vrot.lane.b32.xlu0 %v2457_v16, %s2140_s30  ;;  %v1385_v16 = vld [vmem:[%s2705_s8 + $0x18] sm:$0xff] }
0x2403   :  { %1767 = vmatpush.msra.mxu3 %v1385_v16  ;;  %1424 = vmatpush.msrb.mxu1 %v1385_v16 }
0x2405   :  { %1768 = vmatpush.msra.mxu3 %v1384_v60  ;;  %1425 = vmatpush.msrb.mxu1 %v1384_v60 }
0x2407   :  { %v1275_v9 = vpop.permute.xlu2 %1274  ;;  %1769 = vmatpush.msra.mxu3 %v1383_v54  ;;  %1426 = vmatpush.msrb.mxu1 %v1383_v54 }
0x2408   :  { %1277 = vst.msk [vmem:[#allocation3 + $0x8] sm:$0xff] %vm391_vm1, %v1275_v9  ;;  %v1338_v40 = vld [vmem:[#allocation3 + $0x28] sm:$0xff] }
0x2409   :  { %1359 = vrot.lane.b32.xlu2 %v1338_v40, %s2140_s30  ;;  %1770 = vmatpush.msra.mxu3 %v1382_v55 }
0x240a   :  { %1361 = vrot.lane.b32.xlu1 %v1339_v59, %s2140_s30  ;;  %1355 = vrot.lane.b32.xlu0 %v1336_v48, %s2140_s30 }
0x240b   :  { %1427 = vmatpush.msrb.mxu1 %v1382_v55 }
0x240f   :  { %v1220_v51 = vpop.permute.xlu2 %1219  ;;  %v1334_v52 = vld [vmem:[#allocation3 + $0x8] sm:$0xff] }
0x2410   :  { %1222 = vst.msk [vmem:[#allocation3 + $0x10] sm:$0xff] %vm391_vm1, %v1220_v51 }
0x2411   :  { %1351 = vrot.lane.b32.xlu2 %v1334_v52, %s2140_s30 }
0x2417   :  { %v1335_v53 = vld [vmem:[#allocation3 + $0x10] sm:$0xff] }
0x2418   :  { %1353 = vrot.lane.b32.xlu1 %v1335_v53, %s2140_s30 }
0x2463   :  { %v1360_v5 = vpop.permute.xlu2 %1359 }
0x2464   :  { %v2611_v6 = vsel %vm1373_vm3, %v1338_v40, %v1360_v5 }
0x246b   :  { %v1352_v13 = vpop.permute.xlu2 %1351 }
0x246c   :  { %v1330_v56 = vpop.permute.xlu0 %1329  ;;  %v1326_v61 = vpop.permute.xlu1 %1325  ;;  %v2626_v15 = vsel %vm1373_vm3, %v1334_v52, %v1352_v13 }
0x246d   :  { %1332 = vst.msk [vmem:[#allocation3] sm:$0xff] %vm391_vm1, %v1330_v56 }
0x2474   :  { %v945_v57 = vpop.permute.xlu0 %944  ;;  %v1333_v58 = vld [vmem:[#allocation3] sm:$0xff]  ;;  %v1358_v3 = vpop.permute.xlu1 %1357 }
0x2475   :  { %947 = vst.msk [vmem:[#allocation3 + $0x38] sm:$0xff] %vm391_vm1, %v945_v57  ;;  %1349 = vrot.lane.b32.xlu0 %v1333_v58, %s2140_s30  ;;  %v2606_v4 = vsel %vm1373_vm3, %v1337_v47, %v1358_v3 }
0x2476   :  { %1328 = vst.msk [vmem:[#allocation3 + $0x38] sm:$0xff] %vm335_vm0, %v1326_v61 }
0x247c   :  { %v1356_v62 = vpop.permute.xlu0 %1355  ;;  %v1362_v7 = vpop.permute.xlu1 %1361 }
0x247d   :  { %v2600_v11 = vsel %vm1373_vm3, %v1336_v48, %v1356_v62  ;;  %v1340_v63 = vld [vmem:[#allocation3 + $0x38] sm:$0xff]  ;;  %v2616_v33 = vsel %vm1373_vm3, %v1339_v59, %v1362_v7 }
0x247e   :  { %1363 = vrot.lane.b32.xlu0 %v1340_v63, %s2140_s30  ;;  %1752 = vmatmul.msk.f32.vlgmr.msra.gmra.mxu3 %vm335_vm0, %v2600_v11 }
0x2486   :  { %1753 = vmatmul.msk.f32.gmra.mxu3 %vm335_vm0, %v2606_v4 }
0x248a   :  { %v1354_v10 = vpop.permute.xlu1 %1353 }
0x248b   :  { %v2636_v18 = vsel %vm1373_vm3, %v1335_v53, %v1354_v10 }
0x248e   :  { %1754 = vmatmul.msk.f32.gmra.mxu3 %vm335_vm0, %v2611_v6 }
0x2496   :  { %1755 = vmatmul.msk.f32.gmra.mxu3 %vm335_vm0, %v2616_v33 }
0x24e7   :  { %v1350_v8 = vpop.permute.xlu0 %1349 }
0x24e8   :  { %v2621_v12 = vsel %vm1373_vm3, %v1333_v58, %v1350_v8 }
0x24e9   :  { %1749 = vmatmul.msk.f32.vlgmr.msrb.gmra.mxu1 %vm335_vm0, %v2621_v12 }
0x24f0   :  { %v1364_v14 = vpop.permute.xlu0 %1363 }
0x24f1   :  { %1750 = vmatmul.msk.f32.gmra.mxu1 %vm335_vm0, %v2626_v15  ;;  %v2631_v17 = vsel %vm1373_vm3, %v1340_v63, %v1364_v14  ;;  %v1805_v63 = vld [vmem:[%s2709_s12 + $0x1] ss:$0 sm:$0xff] }
0x24f2   :  { %1756 = vmatmul.msk.f32.gmra.mxu3 %vm335_vm0, %v2631_v17 }
0x24f9   :  { %1751 = vmatmul.msk.f32.gmra.mxu1 %vm335_vm0, %v2636_v18 }
0x2501   :  { %v1438_v20 = vpop.f32.mrf.mxu3 }
0x2502   :  { %v1439_v21 = vadd.f32 %v1803_v19, %v1438_v20 }
0x2504   :  { %v1456_v23 = vmax.f32 %v1439_v21, 0.0 }
0x2506   :  { %v1468_v24 = vmul.f32 %v1804_v50, %v1456_v23 }
0x2508   :  { %v1482_v27 = vsel %vm1373_vm3, %v1468_v24, 0.0 }
0x2509   :  { %v1441_v22 = vpop.f32.mrf.mxu3  ;;  %1483 = vadd.xlane.f32.xlu2 %v1482_v27 }
0x250a   :  { %v1442_v28 = vadd.f32 %v1803_v19, %v1441_v22 }
0x250c   :  { %v1457_v2 = vmax.f32 %v1442_v28, 0.0 }
0x250e   :  { %v1469_v29 = vmul.f32 %v1804_v50, %v1457_v2 }
0x2510   :  { %v1485_v31 = vsel %vm1373_vm3, %v1469_v29, 0.0 }
0x2511   :  { %1486 = vadd.xlane.f32.xlu2 %v1485_v31  ;;  %v1444_v0 = vpop.f32.mrf.mxu3 }
0x2512   :  { %v1445_v44 = vadd.f32 %v1803_v19, %v1444_v0 }
0x2514   :  { %v1458_v26 = vmax.f32 %v1445_v44, 0.0 }
0x2516   :  { %v1470_v40 = vmul.f32 %v1804_v50, %v1458_v26 }
0x2518   :  { %v1488_v16 = vsel %vm1373_vm3, %v1470_v40, 0.0 }
0x2519   :  { %v1447_v39 = vpop.f32.mrf.mxu3 }
0x251a   :  { %v1448_v47 = vadd.f32 %v1803_v19, %v1447_v39 }
0x251c   :  { %v1459_v52 = vmax.f32 %v1448_v47, 0.0 }
0x251e   :  { %v1471_v60 = vmul.f32 %v1804_v50, %v1459_v52 }
0x2520   :  { %v1491_v54 = vsel %vm1373_vm3, %v1471_v60, 0.0 }
0x2566   :  { %v1429_v36 = vpop.f32.mrf.mxu1 }
0x2567   :  { %v1430_v34 = vadd.f32 %v1803_v19, %v1429_v36 }
0x2569   :  { %v1453_v37 = vmax.f32 %v1430_v34, 0.0 }
0x256b   :  { %v1465_v38 = vmul.f32 %v1804_v50, %v1453_v37 }
0x256d   :  { %v1473_v41 = vsel %vm1373_vm3, %v1465_v38, 0.0 }
0x256e   :  { %1474 = vadd.xlane.f32.xlu2 %v1473_v41  ;;  %v1432_v42 = vpop.f32.mrf.mxu1 }
0x256f   :  { %v1433_v43 = vadd.f32 %v1803_v19, %v1432_v42 }
0x2571   :  { %v1454_v1 = vmax.f32 %v1433_v43, 0.0 }
0x2573   :  { %v1466_v32 = vmul.f32 %v1804_v50, %v1454_v1 }
0x2575   :  { %v1450_v25 = vpop.f32.mrf.mxu3  ;;  %v1476_v45 = vsel %vm1373_vm3, %v1466_v32, 0.0 }
0x2576   :  { %v1451_v30 = vadd.f32 %v1803_v19, %v1450_v25  ;;  %v1435_v49 = vpop.f32.mrf.mxu1  ;;  %1477 = vadd.xlane.f32.xlu0 %v1476_v45 }
0x2577   :  { %v1436_v35 = vadd.f32 %v1803_v19, %v1435_v49 }
0x2578   :  { %v1460_v46 = vmax.f32 %v1451_v30, 0.0 }
0x2579   :  { %v1455_v9 = vmax.f32 %v1436_v35, 0.0 }
0x257a   :  { %v1472_v59 = vmul.f32 %v1804_v50, %v1460_v46 }
0x257b   :  { %v1467_v48 = vmul.f32 %v1804_v50, %v1455_v9 }
0x257c   :  { %v1494_v51 = vsel %vm1373_vm3, %v1472_v59, 0.0  ;;  %v1484_v55 = vpop.xlane.xlu2 %1483 }
0x257d   :  { %1495 = vadd.xlane.f32.xlu2 %v1494_v51  ;;  %v1479_v53 = vsel %vm1373_vm3, %v1467_v48, 0.0  ;;  %v1502_v14 = vadd.f32 %v1805_v63, %v1484_v55 }
0x257e   :  { %1480 = vadd.xlane.f32.xlu1 %v1479_v53  ;;  %1489 = vadd.xlane.f32.xlu0 %v1488_v16 }
0x257f   :  { %v1511_v28 = vsel %vm1507_vm4, %v1502_v14, -inf }
0x2584   :  { %v1487_v56 = vpop.xlane.xlu2 %1486 }
0x2585   :  { %v1503_v10 = vadd.f32 %v1805_v63, %v1487_v56 }
0x2586   :  { %1492 = vadd.xlane.f32.xlu1 %v1491_v54 }
0x2587   :  { %v1512_v2 = vsel %vm1507_vm4, %v1503_v10, -inf }
0x25e1   :  { %v1475_v58 = vpop.xlane.xlu2 %1474 }
0x25e2   :  { %v1499_v7 = vadd.f32 %v1805_v63, %v1475_v58 }
0x25e4   :  { %v1508_v50 = vsel %vm1507_vm4, %v1499_v7, -inf }
0x25e5   :  { %v1513_v0 = vmax.f32 %v1508_v50, %v1512_v2 }
0x25e9   :  { %v1478_v57 = vpop.xlane.xlu0 %1477 }
0x25ea   :  { %v1500_v8 = vadd.f32 %v1805_v63, %v1478_v57 }
0x25ec   :  { %v1509_v23 = vsel %vm1507_vm4, %v1500_v8, -inf }
0x25f0   :  { %v1496_v3 = vpop.xlane.xlu2 %1495 }
0x25f1   :  { %v1481_v61 = vpop.xlane.xlu1 %1480  ;;  %v1490_v62 = vpop.xlane.xlu0 %1489  ;;  %v1506_v13 = vadd.f32 %v1805_v63, %v1496_v3 }
0x25f2   :  { %v1504_v5 = vadd.f32 %v1805_v63, %v1490_v62  ;;  %v1501_v19 = vadd.f32 %v1805_v63, %v1481_v61 }
0x25f3   :  { %v1518_v24 = vsel %vm1507_vm4, %v1506_v13, -inf }
0x25f4   :  { %v1514_v20 = vsel %vm1507_vm4, %v1504_v5, -inf  ;;  %v1510_v29 = vsel %vm1507_vm4, %v1501_v19, -inf  ;;  %v1519_v36 = vmax.f32 %v1511_v28, %v1518_v24 }
0x25f5   :  { %v1515_v22 = vmax.f32 %v1509_v23, %v1514_v20 }
0x25f7   :  { %v1520_v37 = vmax.f32 %v1513_v0, %v1515_v22 }
0x25f9   :  { %v1493_v21 = vpop.xlane.xlu1 %1492 }
0x25fa   :  { %v1505_v27 = vadd.f32 %v1805_v63, %v1493_v21 }
0x25fc   :  { %v1516_v31 = vsel %vm1507_vm4, %v1505_v27, -inf }
0x25fd   :  { %v1517_v34 = vmax.f32 %v1510_v29, %v1516_v31 }
0x25ff   :  { %v1521_v38 = vmax.f32 %v1517_v34, %v1519_v36 }
0x2601   :  { %v1522_v39 = vmax.f32 %v1520_v37, %v1521_v38 }
0x2603   :  { %v1523_v41 = vsub.f32 %v1499_v7, %v1522_v39  ;;  %v1524_v42 = vsub.f32 %v1500_v8, %v1522_v39  ;;  %v1525_v43 = vsub.f32 %v1501_v19, %v1522_v39  ;;  %v1526_v44 = vsub.f32 %v1502_v14, %v1522_v39 }
0x2604   :  { %v1527_v1 = vsub.f32 %v1503_v10, %v1522_v39  ;;  %v1528_v45 = vsub.f32 %v1504_v5, %v1522_v39  ;;  %v1529_v49 = vsub.f32 %v1505_v27, %v1522_v39  ;;  %v1530_v46 = vsub.f32 %v1506_v13, %v1522_v39 }
0x2605   :  { %v1531_v32 = vmul.f32 1.442695, %v1523_v41  ;;  %v1533_v26 = vmul.f32 1.442695, %v1524_v42  ;;  %v1535_v25 = vmul.f32 1.442695, %v1525_v43 }
0x2606   :  { %v1537_v30 = vmul.f32 1.442695, %v1526_v44  ;;  %v1539_v35 = vmul.f32 1.442695, %v1527_v1  ;;  %v1541_v47 = vmul.f32 1.442695, %v1528_v45 }
0x2607   :  { %1904 = vpow2.f32 %v1531_v32  ;;  %v1543_v9 = vmul.f32 1.442695, %v1529_v49  ;;  %v1545_v48 = vmul.f32 1.442695, %v1530_v46  ;;  %v1650_v42 = vld [vmem:[#allocation13 + $0x18] sm:$0xff]  ;;  %v1649_v43 = vld [vmem:[#allocation13 + $0x10] sm:$0xff] }
0x2608   :  { %1906 = vpow2.f32 %v1533_v26  ;;  %1668 = vmatpush.msra.mxu1 %v1650_v42  ;;  %v1648_v44 = vld [vmem:[#allocation13 + $0x8] sm:$0xff]  ;;  %v1647_v1 = vld [vmem:[#allocation13] sm:$0xff]  ;;  %v1680_v26 = vld [vmem:[#allocation15 + $0x18] sm:$0xff] }
0x2609   :  { %1908 = vpow2.f32 %v1535_v25  ;;  %v1679_v25 = vld [vmem:[#allocation15 + $0x10] sm:$0xff]  ;;  %1698 = vmatpush.msra.mxu2 %v1680_v26 }
0x260a   :  { %1910 = vpow2.f32 %v1537_v30  ;;  %1669 = vmatpush.msra.mxu1 %v1649_v43 }
0x260b   :  { %1912 = vpow2.f32 %v1539_v35  ;;  %1699 = vmatpush.msra.mxu2 %v1679_v25 }
0x260c   :  { %1914 = vpow2.f32 %v1541_v47  ;;  %1670 = vmatpush.msra.mxu1 %v1648_v44 }
0x260d   :  { %v1905_v40 = vpop.eup %1904  ;;  %1916 = vpow2.f32 %v1543_v9 }
0x260e   :  { %v1907_v59 = vpop.eup %1906  ;;  %v1547_v51 = vsel %vm1507_vm4, %v1905_v40, 0.0  ;;  %1918 = vpow2.f32 %v1545_v48  ;;  %1671 = vmatpush.msra.mxu1 %v1647_v1 }
0x260f   :  { %v1909_v52 = vpop.eup %1908  ;;  %v1548_v53 = vsel %vm1507_vm4, %v1907_v59, 0.0 }
0x2610   :  { %v1911_v16 = vpop.eup %1910  ;;  %v1549_v60 = vadd.f32 %v1548_v53, %v1547_v51  ;;  %v1550_v54 = vsel %vm1507_vm4, %v1909_v52, 0.0 }
0x2611   :  { %v1913_v55 = vpop.eup %1912  ;;  %v1552_v57 = vsel %vm1507_vm4, %v1911_v16, 0.0 }
0x2612   :  { %v1551_v56 = vadd.f32 %v1550_v54, %v1549_v60  ;;  %v1915_v58 = vpop.eup %1914  ;;  %v1554_v62 = vsel %vm1507_vm4, %v1913_v55, 0.0 }
0x2613   :  { %v1917_v63 = vpop.eup %1916  ;;  %v1556_v5 = vsel %vm1507_vm4, %v1915_v58, 0.0 }
0x2614   :  { %v1553_v61 = vadd.f32 %v1552_v57, %v1551_v56  ;;  %v1919_v7 = vpop.eup %1918  ;;  %v1558_v13 = vsel %vm1507_vm4, %v1917_v63, 0.0 }
0x2615   :  { %v1560_v10 = vsel %vm1507_vm4, %v1919_v7, 0.0 }
0x2616   :  { %v1555_v3 = vadd.f32 %v1554_v62, %v1553_v61 }
0x2618   :  { %v1557_v8 = vadd.f32 %v1556_v5, %v1555_v3 }
0x261a   :  { %v1559_v14 = vadd.f32 %v1558_v13, %v1557_v8  ;;  %v1677_v8 = vld [vmem:[#allocation15] sm:$0xff] }
0x261c   :  { %v1561_v19 = vadd.f32 %v1560_v10, %v1559_v14  ;;  %v1807_v14 = vld [vmem:[%s2709_s12 + $0x3] ss:$0 sm:$0xff] }
0x261e   :  { %1920 = vrcp.f32 %v1561_v19  ;;  %v1573_v23 = vand.u32 2147483648, %v1561_v19  ;;  %v1571_v27 = vand.u32 2147483647, %v1561_v19  ;;  %vm1567_vm6 = vweird.f32 %v1561_v19 }
0x2620   :  { %v1574_v28 = vor.u32 1.1754944e-38, %v1573_v23  ;;  %vm1572_vm8 = vcmp.eq.f32.partialorder %v1571_v27, 8.507059e+37 }
0x2624   :  { %v1921_v20 = vpop.eup %1920 }
0x2625   :  { %v1563_v21 = vmul.f32 %v1921_v20, %v1561_v19  ;;  %vm1568_vm5 = vweird.f32 %v1921_v20 }
0x2626   :  { %vm1569_vm7 = vmor %vm1567_vm6, %vm1568_vm5 }
0x2627   :  { %v1564_v50 = vsub.f32 1.0, %v1563_v21 }
0x2629   :  { %v1565_v24 = vmul.f32 %v1921_v20, %v1564_v50 }
0x262b   :  { %v1566_v22 = vadd.f32 %v1921_v20, %v1565_v24 }
0x262d   :  { %v1570_v2 = vsel %vm1569_vm7, %v1921_v20, %v1566_v22 }
0x262e   :  { %v1575_v29 = vsel %vm1572_vm8, %v1574_v28, %v1570_v2 }
0x262f   :  { %v1578_v31 = vmul.f32 %v1909_v52, %v1575_v29  ;;  %v1577_v0 = vmul.f32 %v1907_v59, %v1575_v29  ;;  %v1576_v36 = vmul.f32 %v1905_v40, %v1575_v29  ;;  %v1580_v34 = vmul.f32 %v1913_v55, %v1575_v29 }
0x2630   :  { %v1579_v37 = vmul.f32 %v1911_v16, %v1575_v29  ;;  %v1583_v38 = vmul.f32 %v1919_v7, %v1575_v29  ;;  %v1582_v39 = vmul.f32 %v1917_v63, %v1575_v29  ;;  %v1581_v41 = vmul.f32 %v1915_v58, %v1575_v29  ;;  %v1678_v7 = vld [vmem:[#allocation15 + $0x8] sm:$0xff] }
0x2631   :  { %1596 = vperm.xlu2 %1798, %v1578_v31   ;;  %1591 = vperm.xlu1 %1797, %v1577_v0  }
0x2632   :  { %1586 = vperm.xlu0 %1796, %v1576_v36   ;;  %1700 = vmatpush.msra.mxu2 %v1678_v7 }
0x2634   :  { %1701 = vmatpush.msra.mxu2 %v1677_v8 }
0x2639   :  { %1606 = vperm.xlu2 %1798, %v1580_v34   ;;  %1601 = vperm.xlu1 %1797, %v1579_v37  }
0x263a   :  { %1621 = vperm.xlu0 %1796, %v1583_v38  }
0x2641   :  { %1616 = vperm.xlu2 %1798, %v1582_v39   ;;  %1611 = vperm.xlu1 %1797, %v1581_v41  }
0x268b   :  { %v1597_v32 = vpop.permute.xlu2 %1596 }
0x268c   :  { %v1626_v40 = vmul.f32 %v1597_v32, %v2636_v18 }
0x268e   :  { %v1635_v52 = vsel %vm335_vm0, %v1626_v40, 0.0 }
0x2693   :  { %v1607_v46 = vpop.permute.xlu2 %1606 }
0x269b   :  { %v1617_v60 = vpop.permute.xlu2 %1616 }
0x269c   :  { %v1630_v57 = vmul.f32 %v1617_v60, %v2616_v33 }
0x269e   :  { %v1643_v63 = vsel %vm335_vm0, %v1630_v57, 0.0 }
0x26a3   :  { %v1592_v45 = vpop.permute.xlu1 %1591 }
0x26a4   :  { %v1625_v30 = vmul.f32 %v1592_v45, %v2626_v15  ;;  %v1587_v49 = vpop.permute.xlu0 %1586  ;;  %v1628_v15 = vmul.f32 %v1607_v46, %v2606_v4 }
0x26a5   :  { %v1624_v35 = vmul.f32 %v1587_v49, %v2621_v12 }
0x26a6   :  { %v1633_v47 = vsel %vm335_vm0, %v1625_v30, 0.0  ;;  %v1639_v56 = vsel %vm335_vm0, %v1628_v15, 0.0 }
0x26a7   :  { %v1632_v9 = vsel %vm335_vm0, %v1624_v35, 0.0 }
0x26a8   :  { %v1634_v59 = vadd.f32 %v1633_v47, %v1632_v9 }
0x26aa   :  { %v1636_v16 = vadd.f32 %v1635_v52, %v1634_v59 }
0x26ab   :  { %v1602_v48 = vpop.permute.xlu1 %1601 }
0x26ac   :  { %v1627_v51 = vmul.f32 %v1602_v48, %v2600_v11  ;;  %v1622_v54 = vpop.permute.xlu0 %1621 }
0x26ad   :  { %v1631_v11 = vmul.f32 %v1622_v54, %v2631_v17 }
0x26ae   :  { %v1637_v53 = vsel %vm335_vm0, %v1627_v51, 0.0 }
0x26af   :  { %v1638_v12 = vadd.f32 %v1637_v53, %v1636_v16  ;;  %v1645_v4 = vsel %vm335_vm0, %v1631_v11, 0.0 }
0x26b1   :  { %v1640_v58 = vadd.f32 %v1639_v56, %v1638_v12 }
0x26b3   :  { %v1612_v55 = vpop.permute.xlu1 %1611 }
0x26b4   :  { %v1629_v18 = vmul.f32 %v1612_v55, %v2611_v6  ;;  %v1806_v6 = vld [vmem:[%s2709_s12 + $0x2] ss:$0 sm:$0xff] }
0x26b6   :  { %v1641_v61 = vsel %vm335_vm0, %v1629_v18, 0.0 }
0x26b7   :  { %v1642_v62 = vadd.f32 %v1641_v61, %v1640_v58 }
0x26b9   :  { %v1644_v3 = vadd.f32 %v1643_v63, %v1642_v62 }
0x26bb   :  { %v1646_v5 = vadd.f32 %v1645_v4, %v1644_v3 }
0x26bd   :  { %1757 = vmatmul.msk.f32.vlgmr.msra.gmra.mxu1 %vm335_vm0, %v1646_v5 }
0x273a   :  { %v1673_v33 = vpop.f32.mrf.mxu1 }
0x273b   :  { %v1674_v17 = vadd.f32 %v1806_v6, %v1673_v33 }
0x273d   :  { %v1676_v13 = vmax.f32 %v1674_v17, 0.0 }
0x273f   :  { %1758 = vmatmul.msk.f32.vlgmr.msra.gmra.mxu2 %vm335_vm0, %v1676_v13 }
0x27c2   :  { %v1703_v10 = vpop.f32.mrf.mxu2 }
0x27c3   :  { %v1704_v19 = vadd.f32 %v1807_v14, %v1703_v10 }
0x27c5   :  { %1706 = vst [vmem:[#allocation16] sm:$0xff] %v1704_v19 }
0x27c6   :  { %1717 = dma.vmem_to_hbm [thread:$0]  %s1713_s24, 128, %s1715_s2, [#allocation6]  }
0x27c7   :  { %2122 = dma.done.wait [#allocation6], 128  }
0x27c8   :  { %2123 = vsyncadd [#allocation6], 4294967168 }
0x27c9   :  { %1722 = vsyncpa [#allocation5], 1 }
0x27ca   :  { %1723 = vsyncpa [#allocation8], 1 }
0x27cb   :  { %1724 = vsyncpa [#allocation11], 1 }
0x27cc   :  { %1725 = vsyncpa [#allocation14], 1 }
0x27cd   :  { %1726 = vsyncpa [#allocation6], 1 }

</bundles_post_ra>
